<compile_context>
chip_gen: v7x
topology: tpu7x:2x2x1
jax: 0.10.0
libtpu: 0.0.40
codegen_flags: <defaults>
</compile_context>

<pallas_src>
import math

import jax
import jax.numpy as jnp
from jax.experimental import pallas as pl
from jax.experimental.pallas import tpu as pltpu


def rcab_kernel(x_ref, w1_ref, b1_ref, w2_ref, b2_ref,
                wd1_ref, bd1_ref, wd2_ref, bd2_ref,
                out_ref, pad_ref, col_ref):
    """Fused RCAB forward for one image.

    x_ref:   (H, W, C)          input image (NHWC, batch squeezed by BlockSpec)
    w*_ref:  (9*C, C)  bf16     3x3 conv weights in im2col layout ((ky,kx,cin) x cout)
    b*_ref:  (1, C)    f32      conv biases
    wd1_ref: (C, Cr), bd1_ref: (1, Cr)   CALayer squeeze 1x1 conv
    wd2_ref: (Cr, C), bd2_ref: (1, C)    CALayer excite 1x1 conv
    pad_ref: (H+2, W+2, C) f32  zero-border padded conv input (reused by both convs)
    col_ref: (H, W, 9*C) bf16   im2col patch matrix (reused by both convs)
    """
    H, W, C = x_ref.shape

    # ---- zero ONLY the 1-pixel border of the padded scratch ------------------
    # (the interior is fully overwritten below and never touches the border,
    #  so this is all the zeroing needed; done per step for megacore safety)
    pad_ref[0:1, :, :] = jnp.zeros((1, W + 2, C), jnp.float32)
    pad_ref[H + 1:H + 2, :, :] = jnp.zeros((1, W + 2, C), jnp.float32)
    pad_ref[1:H + 1, 0:1, :] = jnp.zeros((H, 1, C), jnp.float32)
    pad_ref[1:H + 1, W + 1:W + 2, :] = jnp.zeros((H, 1, C), jnp.float32)

    def conv3x3(w_ref, b_ref):
        # Build the im2col matrix once (each shifted patch read exactly once),
        # then a single dense (H*W, 9C) @ (9C, C) bf16 matmul, f32 accumulate.
        for ky in range(3):
            for kx in range(3):
                t = ky * 3 + kx
                col_ref[:, :, t * C:(t + 1) * C] = (
                    pad_ref[ky:ky + H, kx:kx + W, :].astype(jnp.bfloat16))
        # (H, W, 9C) -> (H*W, 9C): only major dims merge, layout-free reshape.
        patches = col_ref[...].reshape(H * W, 9 * C)
        acc = jnp.dot(patches, w_ref[...],
                      preferred_element_type=jnp.float32)       # (H*W, C) f32
        return acc + b_ref[...]

    # ---- conv1 (3x3, same padding, bias) + ReLU ------------------------------
    pad_ref[1:H + 1, 1:W + 1, :] = x_ref[...].astype(jnp.float32)
    h1 = jnp.maximum(conv3x3(w1_ref, b1_ref), 0.0)               # (H*W, C)

    # ---- conv2 (3x3, same padding, bias) -------------------------------------
    pad_ref[1:H + 1, 1:W + 1, :] = h1.reshape(H, W, C)
    res = conv3x3(w2_ref, b2_ref)                                # (H*W, C)

    # ---- CALayer: global avg pool + 1x1 convs + sigmoid gate -----------------
    pooled = jnp.mean(res, axis=0, keepdims=True)                # (1, C)
    z = jnp.maximum(jnp.dot(pooled, wd1_ref[...],
                            preferred_element_type=jnp.float32) + bd1_ref[...],
                    0.0)                                         # (1, Cr)
    gate = jax.nn.sigmoid(jnp.dot(z, wd2_ref[...],
                                  preferred_element_type=jnp.float32)
                          + bd2_ref[...])                        # (1, C)

    # ---- channel scale + residual (x re-read here, not kept live) ------------
    out = (res * gate).reshape(H, W, C) + x_ref[...].astype(jnp.float32)
    out_ref[...] = out.astype(out_ref.dtype)


def rcab_forward(x_nchw, params):
    """RCAB forward. x_nchw: (N, C, H, W) float32 -> (N, C, H, W)."""
    x = jnp.transpose(x_nchw, (0, 2, 3, 1))                      # NHWC
    N, H, W, C = x.shape
    Cr = params["wd1"].shape[1]

    # Host-side (free): im2col weight layout + bf16 cast for MXU-native matmuls.
    w1_r = params["w1"].reshape(9 * C, C).astype(jnp.bfloat16)
    w2_r = params["w2"].reshape(9 * C, C).astype(jnp.bfloat16)

    # Advisory cost hint for the XLA scheduler around the custom call.
    conv_flops = 2 * 2 * (H * W) * (9 * C) * C                   # 2 convs / image
    ca_flops = 2 * (C * Cr) * 2 + H * W * C                      # 1x1s + pool-ish
    cost = pl.CostEstimate(
        flops=N * (conv_flops + ca_flops),
        transcendentals=N * C,                                   # sigmoid
        bytes_accessed=(2 * N * H * W * C * 4                    # x in + out
                        + 2 * 9 * C * C * 2                      # conv weights bf16
                        + 2 * C * Cr * 4 + 2 * C * 4 + Cr * 4))  # CA weights/biases

    # TODO(synk): for production RCAN resolutions (C=64, H/W in the hundreds),
    # strip-tile H with a 1-row halo (manual DMA from a pl.ANY ref) so the
    # padded / im2col scratches stay bounded (v7x has only 64 MiB VMEM).

    out_nhwc = pl.pallas_call(
        rcab_kernel,
        out_shape=jax.ShapeDtypeStruct((N, H, W, C), x.dtype),
        grid_spec=pltpu.PrefetchScalarGridSpec(
            num_scalar_prefetch=0,
            grid=(N,),
            in_specs=[
                pl.BlockSpec((None, H, W, C), lambda n: (n, 0, 0, 0)),
                pl.BlockSpec((9 * C, C), lambda n: (0, 0)),
                pl.BlockSpec((1, C), lambda n: (0, 0)),
                pl.BlockSpec((9 * C, C), lambda n: (0, 0)),
                pl.BlockSpec((1, C), lambda n: (0, 0)),
                pl.BlockSpec((C, Cr), lambda n: (0, 0)),
                pl.BlockSpec((1, Cr), lambda n: (0, 0)),
                pl.BlockSpec((Cr, C), lambda n: (0, 0)),
                pl.BlockSpec((1, C), lambda n: (0, 0)),
            ],
            out_specs=pl.BlockSpec((None, H, W, C), lambda n: (n, 0, 0, 0)),
            scratch_shapes=[
                pltpu.VMEM((H + 2, W + 2, C), jnp.float32),      # padded input
                pltpu.VMEM((H, W, 9 * C), jnp.bfloat16),         # im2col matrix
            ],
        ),
        compiler_params=pltpu.CompilerParams(
            dimension_semantics=("parallel",)),                  # 2 TCs on v7x
        cost_estimate=cost,
    )(x, w1_r, params["b1"], w2_r, params["b2"],
      params["wd1"], params["bd1"], params["wd2"], params["bd2"])

    return jnp.transpose(out_nhwc, (0, 3, 1, 2))                 # back to NCHW


def rcab_reference(x_nchw, params):
    """Pure-JAX f32 reference (matches PyTorch RCAB forward)."""
    x = jnp.transpose(x_nchw, (0, 2, 3, 1))                      # NHWC

    def conv(inp, w, b):
        y = jax.lax.conv_general_dilated(
            inp, w, window_strides=(1, 1), padding="SAME",
            dimension_numbers=("NHWC", "HWIO", "NHWC"))
        return y + b.reshape(1, 1, 1, -1)

    h = jax.nn.relu(conv(x, params["w1"], params["b1"]))
    res = conv(h, params["w2"], params["b2"])
    pooled = jnp.mean(res, axis=(1, 2))                          # (N, C)
    z = jax.nn.relu(pooled @ params["wd1"] + params["bd1"])
    gate = jax.nn.sigmoid(z @ params["wd2"] + params["bd2"])
    out = res * gate[:, None, None, :] + x
    return jnp.transpose(out, (0, 3, 1, 2))


def make_params(key, n_feat, reduction, kernel_size=3):
    c, cr = n_feat, n_feat // reduction
    ks = jax.random.split(key, 8)
    s_conv = 1.0 / math.sqrt(kernel_size * kernel_size * c)
    s_du1 = 1.0 / math.sqrt(c)
    s_du2 = 1.0 / math.sqrt(max(cr, 1))
    return {
        "w1": jax.random.normal(ks[0], (kernel_size, kernel_size, c, c), jnp.float32) * s_conv,
        "b1": jax.random.normal(ks[1], (1, c), jnp.float32) * 0.01,
        "w2": jax.random.normal(ks[2], (kernel_size, kernel_size, c, c), jnp.float32) * s_conv,
        "b2": jax.random.normal(ks[3], (1, c), jnp.float32) * 0.01,
        "wd1": jax.random.normal(ks[4], (c, cr), jnp.float32) * s_du1,
        "bd1": jax.random.normal(ks[5], (1, cr), jnp.float32) * 0.01,
        "wd2": jax.random.normal(ks[6], (cr, c), jnp.float32) * s_du2,
        "bd2": jax.random.normal(ks[7], (1, c), jnp.float32) * 0.01,
    }


if __name__ == "__main__":
    N, C, H, W = 2, 32, 16, 16          # n_feat=32, kernel_size=3
    reduction = 8                       # -> squeeze channels = 4

    key = jax.random.PRNGKey(0)
    kx, kp = jax.random.split(key)
    x = jax.random.normal(kx, (N, C, H, W), jnp.float32)         # NCHW like PyTorch
    params = make_params(kp, C, reduction)

    out = rcab_forward(x, params)
    out = jax.block_until_ready(out)

    ref = jax.block_until_ready(rcab_reference(x, params))
    assert out.shape == (N, C, H, W)
    # bf16 MXU operands with f32 accumulation -> relaxed tolerance vs f32 reference.
    assert jnp.allclose(out, ref, atol=5e-2, rtol=5e-2), (
        f"max abs err = {jnp.max(jnp.abs(out - ref))}")

    print("KERNEL_OK")
</pallas_src>

<mosaic_0001>
module attributes {stable_mosaic.version = 11 : i64} {
  func.func @rcab_kernel(%arg0: i32, %arg1: memref<1x16x16x32xf32, #tpu.memory_space<vmem>>, %arg2: memref<288x32xbf16, #tpu.memory_space<vmem>>, %arg3: memref<1x32xf32, #tpu.memory_space<vmem>>, %arg4: memref<288x32xbf16, #tpu.memory_space<vmem>>, %arg5: memref<1x32xf32, #tpu.memory_space<vmem>>, %arg6: memref<32x4xf32, #tpu.memory_space<vmem>>, %arg7: memref<1x4xf32, #tpu.memory_space<vmem>>, %arg8: memref<4x32xf32, #tpu.memory_space<vmem>>, %arg9: memref<1x32xf32, #tpu.memory_space<vmem>>, %arg10: memref<1x16x16x32xf32, #tpu.memory_space<vmem>>, %arg11: memref<18x18x32xf32, #tpu.memory_space<vmem>>, %arg12: memref<16x16x288xbf16, #tpu.memory_space<vmem>>) attributes {dimension_semantics = [#tpu.dimension_semantics<parallel>], iteration_bounds = array<i64: 2>, scalar_prefetch = 0 : i64, scratch_operands = 2 : i64, tpu.core_type = #tpu.core_type<tc>, window_params = [{transform_indices = @transform_0, window_bounds = array<i64: 1, 16, 16, 32>}, {pipeline_mode = #tpu.pipeline_mode<synchronous>, transform_indices = @transform_1, window_bounds = array<i64: 288, 32>}, {pipeline_mode = #tpu.pipeline_mode<synchronous>, transform_indices = @transform_2, window_bounds = array<i64: 1, 32>}, {pipeline_mode = #tpu.pipeline_mode<synchronous>, transform_indices = @transform_3, window_bounds = array<i64: 288, 32>}, {pipeline_mode = #tpu.pipeline_mode<synchronous>, transform_indices = @transform_4, window_bounds = array<i64: 1, 32>}, {pipeline_mode = #tpu.pipeline_mode<synchronous>, transform_indices = @transform_5, window_bounds = array<i64: 32, 4>}, {pipeline_mode = #tpu.pipeline_mode<synchronous>, transform_indices = @transform_6, window_bounds = array<i64: 1, 4>}, {pipeline_mode = #tpu.pipeline_mode<synchronous>, transform_indices = @transform_7, window_bounds = array<i64: 4, 32>}, {pipeline_mode = #tpu.pipeline_mode<synchronous>, transform_indices = @transform_8, window_bounds = array<i64: 1, 32>}, {transform_indices = @transform_9, window_bounds = array<i64: 1, 16, 16, 32>}]} {
    %cst = arith.constant 0.000000e+00 : f32
    %0 = vector.broadcast %cst : f32 to vector<1x18x32xf32>
    %c0 = arith.constant 0 : index
    %c0_0 = arith.constant 0 : index
    %c0_1 = arith.constant 0 : index
    %1 = vector.load %arg11[%c0, %c0_0, %c0_1] : memref<18x18x32xf32, #tpu.memory_space<vmem>>, vector<1x18x32xf32>
    tpu.vector_store %arg11[%c0, %c0_0, %c0_1], %0 {strides = array<i32>} : memref<18x18x32xf32, #tpu.memory_space<vmem>>, vector<1x18x32xf32>,
    %cst_2 = arith.constant 0.000000e+00 : f32
    %2 = vector.broadcast %cst_2 : f32 to vector<1x18x32xf32>
    %c17 = arith.constant 17 : index
    %c0_3 = arith.constant 0 : index
    %c0_4 = arith.constant 0 : index
    %3 = vector.load %arg11[%c17, %c0_3, %c0_4] : memref<18x18x32xf32, #tpu.memory_space<vmem>>, vector<1x18x32xf32>
    tpu.vector_store %arg11[%c17, %c0_3, %c0_4], %2 {strides = array<i32>} : memref<18x18x32xf32, #tpu.memory_space<vmem>>, vector<1x18x32xf32>,
    %cst_5 = arith.constant 0.000000e+00 : f32
    %4 = vector.broadcast %cst_5 : f32 to vector<16x1x32xf32>
    %c1 = arith.constant 1 : index
    %c0_6 = arith.constant 0 : index
    %c0_7 = arith.constant 0 : index
    %5 = vector.load %arg11[%c1, %c0_6, %c0_7] : memref<18x18x32xf32, #tpu.memory_space<vmem>>, vector<16x1x32xf32>
    tpu.vector_store %arg11[%c1, %c0_6, %c0_7], %4 {strides = array<i32>} : memref<18x18x32xf32, #tpu.memory_space<vmem>>, vector<16x1x32xf32>,
    %cst_8 = arith.constant 0.000000e+00 : f32
    %6 = vector.broadcast %cst_8 : f32 to vector<16x1x32xf32>
    %c1_9 = arith.constant 1 : index
    %c17_10 = arith.constant 17 : index
    %c0_11 = arith.constant 0 : index
    %7 = vector.load %arg11[%c1_9, %c17_10, %c0_11] : memref<18x18x32xf32, #tpu.memory_space<vmem>>, vector<16x1x32xf32>
    tpu.vector_store %arg11[%c1_9, %c17_10, %c0_11], %6 {strides = array<i32>} : memref<18x18x32xf32, #tpu.memory_space<vmem>>, vector<16x1x32xf32>,
    %c0_12 = arith.constant 0 : index
    %c0_13 = arith.constant 0 : index
    %c0_14 = arith.constant 0 : index
    %c0_15 = arith.constant 0 : index
    %8 = vector.load %arg1[%c0_12, %c0_13, %c0_14, %c0_15] : memref<1x16x16x32xf32, #tpu.memory_space<vmem>>, vector<1x16x16x32xf32>
    %9 = vector.shape_cast %8 : vector<1x16x16x32xf32> to vector<16x16x32xf32>
    %c1_16 = arith.constant 1 : index
    %c1_17 = arith.constant 1 : index
    %c0_18 = arith.constant 0 : index
    %10 = vector.load %arg11[%c1_16, %c1_17, %c0_18] : memref<18x18x32xf32, #tpu.memory_space<vmem>>, vector<16x16x32xf32>
    tpu.vector_store %arg11[%c1_16, %c1_17, %c0_18], %9 {strides = array<i32>} : memref<18x18x32xf32, #tpu.memory_space<vmem>>, vector<16x16x32xf32>,
    %c0_19 = arith.constant 0 : index
    %c0_20 = arith.constant 0 : index
    %c0_21 = arith.constant 0 : index
    %11 = vector.load %arg11[%c0_19, %c0_20, %c0_21] : memref<18x18x32xf32, #tpu.memory_space<vmem>>, vector<16x16x32xf32>
    %12 = arith.truncf %11 : vector<16x16x32xf32> to vector<16x16x32xbf16>
    %c0_22 = arith.constant 0 : index
    %c0_23 = arith.constant 0 : index
    %c0_24 = arith.constant 0 : index
    %13 = vector.load %arg12[%c0_22, %c0_23, %c0_24] : memref<16x16x288xbf16, #tpu.memory_space<vmem>>, vector<16x16x32xbf16>
    tpu.vector_store %arg12[%c0_22, %c0_23, %c0_24], %12 {strides = array<i32>} : memref<16x16x288xbf16, #tpu.memory_space<vmem>>, vector<16x16x32xbf16>,
    %c0_25 = arith.constant 0 : index
    %c1_26 = arith.constant 1 : index
    %c0_27 = arith.constant 0 : index
    %14 = vector.load %arg11[%c0_25, %c1_26, %c0_27] : memref<18x18x32xf32, #tpu.memory_space<vmem>>, vector<16x16x32xf32>
    %15 = arith.truncf %14 : vector<16x16x32xf32> to vector<16x16x32xbf16>
    %c0_28 = arith.constant 0 : index
    %c0_29 = arith.constant 0 : index
    %c32 = arith.constant 32 : index
    %16 = vector.load %arg12[%c0_28, %c0_29, %c32] : memref<16x16x288xbf16, #tpu.memory_space<vmem>>, vector<16x16x32xbf16>
    tpu.vector_store %arg12[%c0_28, %c0_29, %c32], %15 {strides = array<i32>} : memref<16x16x288xbf16, #tpu.memory_space<vmem>>, vector<16x16x32xbf16>,
    %c0_30 = arith.constant 0 : index
    %c2 = arith.constant 2 : index
    %c0_31 = arith.constant 0 : index
    %17 = vector.load %arg11[%c0_30, %c2, %c0_31] : memref<18x18x32xf32, #tpu.memory_space<vmem>>, vector<16x16x32xf32>
    %18 = arith.truncf %17 : vector<16x16x32xf32> to vector<16x16x32xbf16>
    %c0_32 = arith.constant 0 : index
    %c0_33 = arith.constant 0 : index
    %c64 = arith.constant 64 : index
    %19 = vector.load %arg12[%c0_32, %c0_33, %c64] : memref<16x16x288xbf16, #tpu.memory_space<vmem>>, vector<16x16x32xbf16>
    tpu.vector_store %arg12[%c0_32, %c0_33, %c64], %18 {strides = array<i32>} : memref<16x16x288xbf16, #tpu.memory_space<vmem>>, vector<16x16x32xbf16>,
    %c1_34 = arith.constant 1 : index
    %c0_35 = arith.constant 0 : index
    %c0_36 = arith.constant 0 : index
    %20 = vector.load %arg11[%c1_34, %c0_35, %c0_36] : memref<18x18x32xf32, #tpu.memory_space<vmem>>, vector<16x16x32xf32>
    %21 = arith.truncf %20 : vector<16x16x32xf32> to vector<16x16x32xbf16>
    %c0_37 = arith.constant 0 : index
    %c0_38 = arith.constant 0 : index
    %c96 = arith.constant 96 : index
    %22 = vector.load %arg12[%c0_37, %c0_38, %c96] : memref<16x16x288xbf16, #tpu.memory_space<vmem>>, vector<16x16x32xbf16>
    tpu.vector_store %arg12[%c0_37, %c0_38, %c96], %21 {strides = array<i32>} : memref<16x16x288xbf16, #tpu.memory_space<vmem>>, vector<16x16x32xbf16>,
    %c1_39 = arith.constant 1 : index
    %c1_40 = arith.constant 1 : index
    %c0_41 = arith.constant 0 : index
    %23 = vector.load %arg11[%c1_39, %c1_40, %c0_41] : memref<18x18x32xf32, #tpu.memory_space<vmem>>, vector<16x16x32xf32>
    %24 = arith.truncf %23 : vector<16x16x32xf32> to vector<16x16x32xbf16>
    %c0_42 = arith.constant 0 : index
    %c0_43 = arith.constant 0 : index
    %c128 = arith.constant 128 : index
    %25 = vector.load %arg12[%c0_42, %c0_43, %c128] : memref<16x16x288xbf16, #tpu.memory_space<vmem>>, vector<16x16x32xbf16>
    tpu.vector_store %arg12[%c0_42, %c0_43, %c128], %24 {strides = array<i32>} : memref<16x16x288xbf16, #tpu.memory_space<vmem>>, vector<16x16x32xbf16>,
    %c1_44 = arith.constant 1 : index
    %c2_45 = arith.constant 2 : index
    %c0_46 = arith.constant 0 : index
    %26 = vector.load %arg11[%c1_44, %c2_45, %c0_46] : memref<18x18x32xf32, #tpu.memory_space<vmem>>, vector<16x16x32xf32>
    %27 = arith.truncf %26 : vector<16x16x32xf32> to vector<16x16x32xbf16>
    %c0_47 = arith.constant 0 : index
    %c0_48 = arith.constant 0 : index
    %c160 = arith.constant 160 : index
    %28 = vector.load %arg12[%c0_47, %c0_48, %c160] : memref<16x16x288xbf16, #tpu.memory_space<vmem>>, vector<16x16x32xbf16>
    tpu.vector_store %arg12[%c0_47, %c0_48, %c160], %27 {strides = array<i32>} : memref<16x16x288xbf16, #tpu.memory_space<vmem>>, vector<16x16x32xbf16>,
    %c2_49 = arith.constant 2 : index
    %c0_50 = arith.constant 0 : index
    %c0_51 = arith.constant 0 : index
    %29 = vector.load %arg11[%c2_49, %c0_50, %c0_51] : memref<18x18x32xf32, #tpu.memory_space<vmem>>, vector<16x16x32xf32>
    %30 = arith.truncf %29 : vector<16x16x32xf32> to vector<16x16x32xbf16>
    %c0_52 = arith.constant 0 : index
    %c0_53 = arith.constant 0 : index
    %c192 = arith.constant 192 : index
    %31 = vector.load %arg12[%c0_52, %c0_53, %c192] : memref<16x16x288xbf16, #tpu.memory_space<vmem>>, vector<16x16x32xbf16>
    tpu.vector_store %arg12[%c0_52, %c0_53, %c192], %30 {strides = array<i32>} : memref<16x16x288xbf16, #tpu.memory_space<vmem>>, vector<16x16x32xbf16>,
    %c2_54 = arith.constant 2 : index
    %c1_55 = arith.constant 1 : index
    %c0_56 = arith.constant 0 : index
    %32 = vector.load %arg11[%c2_54, %c1_55, %c0_56] : memref<18x18x32xf32, #tpu.memory_space<vmem>>, vector<16x16x32xf32>
    %33 = arith.truncf %32 : vector<16x16x32xf32> to vector<16x16x32xbf16>
    %c0_57 = arith.constant 0 : index
    %c0_58 = arith.constant 0 : index
    %c224 = arith.constant 224 : index
    %34 = vector.load %arg12[%c0_57, %c0_58, %c224] : memref<16x16x288xbf16, #tpu.memory_space<vmem>>, vector<16x16x32xbf16>
    tpu.vector_store %arg12[%c0_57, %c0_58, %c224], %33 {strides = array<i32>} : memref<16x16x288xbf16, #tpu.memory_space<vmem>>, vector<16x16x32xbf16>,
    %c2_59 = arith.constant 2 : index
    %c2_60 = arith.constant 2 : index
    %c0_61 = arith.constant 0 : index
    %35 = vector.load %arg11[%c2_59, %c2_60, %c0_61] : memref<18x18x32xf32, #tpu.memory_space<vmem>>, vector<16x16x32xf32>
    %36 = arith.truncf %35 : vector<16x16x32xf32> to vector<16x16x32xbf16>
    %c0_62 = arith.constant 0 : index
    %c0_63 = arith.constant 0 : index
    %c256 = arith.constant 256 : index
    %37 = vector.load %arg12[%c0_62, %c0_63, %c256] : memref<16x16x288xbf16, #tpu.memory_space<vmem>>, vector<16x16x32xbf16>
    tpu.vector_store %arg12[%c0_62, %c0_63, %c256], %36 {strides = array<i32>} : memref<16x16x288xbf16, #tpu.memory_space<vmem>>, vector<16x16x32xbf16>,
    %c0_64 = arith.constant 0 : index
    %c0_65 = arith.constant 0 : index
    %c0_66 = arith.constant 0 : index
    %38 = vector.load %arg12[%c0_64, %c0_65, %c0_66] : memref<16x16x288xbf16, #tpu.memory_space<vmem>>, vector<16x16x288xbf16>
    %39 = vector.shape_cast %38 : vector<16x16x288xbf16> to vector<256x288xbf16>
    %c0_67 = arith.constant 0 : index
    %c0_68 = arith.constant 0 : index
    %40 = vector.load %arg2[%c0_67, %c0_68] : memref<288x32xbf16, #tpu.memory_space<vmem>>, vector<288x32xbf16>
    %cst_69 = arith.constant dense<0.000000e+00> : vector<256x32xf32>
    %41 = tpu.matmul %39, %40, %cst_69 {dimension_numbers = #tpu.dot_dimension_numbers<[1], [0], [0], [1], [0, 0, 1, 1], [], []>} : vector<256x288xbf16>, vector<288x32xbf16>, vector<256x32xf32> -> vector<256x32xf32>
    %c0_70 = arith.constant 0 : index
    %c0_71 = arith.constant 0 : index
    %42 = vector.load %arg3[%c0_70, %c0_71] : memref<1x32xf32, #tpu.memory_space<vmem>>, vector<1x32xf32>
    %43 = vector.broadcast %42 : vector<1x32xf32> to vector<256x32xf32>
    %44 = arith.addf %41, %43 : vector<256x32xf32>
    %cst_72 = arith.constant 0.000000e+00 : f32
    %45 = vector.broadcast %cst_72 : f32 to vector<256x32xf32>
    %46 = arith.maximumf %44, %45 : vector<256x32xf32>
    %47 = vector.shape_cast %46 : vector<256x32xf32> to vector<16x16x32xf32>
    %c1_73 = arith.constant 1 : index
    %c1_74 = arith.constant 1 : index
    %c0_75 = arith.constant 0 : index
    %48 = vector.load %arg11[%c1_73, %c1_74, %c0_75] : memref<18x18x32xf32, #tpu.memory_space<vmem>>, vector<16x16x32xf32>
    tpu.vector_store %arg11[%c1_73, %c1_74, %c0_75], %47 {strides = array<i32>} : memref<18x18x32xf32, #tpu.memory_space<vmem>>, vector<16x16x32xf32>,
    %c0_76 = arith.constant 0 : index
    %c0_77 = arith.constant 0 : index
    %c0_78 = arith.constant 0 : index
    %49 = vector.load %arg11[%c0_76, %c0_77, %c0_78] : memref<18x18x32xf32, #tpu.memory_space<vmem>>, vector<16x16x32xf32>
    %50 = arith.truncf %49 : vector<16x16x32xf32> to vector<16x16x32xbf16>
    %c0_79 = arith.constant 0 : index
    %c0_80 = arith.constant 0 : index
    %c0_81 = arith.constant 0 : index
    %51 = vector.load %arg12[%c0_79, %c0_80, %c0_81] : memref<16x16x288xbf16, #tpu.memory_space<vmem>>, vector<16x16x32xbf16>
    tpu.vector_store %arg12[%c0_79, %c0_80, %c0_81], %50 {strides = array<i32>} : memref<16x16x288xbf16, #tpu.memory_space<vmem>>, vector<16x16x32xbf16>,
    %c0_82 = arith.constant 0 : index
    %c1_83 = arith.constant 1 : index
    %c0_84 = arith.constant 0 : index
    %52 = vector.load %arg11[%c0_82, %c1_83, %c0_84] : memref<18x18x32xf32, #tpu.memory_space<vmem>>, vector<16x16x32xf32>
    %53 = arith.truncf %52 : vector<16x16x32xf32> to vector<16x16x32xbf16>
    %c0_85 = arith.constant 0 : index
    %c0_86 = arith.constant 0 : index
    %c32_87 = arith.constant 32 : index
    %54 = vector.load %arg12[%c0_85, %c0_86, %c32_87] : memref<16x16x288xbf16, #tpu.memory_space<vmem>>, vector<16x16x32xbf16>
    tpu.vector_store %arg12[%c0_85, %c0_86, %c32_87], %53 {strides = array<i32>} : memref<16x16x288xbf16, #tpu.memory_space<vmem>>, vector<16x16x32xbf16>,
    %c0_88 = arith.constant 0 : index
    %c2_89 = arith.constant 2 : index
    %c0_90 = arith.constant 0 : index
    %55 = vector.load %arg11[%c0_88, %c2_89, %c0_90] : memref<18x18x32xf32, #tpu.memory_space<vmem>>, vector<16x16x32xf32>
    %56 = arith.truncf %55 : vector<16x16x32xf32> to vector<16x16x32xbf16>
    %c0_91 = arith.constant 0 : index
    %c0_92 = arith.constant 0 : index
    %c64_93 = arith.constant 64 : index
    %57 = vector.load %arg12[%c0_91, %c0_92, %c64_93] : memref<16x16x288xbf16, #tpu.memory_space<vmem>>, vector<16x16x32xbf16>
    tpu.vector_store %arg12[%c0_91, %c0_92, %c64_93], %56 {strides = array<i32>} : memref<16x16x288xbf16, #tpu.memory_space<vmem>>, vector<16x16x32xbf16>,
    %c1_94 = arith.constant 1 : index
    %c0_95 = arith.constant 0 : index
    %c0_96 = arith.constant 0 : index
    %58 = vector.load %arg11[%c1_94, %c0_95, %c0_96] : memref<18x18x32xf32, #tpu.memory_space<vmem>>, vector<16x16x32xf32>
    %59 = arith.truncf %58 : vector<16x16x32xf32> to vector<16x16x32xbf16>
    %c0_97 = arith.constant 0 : index
    %c0_98 = arith.constant 0 : index
    %c96_99 = arith.constant 96 : index
    %60 = vector.load %arg12[%c0_97, %c0_98, %c96_99] : memref<16x16x288xbf16, #tpu.memory_space<vmem>>, vector<16x16x32xbf16>
    tpu.vector_store %arg12[%c0_97, %c0_98, %c96_99], %59 {strides = array<i32>} : memref<16x16x288xbf16, #tpu.memory_space<vmem>>, vector<16x16x32xbf16>,
    %c1_100 = arith.constant 1 : index
    %c1_101 = arith.constant 1 : index
    %c0_102 = arith.constant 0 : index
    %61 = vector.load %arg11[%c1_100, %c1_101, %c0_102] : memref<18x18x32xf32, #tpu.memory_space<vmem>>, vector<16x16x32xf32>
    %62 = arith.truncf %61 : vector<16x16x32xf32> to vector<16x16x32xbf16>
    %c0_103 = arith.constant 0 : index
    %c0_104 = arith.constant 0 : index
    %c128_105 = arith.constant 128 : index
    %63 = vector.load %arg12[%c0_103, %c0_104, %c128_105] : memref<16x16x288xbf16, #tpu.memory_space<vmem>>, vector<16x16x32xbf16>
    tpu.vector_store %arg12[%c0_103, %c0_104, %c128_105], %62 {strides = array<i32>} : memref<16x16x288xbf16, #tpu.memory_space<vmem>>, vector<16x16x32xbf16>,
    %c1_106 = arith.constant 1 : index
    %c2_107 = arith.constant 2 : index
    %c0_108 = arith.constant 0 : index
    %64 = vector.load %arg11[%c1_106, %c2_107, %c0_108] : memref<18x18x32xf32, #tpu.memory_space<vmem>>, vector<16x16x32xf32>
    %65 = arith.truncf %64 : vector<16x16x32xf32> to vector<16x16x32xbf16>
    %c0_109 = arith.constant 0 : index
    %c0_110 = arith.constant 0 : index
    %c160_111 = arith.constant 160 : index
    %66 = vector.load %arg12[%c0_109, %c0_110, %c160_111] : memref<16x16x288xbf16, #tpu.memory_space<vmem>>, vector<16x16x32xbf16>
    tpu.vector_store %arg12[%c0_109, %c0_110, %c160_111], %65 {strides = array<i32>} : memref<16x16x288xbf16, #tpu.memory_space<vmem>>, vector<16x16x32xbf16>,
    %c2_112 = arith.constant 2 : index
    %c0_113 = arith.constant 0 : index
    %c0_114 = arith.constant 0 : index
    %67 = vector.load %arg11[%c2_112, %c0_113, %c0_114] : memref<18x18x32xf32, #tpu.memory_space<vmem>>, vector<16x16x32xf32>
    %68 = arith.truncf %67 : vector<16x16x32xf32> to vector<16x16x32xbf16>
    %c0_115 = arith.constant 0 : index
    %c0_116 = arith.constant 0 : index
    %c192_117 = arith.constant 192 : index
    %69 = vector.load %arg12[%c0_115, %c0_116, %c192_117] : memref<16x16x288xbf16, #tpu.memory_space<vmem>>, vector<16x16x32xbf16>
    tpu.vector_store %arg12[%c0_115, %c0_116, %c192_117], %68 {strides = array<i32>} : memref<16x16x288xbf16, #tpu.memory_space<vmem>>, vector<16x16x32xbf16>,
    %c2_118 = arith.constant 2 : index
    %c1_119 = arith.constant 1 : index
    %c0_120 = arith.constant 0 : index
    %70 = vector.load %arg11[%c2_118, %c1_119, %c0_120] : memref<18x18x32xf32, #tpu.memory_space<vmem>>, vector<16x16x32xf32>
    %71 = arith.truncf %70 : vector<16x16x32xf32> to vector<16x16x32xbf16>
    %c0_121 = arith.constant 0 : index
    %c0_122 = arith.constant 0 : index
    %c224_123 = arith.constant 224 : index
    %72 = vector.load %arg12[%c0_121, %c0_122, %c224_123] : memref<16x16x288xbf16, #tpu.memory_space<vmem>>, vector<16x16x32xbf16>
    tpu.vector_store %arg12[%c0_121, %c0_122, %c224_123], %71 {strides = array<i32>} : memref<16x16x288xbf16, #tpu.memory_space<vmem>>, vector<16x16x32xbf16>,
    %c2_124 = arith.constant 2 : index
    %c2_125 = arith.constant 2 : index
    %c0_126 = arith.constant 0 : index
    %73 = vector.load %arg11[%c2_124, %c2_125, %c0_126] : memref<18x18x32xf32, #tpu.memory_space<vmem>>, vector<16x16x32xf32>
    %74 = arith.truncf %73 : vector<16x16x32xf32> to vector<16x16x32xbf16>
    %c0_127 = arith.constant 0 : index
    %c0_128 = arith.constant 0 : index
    %c256_129 = arith.constant 256 : index
    %75 = vector.load %arg12[%c0_127, %c0_128, %c256_129] : memref<16x16x288xbf16, #tpu.memory_space<vmem>>, vector<16x16x32xbf16>
    tpu.vector_store %arg12[%c0_127, %c0_128, %c256_129], %74 {strides = array<i32>} : memref<16x16x288xbf16, #tpu.memory_space<vmem>>, vector<16x16x32xbf16>,
    %c0_130 = arith.constant 0 : index
    %c0_131 = arith.constant 0 : index
    %c0_132 = arith.constant 0 : index
    %76 = vector.load %arg12[%c0_130, %c0_131, %c0_132] : memref<16x16x288xbf16, #tpu.memory_space<vmem>>, vector<16x16x288xbf16>
    %77 = vector.shape_cast %76 : vector<16x16x288xbf16> to vector<256x288xbf16>
    %c0_133 = arith.constant 0 : index
    %c0_134 = arith.constant 0 : index
    %78 = vector.load %arg4[%c0_133, %c0_134] : memref<288x32xbf16, #tpu.memory_space<vmem>>, vector<288x32xbf16>
    %cst_135 = arith.constant dense<0.000000e+00> : vector<256x32xf32>
    %79 = tpu.matmul %77, %78, %cst_135 {dimension_numbers = #tpu.dot_dimension_numbers<[1], [0], [0], [1], [0, 0, 1, 1], [], []>} : vector<256x288xbf16>, vector<288x32xbf16>, vector<256x32xf32> -> vector<256x32xf32>
    %c0_136 = arith.constant 0 : index
    %c0_137 = arith.constant 0 : index
    %80 = vector.load %arg5[%c0_136, %c0_137] : memref<1x32xf32, #tpu.memory_space<vmem>>, vector<1x32xf32>
    %81 = vector.broadcast %80 : vector<1x32xf32> to vector<256x32xf32>
    %82 = arith.addf %79, %81 : vector<256x32xf32>
    %cst_138 = arith.constant dense<0.000000e+00> : vector<32xf32>
    %83 = vector.multi_reduction <add>, %82, %cst_138 [0] : vector<256x32xf32> to vector<32xf32>
    %84 = vector.shape_cast %83 : vector<32xf32> to vector<1x32xf32>
    %cst_139 = arith.constant 2.560000e+02 : f32
    %85 = vector.broadcast %cst_139 : f32 to vector<1x32xf32>
    %86 = arith.divf %84, %85 : vector<1x32xf32>
    %c0_140 = arith.constant 0 : index
    %c0_141 = arith.constant 0 : index
    %87 = vector.load %arg6[%c0_140, %c0_141] : memref<32x4xf32, #tpu.memory_space<vmem>>, vector<32x4xf32>
    %cst_142 = arith.constant dense<0.000000e+00> : vector<1x4xf32>
    %88 = tpu.matmul %86, %87, %cst_142 {dimension_numbers = #tpu.dot_dimension_numbers<[1], [0], [0], [1], [0, 0, 1, 1], [], []>} : vector<1x32xf32>, vector<32x4xf32>, vector<1x4xf32> -> vector<1x4xf32>
    %c0_143 = arith.constant 0 : index
    %c0_144 = arith.constant 0 : index
    %89 = vector.load %arg7[%c0_143, %c0_144] : memref<1x4xf32, #tpu.memory_space<vmem>>, vector<1x4xf32>
    %90 = arith.addf %88, %89 : vector<1x4xf32>
    %cst_145 = arith.constant 0.000000e+00 : f32
    %91 = vector.broadcast %cst_145 : f32 to vector<1x4xf32>
    %92 = arith.maximumf %90, %91 : vector<1x4xf32>
    %c0_146 = arith.constant 0 : index
    %c0_147 = arith.constant 0 : index
    %93 = vector.load %arg8[%c0_146, %c0_147] : memref<4x32xf32, #tpu.memory_space<vmem>>, vector<4x32xf32>
    %cst_148 = arith.constant dense<0.000000e+00> : vector<1x32xf32>
    %94 = tpu.matmul %92, %93, %cst_148 {dimension_numbers = #tpu.dot_dimension_numbers<[1], [0], [0], [1], [0, 0, 1, 1], [], []>} : vector<1x4xf32>, vector<4x32xf32>, vector<1x32xf32> -> vector<1x32xf32>
    %c0_149 = arith.constant 0 : index
    %c0_150 = arith.constant 0 : index
    %95 = vector.load %arg9[%c0_149, %c0_150] : memref<1x32xf32, #tpu.memory_space<vmem>>, vector<1x32xf32>
    %96 = arith.addf %94, %95 : vector<1x32xf32>
    %97 = arith.negf %96 : vector<1x32xf32>
    %98 = math.exp %97 : vector<1x32xf32>
    %cst_151 = arith.constant 1.000000e+00 : f32
    %99 = vector.broadcast %cst_151 : f32 to vector<1x32xf32>
    %100 = arith.addf %99, %98 : vector<1x32xf32>
    %101 = arith.divf %99, %100 : vector<1x32xf32>
    %102 = vector.broadcast %101 : vector<1x32xf32> to vector<256x32xf32>
    %103 = arith.mulf %82, %102 : vector<256x32xf32>
    %104 = vector.shape_cast %103 : vector<256x32xf32> to vector<16x16x32xf32>
    %c0_152 = arith.constant 0 : index
    %c0_153 = arith.constant 0 : index
    %c0_154 = arith.constant 0 : index
    %c0_155 = arith.constant 0 : index
    %105 = vector.load %arg1[%c0_152, %c0_153, %c0_154, %c0_155] : memref<1x16x16x32xf32, #tpu.memory_space<vmem>>, vector<1x16x16x32xf32>
    %106 = vector.shape_cast %105 : vector<1x16x16x32xf32> to vector<16x16x32xf32>
    %107 = arith.addf %104, %106 : vector<16x16x32xf32>
    %c0_156 = arith.constant 0 : index
    %c0_157 = arith.constant 0 : index
    %c0_158 = arith.constant 0 : index
    %c0_159 = arith.constant 0 : index
    %108 = vector.load %arg10[%c0_156, %c0_157, %c0_158, %c0_159] : memref<1x16x16x32xf32, #tpu.memory_space<vmem>>, vector<1x16x16x32xf32>
    %109 = vector.shape_cast %108 : vector<1x16x16x32xf32> to vector<16x16x32xf32>
    %110 = vector.shape_cast %107 : vector<16x16x32xf32> to vector<1x16x16x32xf32>
    tpu.vector_store %arg10[%c0_156, %c0_157, %c0_158, %c0_159], %110 {strides = array<i32>} : memref<1x16x16x32xf32, #tpu.memory_space<vmem>>, vector<1x16x16x32xf32>,
    return
  }
  func.func @transform_0(%arg0: i32) -> (i32, i32, i32, i32) {
    %c0_i32 = arith.constant 0 : i32
    %c0_i32_0 = arith.constant 0 : i32
    %c0_i32_1 = arith.constant 0 : i32
    %c0_i32_2 = arith.constant 0 : i32
    return %arg0, %c0_i32, %c0_i32_0, %c0_i32_1 : i32, i32, i32, i32
  }
  func.func @transform_1(%arg0: i32) -> (i32, i32) {
    %c0_i32 = arith.constant 0 : i32
    %c0_i32_0 = arith.constant 0 : i32
    %c0_i32_1 = arith.constant 0 : i32
    return %c0_i32, %c0_i32_0 : i32, i32
  }
  func.func @transform_2(%arg0: i32) -> (i32, i32) {
    %c0_i32 = arith.constant 0 : i32
    %c0_i32_0 = arith.constant 0 : i32
    %c0_i32_1 = arith.constant 0 : i32
    return %c0_i32, %c0_i32_0 : i32, i32
  }
  func.func @transform_3(%arg0: i32) -> (i32, i32) {
    %c0_i32 = arith.constant 0 : i32
    %c0_i32_0 = arith.constant 0 : i32
    %c0_i32_1 = arith.constant 0 : i32
    return %c0_i32, %c0_i32_0 : i32, i32
  }
  func.func @transform_4(%arg0: i32) -> (i32, i32) {
    %c0_i32 = arith.constant 0 : i32
    %c0_i32_0 = arith.constant 0 : i32
    %c0_i32_1 = arith.constant 0 : i32
    return %c0_i32, %c0_i32_0 : i32, i32
  }
  func.func @transform_5(%arg0: i32) -> (i32, i32) {
    %c0_i32 = arith.constant 0 : i32
    %c0_i32_0 = arith.constant 0 : i32
    %c0_i32_1 = arith.constant 0 : i32
    return %c0_i32, %c0_i32_0 : i32, i32
  }
  func.func @transform_6(%arg0: i32) -> (i32, i32) {
    %c0_i32 = arith.constant 0 : i32
    %c0_i32_0 = arith.constant 0 : i32
    %c0_i32_1 = arith.constant 0 : i32
    return %c0_i32, %c0_i32_0 : i32, i32
  }
  func.func @transform_7(%arg0: i32) -> (i32, i32) {
    %c0_i32 = arith.constant 0 : i32
    %c0_i32_0 = arith.constant 0 : i32
    %c0_i32_1 = arith.constant 0 : i32
    return %c0_i32, %c0_i32_0 : i32, i32
  }
  func.func @transform_8(%arg0: i32) -> (i32, i32) {
    %c0_i32 = arith.constant 0 : i32
    %c0_i32_0 = arith.constant 0 : i32
    %c0_i32_1 = arith.constant 0 : i32
    return %c0_i32, %c0_i32_0 : i32, i32
  }
  func.func @transform_9(%arg0: i32) -> (i32, i32, i32, i32) {
    %c0_i32 = arith.constant 0 : i32
    %c0_i32_0 = arith.constant 0 : i32
    %c0_i32_1 = arith.constant 0 : i32
    %c0_i32_2 = arith.constant 0 : i32
    return %arg0, %c0_i32, %c0_i32_0, %c0_i32_1 : i32, i32, i32, i32
  }
}

</mosaic_0001>

<bundles_post_ra>
// kernel: tpu_custom_call.1
= control target key start
LH: loop header
LB: loop body
LE: loop exit
PB: predicated region body
PF: predicated region fallthrough
CT: control target
= control target key end

     0   :  { %14 = vsyncpa [#allocation5], 0  ;;  %s6480_s0 = inlined_call_operand.hbm [shape: f32[2,16,16,32], index: 0, kind: input, shape index: {}]   ;;  %s6481_s1 = inlined_call_operand.vmem [shape: bf16[288,32], index: 1, kind: input, shape index: {}]   ;;  %s6482_s2 = inlined_call_operand.vmem [shape: f32[1,32], index: 2, kind: input, shape index: {}]   ;;  %s6483_s3 = inlined_call_operand.vmem [shape: bf16[288,32], index: 3, kind: input, shape index: {}]   ;;  %s6484_s4 = inlined_call_operand.vmem [shape: f32[1,32], index: 4, kind: input, shape index: {}]   ;;  %s6485_s5 = inlined_call_operand.vmem [shape: f32[32,4], index: 5, kind: input, shape index: {}]   ;;  %s6486_s6 = inlined_call_operand.vmem [shape: f32[1,4], index: 6, kind: input, shape index: {}]   ;;  %s6487_s7 = inlined_call_operand.vmem [shape: f32[4,32], index: 7, kind: input, shape index: {}]   ;;  %s6488_s8 = inlined_call_operand.vmem [shape: f32[1,32], index: 8, kind: input, shape index: {}]   ;;  %s6489_s9 = inlined_call_operand.hbm [shape: f32[2,16,16,32], index: 9, kind: output, shape index: {}]  }
   0x1   :  { %16 = vsyncpa [#allocation5 + $0x1], 0 }
   0x2   :  { %17 = vsyncpa [#allocation6], 0 }
   0x3   :  { %19 = vsyncpa [#allocation6 + $0x1], 0  ;;  %s4754_s30 = smov 0   ;;  %s4756_s10 = smov 0  }
   0x4   :  { %s4758_s11 = smov 0   ;;  %s4760_s12 = smov 0  }
   0x5 LB: > { %s4775_s13 = sadd.s32 4294967295, %s4690_s12   ;;  %s4040_s14 = sadd.s32 4294967294, %s4690_s12   ;;  %s4690_s12 = sphi %s4760_s12, %s6518_s12   ;;  %s4686_s11 = sphi %s4758_s11, %s6517_s11   ;;  %s4682_s10 = sphi %s4756_s10, %s6516_s10   ;;  %s4678_s30 = sphi %s4754_s30, %s6515_s30  }
   0x6   : > { %s4779_s15 = sadd.s32 1, %s4690_s12   ;;  %s32_s16 = sadd.s32 1, %s4686_s11 }
   0x7   : > { %s29_s17 = ssub.s32 %s4690_s12, %s4779_s15  ;;  %p39_p0 = scmp.ne.s32.totalorder %s4686_s11, %s4682_s10 }
   0x8   : > { %p30_p1 = scmp.eq.s32.totalorder %s29_s17, 0  ;;  %p40_p2 = scmp.eq.s32.totalorder %s4690_s12, 0 }
   0x9   : > { %p45_p3 = scmp.ne.s32.totalorder %s4682_s10, %s4678_s30  ;;  %p46_p4 = scmp.eq.s32.totalorder %s4775_s13, 0 }
   0xa   : > { %s4791_s18 = scalar_select %p30_p1, %s4686_s11, %s32_s16  }
   0xb   : > { %p4793_p5 = por %p40_p2, %p39_p0  ;;  %p4797_p6 = por %p46_p4, %p45_p3 }
   0xc   : > { %p237_p7 = scmp.eq.s32.totalorder %s4775_s13, 1  ;;  %p243_p8 = scmp.eq.s32.totalorder %s4040_s14, 1 }
   0xd   : > { %p4507_p10 = scmp.lt.s32.totalorder %s4690_s12, 2  ;;  %s287_s23 = sand.u32 1, %s4686_s11  }
   0xe   : > { %p4804_p11 = por %p237_p7, %p39_p0  ;;  %p4808_p12 = por %p243_p8, %p45_p3 }
   0xf   : > { %s4128_s24 = sshll.u32 %s4690_s12, 12  ;;  %s4043_s25 = sshll.u32 %s287_s23, 8 }
  0x10   : > { %s6498_s21 = scalar_select %p4804_p11, 1, 0 }
  0x11   : > { %s6499_s22 = scalar_select %p4808_p12, 1, 0 }
  0x12   : > { %s4817_s28 = scalar_lea.hbm %s6480_s0, %s4128_s24  ;;  %s291_s29 = scalar_lea.vmem [#allocation4], %s4043_s25 }
  0x13   : > { %s298_s14 = sshll.u32 %s291_s29, 4  ;;  %p4821_p13 = pnand %p4507_p10, %p4793_p5  ;;  %s4825_s14 = int_to_ptr.vmem [resolvable:$true] %s298_s14 }
  0x14   : > { %s4827_s17 = scalar_lea.sflag [#allocation5], %s287_s23  ;;  %s4594_s26 = scalar_lea.hbm %s4817_s28, 4096 }
  0x15   : > { %p4595_p0 = scmp.ne.s32.totalorder %s4817_s28, %s4594_s26  ;;  %p4596_p1 = pneg %p4821_p13 }
  0x16   : > { %s4599_s25 = scalar_lea.hbm %s6480_s0, 8192  ;;  %p4600_p4 = scmp.lt.u32.totalorder %s4817_s28, %s6480_s0 }
  0x17   : > { %p4597_p2 = pnand %p4596_p1, %p4595_p0  ;;  %p4601_p5 = scmp.lt.u32.totalorder %s4599_s25, %s4594_s26 }
  0x18   : > { %p4603_p8 = scmp.lt.u32.totalorder %s4594_s26, %s4817_s28 }
  0x19   : > { %p4598_p3 = pneg %p4597_p2  ;;  %p4602_p7 = por %p4601_p5, %p4600_p4 }
  0x1b   : > { %p4604_p10 = por %p4603_p8, %p4602_p7 }
  0x1d   : > { %p4605_p9 = pnand %p4604_p10, %p4598_p3 }
  0x1f   : > { %4608 = shalt.err (!%p4605_p9)
}
  0x20   : > { %s4609_s23 = scalar_lea.vmem %s4825_s14, 4096  ;;  %s4692_s24 = smov [#allocation4]  }
  0x21   : > { %p4610_p0 = scmp.ne.s32.totalorder %s4825_s14, %s4609_s23  ;;  %s4614_s19 = sshll.u32 %s4692_s24, 4  ;;  %s4615_s19 = int_to_ptr.vmem [resolvable:$false] %s4614_s19 }
  0x22   : > { %s4616_s27 = scalar_lea.vmem %s4615_s19, 8192  ;;  %p4617_p11 = scmp.lt.s32.totalorder %s4825_s14, %s4615_s19 }
  0x23   : > { %p4612_p2 = pnand %p4610_p0, %p4596_p1  ;;  %p4618_p4 = scmp.lt.s32.totalorder %s4616_s27, %s4609_s23 }
  0x25   : > { %p4613_p12 = pneg %p4612_p2  ;;  %p4619_p5 = por %p4618_p4, %p4617_p11 }
  0x27   : > { %p4620_p7 = pnand %p4619_p5, %p4613_p12 }
  0x29   : > { %4623 = shalt.err (!%p4620_p7)
}
  0x2a   : > { %s4693_s26 = smov 128   ;;  %s4694_s25 = smov 8  }
  0x2b   : > { %4502 = dma.hbm_to_vmem [thread:$0]  (!%p4821_p13), %s4817_s28, 4096, %s4825_s14, %s4827_s17, %s4693_s26, %s4693_s26, %s4694_s25  }
  0x2c   : > { %p4046_p9 = scmp.ge.s32.totalorder %s4690_s12, 1  ;;  %p306_p1 = scmp.lt.s32.totalorder %s4690_s12, 3 }
  0x2e   : > { %p307_p3 = pnand %p4046_p9, %p306_p1 }
  0x30   : > { %310 = sbr.rel (%p307_p3) target bundleno = 1514 (0x5ea), region = 56 }
  0x37   : > { %s4858_s29 = sand.u32 1, %s4682_s10  }
  0x38   : > { %s6491_s23 = sshll.u32 %s4858_s29, 8  ;;  %s313_s24 = scalar_lea.sflag [#allocation5], %s4858_s29 }
  0x39   : > { %s4864_s19 = scalar_lea.vmem [#allocation4], %s6491_s23 }
  0x3a   : > { %4669 = dma.done.wait (%p4797_p6), %s313_s24, 4096  }
  0x3b   : > { %4671 = vsyncadd (%p4797_p6), %s313_s24, 4294963200  ;;  %vm352_vm0 = vcmask 261120   ;;  %vm355_vm1 = vcmask 254976   ;;  %v4695_v0 = vmov 0.0   ;;  %vm362_vm2 = vcmask 253952   ;;  %v395_v1 = vld [vmem:[%s4864_s19] sm:$0xff] }
  0x3c   : > { %353 = vst.msk [vmem:[#allocation2] sm:$0xff] %vm352_vm0, %v4695_v0  ;;  %354 = vst.msk [vmem:[#allocation2 + $0x8] sm:$0xff] %vm352_vm0, %v4695_v0  ;;  %v396_v2 = vld [vmem:[%s4864_s19 + $0x8] sm:$0xff]  ;;  %v397_v3 = vld [vmem:[%s4864_s19 + $0x10] sm:$0xff]  ;;  %s6494_s20 = smov 32   ;;  %s6492_s28 = smov 64  }
  0x3d   : > { %356 = vst.msk [vmem:[#allocation2 + $0x10] sm:$0x3] %vm355_vm1, %v4695_v0  ;;  %360 = vst.msk [vmem:[#allocation2 + $0x1a8] sm:$0x3] %vm355_vm1, %v4695_v0  ;;  %v398_v9 = vld [vmem:[%s4864_s19 + $0x18] sm:$0xff]  ;;  %v399_v10 = vld [vmem:[%s4864_s19 + $0x20] sm:$0xff] }
  0x3e   : > { %358 = vst.msk [vmem:[#allocation2 + $0x198] sm:$0xff] %vm352_vm0, %v4695_v0  ;;  %359 = vst.msk [vmem:[#allocation2 + $0x1a0] sm:$0xff] %vm352_vm0, %v4695_v0  ;;  %v400_v12 = vld [vmem:[%s4864_s19 + $0x28] sm:$0xff]  ;;  %v401_v13 = vld [vmem:[%s4864_s19 + $0x30] sm:$0xff]  ;;  %s4698_s14 = smov 96   ;;  %s6501_s23 = smov 64  }
  0x3f   : > { %379 = vst.msk [vmem:[#allocation2 + $0x29] sm:$0x1] %vm362_vm2, %v4695_v0  ;;  %363 = vst.msk [vmem:[#allocation2 + $0x18] sm:$0x1] %vm362_vm2, %v4695_v0  ;;  %v402_v14 = vld [vmem:[%s4864_s19 + $0x38] sm:$0xff]  ;;  %v403_v15 = vld [vmem:[%s4864_s19 + $0x40] sm:$0xff] }
  0x40   : > { %364 = vst.msk [vmem:[#allocation2 + $0x30] sm:$0x1] %vm362_vm2, %v4695_v0  ;;  %365 = vst.msk [vmem:[#allocation2 + $0x48] sm:$0x1] %vm362_vm2, %v4695_v0  ;;  %v404_v16 = vld [vmem:[%s4864_s19 + $0x48] sm:$0xff]  ;;  %v405_v17 = vld [vmem:[%s4864_s19 + $0x50] sm:$0xff] }
  0x41   : > { %366 = vst.msk [vmem:[#allocation2 + $0x60] sm:$0x1] %vm362_vm2, %v4695_v0  ;;  %367 = vst.msk [vmem:[#allocation2 + $0x78] sm:$0x1] %vm362_vm2, %v4695_v0  ;;  %v406_v18 = vld [vmem:[%s4864_s19 + $0x58] sm:$0xff]  ;;  %v407_v19 = vld [vmem:[%s4864_s19 + $0x60] sm:$0xff] }
  0x42   : > { %368 = vst.msk [vmem:[#allocation2 + $0x90] sm:$0x1] %vm362_vm2, %v4695_v0  ;;  %369 = vst.msk [vmem:[#allocation2 + $0xa8] sm:$0x1] %vm362_vm2, %v4695_v0  ;;  %v408_v20 = vld [vmem:[%s4864_s19 + $0x68] sm:$0xff]  ;;  %v409_v21 = vld [vmem:[%s4864_s19 + $0x70] sm:$0xff] }
  0x43   : > { %370 = vst.msk [vmem:[#allocation2 + $0xc0] sm:$0x1] %vm362_vm2, %v4695_v0  ;;  %371 = vst.msk [vmem:[#allocation2 + $0xd8] sm:$0x1] %vm362_vm2, %v4695_v0  ;;  %v523_v4 = vld [vmem:[#allocation2 + $0x1] sm:$0xff]  ;;  %v411_v23 = vld [vmem:[%s4864_s19 + $0x80] sm:$0xff] }
  0x44   : > { %372 = vst.msk [vmem:[#allocation2 + $0xf0] sm:$0x1] %vm362_vm2, %v4695_v0  ;;  %373 = vst.msk [vmem:[#allocation2 + $0x108] sm:$0x1] %vm362_vm2, %v4695_v0  ;;  %v524_v5 = vld [vmem:[#allocation2 + $0x9] sm:$0xff]  ;;  %v412_v24 = vld [vmem:[%s4864_s19 + $0x88] sm:$0xff] }
  0x45   : > { %374 = vst.msk [vmem:[#allocation2 + $0x120] sm:$0x1] %vm362_vm2, %v4695_v0  ;;  %375 = vst.msk [vmem:[#allocation2 + $0x138] sm:$0x1] %vm362_vm2, %v4695_v0  ;;  %v652_v6 = vld [vmem:[#allocation2 + $0x2] sm:$0xff]  ;;  %v555_v7 = vpack.c.bf16 %v524_v5, %v523_v4  ;;  %v653_v8 = vld [vmem:[#allocation2 + $0xa] sm:$0xff] }
  0x46   : > { %376 = vst.msk [vmem:[#allocation2 + $0x150] sm:$0x1] %vm362_vm2, %v4695_v0  ;;  %377 = vst.msk [vmem:[#allocation2 + $0x168] sm:$0x1] %vm362_vm2, %v4695_v0  ;;  %v684_v11 = vpack.c.bf16 %v653_v8, %v652_v6  ;;  %v410_v22 = vld [vmem:[%s4864_s19 + $0x78] sm:$0xff]  ;;  %vm635_vm3 = vcmask 523520  }
  0x47   : > { %378 = vst.msk [vmem:[#allocation2 + $0x180] sm:$0x1] %vm362_vm2, %v4695_v0  ;;  %380 = vst.msk [vmem:[#allocation2 + $0x41] sm:$0x1] %vm362_vm2, %v4695_v0  ;;  %587 = vrot.lane.b32.xlu0 %v555_v7, %s6494_s20  ;;  %vm764_vm4 = vcmask 785920   ;;  %vm893_vm5 = vcmask 1048320  }
  0x48   : > { %381 = vst.msk [vmem:[#allocation2 + $0x59] sm:$0x1] %vm362_vm2, %v4695_v0  ;;  %382 = vst.msk [vmem:[#allocation2 + $0x71] sm:$0x1] %vm362_vm2, %v4695_v0  ;;  %716 = vrot.lane.b32.xlu1 %v684_v11, %s6492_s28  ;;  %v414_v11 = vld [vmem:[%s4864_s19 + $0x98] sm:$0xff]  ;;  %vm4700_vm6 = vmmov 0  }
  0x49   : > { %383 = vst.msk [vmem:[#allocation2 + $0x89] sm:$0x1] %vm362_vm2, %v4695_v0  ;;  %384 = vst.msk [vmem:[#allocation2 + $0xa1] sm:$0x1] %vm362_vm2, %v4695_v0  ;;  %vm3741_vm7 = vcmask 1043456   ;;  %vm3737_vm8 = vcmask 31744  }
  0x4a   : > { %385 = vst.msk [vmem:[#allocation2 + $0xb9] sm:$0x1] %vm362_vm2, %v4695_v0  ;;  %386 = vst.msk [vmem:[#allocation2 + $0xd1] sm:$0x1] %vm362_vm2, %v4695_v0  ;;  %s6507_s25 = sshll.u32 %s4858_s29, 8  ;;  %p6512_p11 = scmp.ne.s32.totalorder %s6498_s21, 0 }
  0x4b   : > { %387 = vst.msk [vmem:[#allocation2 + $0xe9] sm:$0x1] %vm362_vm2, %v4695_v0  ;;  %388 = vst.msk [vmem:[#allocation2 + $0x101] sm:$0x1] %vm362_vm2, %v4695_v0  ;;  %s6337_s24 = scalar_lea.vmem [#allocation7], %s6507_s25  ;;  %s4701_s17 = smov [#allocation7]  }
  0x4c   : > { %389 = vst.msk [vmem:[#allocation2 + $0x119] sm:$0x1] %vm362_vm2, %v4695_v0  ;;  %390 = vst.msk [vmem:[#allocation2 + $0x131] sm:$0x1] %vm362_vm2, %v4695_v0  ;;  %s3967_s16 = sshll.u32 %s6337_s24, 4  ;;  %s4628_s27 = sshll.u32 %s4701_s17, 4  ;;  %s6408_s16 = int_to_ptr.vmem [resolvable:$true] %s3967_s16  ;;  %s4629_s27 = int_to_ptr.vmem [resolvable:$false] %s4628_s27 }
  0x4d   : > { %391 = vst.msk [vmem:[#allocation2 + $0x149] sm:$0x1] %vm362_vm2, %v4695_v0  ;;  %392 = vst.msk [vmem:[#allocation2 + $0x161] sm:$0x1] %vm362_vm2, %v4695_v0  ;;  %s4630_s26 = scalar_lea.vmem %s4629_s27, 8192  ;;  %p4631_p8 = scmp.lt.s32.totalorder %s6408_s16, %s4629_s27 }
  0x4e   : > { %393 = vst.msk [vmem:[#allocation2 + $0x179] sm:$0x1] %vm362_vm2, %v4695_v0  ;;  %394 = vst.msk [vmem:[#allocation2 + $0x191] sm:$0x1] %vm362_vm2, %v4695_v0 }
  0x4f   : > { %427 = vst.msk [vmem:[#allocation2 + $0x19] sm:$0xff] %vm352_vm0, %v395_v1  ;;  %428 = vst.msk [vmem:[#allocation2 + $0x21] sm:$0xff] %vm352_vm0, %v396_v2 }
  0x50   : > { %429 = vst.msk [vmem:[#allocation2 + $0x31] sm:$0xff] %vm352_vm0, %v397_v3  ;;  %430 = vst.msk [vmem:[#allocation2 + $0x39] sm:$0xff] %vm352_vm0, %v398_v9  ;;  %v4551_v9 = vld [vmem:[%s6481_s1 + $0x40] sm:$0xff]  }
  0x51   : > { %431 = vst.msk [vmem:[#allocation2 + $0x49] sm:$0xff] %vm352_vm0, %v399_v10  ;;  %432 = vst.msk [vmem:[#allocation2 + $0x51] sm:$0xff] %vm352_vm0, %v400_v12  ;;  %v413_v10 = vld [vmem:[%s4864_s19 + $0x90] sm:$0xff]  ;;  %4130 = vmatprep.subr.bf16.mxu0 %v4551_v9 }
  0x52   : > { %433 = vst.msk [vmem:[#allocation2 + $0x61] sm:$0xff] %vm352_vm0, %v401_v13  ;;  %434 = vst.msk [vmem:[#allocation2 + $0x69] sm:$0xff] %vm352_vm0, %v402_v14  ;;  %v4552_v12 = vld [vmem:[%s6481_s1] sm:$0xff]   ;;  %v4553_v13 = vld [vmem:[%s6481_s1 + $0x48] sm:$0xff]  }
  0x53   : > { %435 = vst.msk [vmem:[#allocation2 + $0x79] sm:$0xff] %vm352_vm0, %v403_v15  ;;  %436 = vst.msk [vmem:[#allocation2 + $0x81] sm:$0xff] %vm352_vm0, %v404_v16  ;;  %4131 = vmatpush3.bf16.msra.mxu0 %v4552_v12  ;;  %v4554_v14 = vld [vmem:[%s6481_s1 + $0x8] sm:$0xff]   ;;  %v4555_v15 = vld [vmem:[%s6481_s1 + $0x50] sm:$0xff]  }
  0x54   : > { %437 = vst.msk [vmem:[#allocation2 + $0x91] sm:$0xff] %vm352_vm0, %v405_v17  ;;  %438 = vst.msk [vmem:[#allocation2 + $0x99] sm:$0xff] %vm352_vm0, %v406_v18  ;;  %4132 = vmatprep.subr.bf16.mxu0 %v4553_v13  ;;  %v4556_v17 = vld [vmem:[%s6481_s1 + $0x10] sm:$0xff]  }
  0x55   : > { %439 = vst.msk [vmem:[#allocation2 + $0xa9] sm:$0xff] %vm352_vm0, %v407_v19  ;;  %440 = vst.msk [vmem:[#allocation2 + $0xb1] sm:$0xff] %vm352_vm0, %v408_v20  ;;  %v415_v18 = vld [vmem:[%s4864_s19 + $0xa0] sm:$0xff]  ;;  %v416_v19 = vld [vmem:[%s4864_s19 + $0xa8] sm:$0xff] }
  0x56   : > { %441 = vst.msk [vmem:[#allocation2 + $0xc1] sm:$0xff] %vm352_vm0, %v409_v21  ;;  %442 = vst.msk [vmem:[#allocation2 + $0xc9] sm:$0xff] %vm352_vm0, %v410_v22  ;;  %v974_v25 = vld [vmem:[#allocation2 + $0x1a] sm:$0xff]  ;;  %v975_v26 = vld [vmem:[#allocation2 + $0x22] sm:$0xff] }
  0x57   : > { %443 = vst.msk [vmem:[#allocation2 + $0xd9] sm:$0xff] %vm352_vm0, %v411_v23  ;;  %v1103_v27 = vld [vmem:[#allocation2 + $0x30] sm:$0xff]  ;;  %444 = vst.msk [vmem:[#allocation2 + $0xe1] sm:$0xff] %vm352_vm0, %v412_v24  ;;  %v4982_v28 = vpack.c.bf16 %v975_v26, %v974_v25  ;;  %v781_v30 = vld [vmem:[#allocation2 + $0x18] sm:$0xff]  ;;  %4133 = vmatpush3.bf16.msra.mxu0 %v4554_v14 }
  0x58   : > { %v1231_v29 = vld [vmem:[#allocation2 + $0x31] sm:$0xff]  ;;  %v782_v31 = vld [vmem:[#allocation2 + $0x20] sm:$0xff]  ;;  %v1105_v43 = vld [vmem:[#allocation2 + $0x48] sm:$0xff]  ;;  %445 = vst.msk [vmem:[#allocation2 + $0xf1] sm:$0xff] %vm352_vm0, %v413_v10  ;;  %4134 = vmatprep.subr.bf16.mxu0 %v4555_v15 }
  0x59   : > { %v1104_v32 = vld [vmem:[#allocation2 + $0x38] sm:$0xff]  ;;  %v813_v34 = vpack.c.bf16 %v782_v31, %v781_v30  ;;  %1038 = vrot.lane.b32.xlu0 %v4982_v28, %s6494_s20  ;;  %v526_v40 = vld [vmem:[#allocation2 + $0x21] sm:$0xff]  ;;  %v1106_v44 = vld [vmem:[#allocation2 + $0x50] sm:$0xff]  ;;  %446 = vst.msk [vmem:[#allocation2 + $0xf9] sm:$0xff] %vm352_vm0, %v414_v11 }
  0x5a   : > { %v1232_v33 = vld [vmem:[#allocation2 + $0x39] sm:$0xff]  ;;  %v4986_v36 = vpack.c.bf16 %v1104_v32, %v1103_v27  ;;  %v1233_v45 = vld [vmem:[#allocation2 + $0x49] sm:$0xff]  ;;  %v4995_v46 = vpack.c.bf16 %v1106_v44, %v1105_v43  ;;  %v1234_v47 = vld [vmem:[#allocation2 + $0x51] sm:$0xff]  ;;  %447 = vst.msk [vmem:[#allocation2 + $0x109] sm:$0xff] %vm352_vm0, %v415_v18 }
  0x5b   : > { %v976_v35 = vld [vmem:[#allocation2 + $0x32] sm:$0xff]  ;;  %v4988_v37 = vpack.c.bf16 %v1232_v33, %v1231_v29  ;;  %v977_v38 = vld [vmem:[#allocation2 + $0x3a] sm:$0xff]  ;;  %508 = vst.msk [vmem:[#allocation3 + $0x18] sm:$0xff] %vm352_vm0, %v813_v34  ;;  %v978_v48 = vld [vmem:[#allocation2 + $0x4a] sm:$0xff]  ;;  %v5001_v50 = vpack.c.bf16 %v1234_v47, %v1233_v45  ;;  %4135 = vmatpush3.bf16.msra.mxu0 %v4556_v17 }
  0x5c   : > { %v525_v39 = vld [vmem:[#allocation2 + $0x19] sm:$0xff]  ;;  %v4990_v41 = vpack.c.bf16 %v977_v38, %v976_v35  ;;  %1167 = vrot.lane.b32.xlu1 %v4986_v36, %s6492_s28  ;;  %509 = vst.msk [vmem:[#allocation3 + $0x30] sm:$0xff] %vm352_vm0, %v4986_v36  ;;  %v1235_v52 = vld [vmem:[#allocation2 + $0x61] sm:$0xff]  ;;  %v1236_v53 = vld [vmem:[#allocation2 + $0x69] sm:$0xff] }
  0x5d   : > { %v556_v42 = vpack.c.bf16 %v526_v40, %v525_v39  ;;  %v979_v49 = vld [vmem:[#allocation2 + $0x52] sm:$0xff]  ;;  %959 = vst.msk [vmem:[#allocation3 + $0x20] sm:$0xff] %vm352_vm0, %v4988_v37  ;;  %1295 = vrot.lane.b32.xlu0 %v4988_v37, %s4698_s14  ;;  %v980_v54 = vld [vmem:[#allocation2 + $0x62] sm:$0xff]  ;;  %v981_v55 = vld [vmem:[#allocation2 + $0x6a] sm:$0xff]  ;;  %v5012_v56 = vpack.c.bf16 %v1236_v53, %v1235_v52 }
  0x5e   : > { %v5003_v51 = vpack.c.bf16 %v979_v49, %v978_v48  ;;  %1407 = vst.msk [vmem:[#allocation3 + $0x10] sm:$0xff] %vm352_vm0, %v4990_v41  ;;  %510 = vst.msk [vmem:[#allocation3 + $0x48] sm:$0xff] %vm352_vm0, %v4995_v46  ;;  %v5014_v57 = vpack.c.bf16 %v981_v55, %v980_v54  ;;  %v1237_v58 = vld [vmem:[#allocation2 + $0x79] sm:$0xff]  ;;  %v1238_v59 = vld [vmem:[#allocation2 + $0x81] sm:$0xff] }
  0x5f   : > { %958 = vst.msk [vmem:[#allocation3 + $0x8] sm:$0xff] %vm352_vm0, %v556_v42  ;;  %960 = vst.msk [vmem:[#allocation3 + $0x38] sm:$0xff] %vm352_vm0, %v5001_v50  ;;  %v982_v60 = vld [vmem:[#allocation2 + $0x7a] sm:$0xff]  ;;  %v983_v61 = vld [vmem:[#allocation2 + $0x82] sm:$0xff]  ;;  %v5021_v62 = vpack.c.bf16 %v1238_v59, %v1237_v58 }
  0x60   : > { %1408 = vst.msk [vmem:[#allocation3 + $0x28] sm:$0xff] %vm352_vm0, %v5003_v51  ;;  %845 = vrot.lane.b32.xlu1 %v813_v34, %s4698_s14  ;;  %v5023_v63 = vpack.c.bf16 %v983_v61, %v982_v60  ;;  %v1239_v1 = vld [vmem:[#allocation2 + $0x91] sm:$0xff]  ;;  %961 = vst.msk [vmem:[#allocation3 + $0x50] sm:$0xff] %vm352_vm0, %v5012_v56  ;;  %v1240_v2 = vld [vmem:[#allocation2 + $0x99] sm:$0xff] }
  0x61   : > { %1409 = vst.msk [vmem:[#allocation3 + $0x40] sm:$0xff] %vm352_vm0, %v5014_v57  ;;  %1040 = vrot.lane.b32.xlu0 %v4990_v41, %s6494_s20  ;;  %v5031_v3 = vpack.c.bf16 %v1240_v2, %v1239_v1  ;;  %962 = vst.msk [vmem:[#allocation3 + $0x68] sm:$0xff] %vm352_vm0, %v5021_v62  ;;  %v986_v4 = vld [vmem:[#allocation2 + $0xaa] sm:$0xff]  ;;  %v987_v5 = vld [vmem:[#allocation2 + $0xb2] sm:$0xff] }
  0x62   : > { %1410 = vst.msk [vmem:[#allocation3 + $0x58] sm:$0xff] %vm352_vm0, %v5023_v63  ;;  %v5038_v6 = vpack.c.bf16 %v987_v5, %v986_v4  ;;  %v1107_v7 = vld [vmem:[#allocation2 + $0x60] sm:$0xff]  ;;  %v1108_v8 = vld [vmem:[#allocation2 + $0x68] sm:$0xff]  ;;  %v4557_v20 = vld [vmem:[%s6481_s1 + $0x58] sm:$0xff]  }
  0x63   : > { %963 = vst.msk [vmem:[#allocation3 + $0x80] sm:$0xff] %vm352_vm0, %v5031_v3  ;;  %v5073_v16 = vpack.c.bf16 %v1108_v8, %v1107_v7  ;;  %448 = vst.msk [vmem:[#allocation2 + $0x111] sm:$0xff] %vm352_vm0, %v416_v19  ;;  %v4558_v21 = vld [vmem:[%s6481_s1 + $0x18] sm:$0xff]   ;;  %v460_v22 = vld [vmem:[#allocation2 + $0x8] sm:$0xff]  ;;  %4136 = vmatprep.subr.bf16.mxu0 %v4557_v20 }
  0x64   : > { %589 = vrot.lane.b32.xlu1 %v556_v42, %s6494_s20  ;;  %1412 = vst.msk [vmem:[#allocation3 + $0x88] sm:$0xff] %vm352_vm0, %v5038_v6  ;;  %v459_v23 = vld [vmem:[#allocation2] sm:$0xff]  ;;  %v1109_v26 = vld [vmem:[#allocation2 + $0x78] sm:$0xff]  ;;  %4137 = vmatpush3.bf16.msra.mxu0 %v4558_v21  ;;  %v4561_v30 = vld [vmem:[%s6481_s1 + $0x68] sm:$0xff]  }
  0x65   : > { %1169 = vrot.lane.b32.xlu0 %v4995_v46, %s6492_s28  ;;  %v491_v24 = vpack.c.bf16 %v460_v22, %v459_v23  ;;  %v4559_v25 = vld [vmem:[%s6481_s1 + $0x60] sm:$0xff]   ;;  %v418_v38 = vld [vmem:[%s4864_s19 + $0xb8] sm:$0xff]  ;;  %v4563_v40 = vld [vmem:[%s6481_s1 + $0x70] sm:$0xff]  }
  0x66   : > { %v1110_v27 = vld [vmem:[#allocation2 + $0x80] sm:$0xff]  ;;  %4138 = vmatprep.subr.bf16.mxu0 %v4559_v25  ;;  %v4562_v39 = vld [vmem:[%s6481_s1 + $0x28] sm:$0xff]   ;;  %450 = vst.msk [vmem:[#allocation2 + $0x129] sm:$0xff] %vm352_vm0, %v418_v38  ;;  %v4564_v42 = vld [vmem:[%s6481_s1 + $0x30] sm:$0xff]  }
  0x67   : > { %507 = vst.msk [vmem:[#allocation3] sm:$0xff] %vm352_vm0, %v491_v24  ;;  %v4560_v29 = vld [vmem:[%s6481_s1 + $0x20] sm:$0xff]   ;;  %v5110_v34 = vpack.c.bf16 %v1110_v27, %v1109_v26  ;;  %v4568_v43 = vld [vmem:[%s6481_s1 + $0x88] sm:$0xff]   ;;  %v1111_v44 = vld [vmem:[#allocation2 + $0x90] sm:$0xff] }
  0x68   : > { %718 = vrot.lane.b32.xlu1 %v4982_v28, %s6492_s28  ;;  %v1249_v28 = vld [vmem:[#allocation2 + $0x109] sm:$0xff]  ;;  %4139 = vmatpush3.bf16.msra.mxu0 %v4560_v29  ;;  %v4565_v45 = vld [vmem:[%s6481_s1 + $0x78] sm:$0xff]   ;;  %v421_v49 = vld [vmem:[%s4864_s19 + $0xd0] sm:$0xff]  ;;  %s4129_s28 = sshll.u32 %s4775_s13, 12  ;;  %s3954_s13 = scalar_lea.sflag [#allocation6], %s4858_s29 }
  0x69   : > { %1297 = vrot.lane.b32.xlu0 %v5001_v50, %s4698_s14  ;;  %4140 = vmatprep.subr.bf16.mxu0 %v4561_v30  ;;  %v419_v47 = vld [vmem:[%s4864_s19 + $0xc0] sm:$0xff]  ;;  %v420_v48 = vld [vmem:[%s4864_s19 + $0xc8] sm:$0xff]  ;;  %453 = vst.msk [vmem:[#allocation2 + $0x151] sm:$0xff] %vm352_vm0, %v421_v49  ;;  %v467_v7 = vld [vmem:[#allocation2 + $0x60] sm:$0xff] }
  0x6a   : > { %v1250_v31 = vld [vmem:[#allocation2 + $0x111] sm:$0xff]  ;;  %451 = vst.msk [vmem:[#allocation2 + $0x139] sm:$0xff] %vm352_vm0, %v419_v47  ;;  %452 = vst.msk [vmem:[#allocation2 + $0x141] sm:$0xff] %vm352_vm0, %v420_v48  ;;  %v468_v8 = vld [vmem:[#allocation2 + $0x68] sm:$0xff] }
  0x6b   : > { %v994_v32 = vld [vmem:[#allocation2 + $0x10a] sm:$0xff]  ;;  %v995_v33 = vld [vmem:[#allocation2 + $0x112] sm:$0xff]  ;;  %v5112_v35 = vpack.c.bf16 %v1250_v31, %v1249_v28  ;;  %v495_v9 = vpack.c.bf16 %v468_v8, %v467_v7  ;;  %v425_v10 = vld [vmem:[%s4864_s19 + $0xf0] sm:$0xff] }
  0x6c   : > { %847 = vrot.lane.b32.xlu1 %v4986_v36, %s4698_s14  ;;  %v5114_v36 = vpack.c.bf16 %v995_v33, %v994_v32  ;;  %4141 = vmatpush3.bf16.msra.mxu0 %v4562_v39  ;;  %v4567_v53 = vld [vmem:[%s6481_s1 + $0x38] sm:$0xff]   ;;  %v1431_v1 = vld [vmem:[#allocation3 + $0x40] sm:$0xff]  ;;  %v426_v11 = vld [vmem:[%s4864_s19 + $0xf8] sm:$0xff]  ;;  %457 = vst.msk [vmem:[#allocation2 + $0x181] sm:$0xff] %vm352_vm0, %v425_v10 }
  0x6d   : > { %1042 = vrot.lane.b32.xlu0 %v5003_v51, %s6494_s20  ;;  %968 = vst.msk [vmem:[#allocation3 + $0xf8] sm:$0xff] %vm352_vm0, %v5112_v35  ;;  %4142 = vmatprep.subr.bf16.mxu0 %v4563_v40  ;;  %v1252_v54 = vld [vmem:[#allocation2 + $0x129] sm:$0xff]  ;;  %v1428_v61 = vld [vmem:[#allocation3 + $0x28] sm:$0xff]  ;;  %458 = vst.msk [vmem:[#allocation2 + $0x189] sm:$0xff] %vm352_vm0, %v426_v11 }
  0x6e   : > { %1416 = vst.msk [vmem:[#allocation3 + $0xe8] sm:$0xff] %vm352_vm0, %v5114_v36  ;;  %v997_v58 = vld [vmem:[#allocation2 + $0x12a] sm:$0xff]  ;;  %v424_v5 = vld [vmem:[%s4864_s19 + $0xe8] sm:$0xff]  ;;  %v470_v13 = vld [vmem:[#allocation2 + $0x80] sm:$0xff] }
  0x6f   : > { %v423_v2 = vld [vmem:[%s4864_s19 + $0xe0] sm:$0xff]  ;;  %456 = vst.msk [vmem:[#allocation2 + $0x171] sm:$0xff] %vm352_vm0, %v424_v5  ;;  %v469_v12 = vld [vmem:[#allocation2 + $0x78] sm:$0xff]  ;;  %511 = vst.msk [vmem:[#allocation3 + $0x60] sm:$0xff] %vm352_vm0, %v495_v9 }
  0x70   : > { %591 = vrot.lane.b32.xlu1 %v4988_v37, %s6494_s20  ;;  %v417_v37 = vld [vmem:[%s4864_s19 + $0xb0] sm:$0xff]  ;;  %4143 = vmatpush3.bf16.msra.mxu0 %v4564_v42  ;;  %455 = vst.msk [vmem:[#allocation2 + $0x169] sm:$0xff] %vm352_vm0, %v423_v2  ;;  %v1367_v14 = vld [vmem:[#allocation2 + $0x92] sm:$0xff]  ;;  %v496_v20 = vpack.c.bf16 %v470_v13, %v469_v12  ;;  %v922_v7 = vld [vmem:[#allocation2 + $0xa9] sm:$0xff] }
  0x71   : > { %1171 = vrot.lane.b32.xlu0 %v5073_v16, %s6501_s23  ;;  %449 = vst.msk [vmem:[#allocation2 + $0x121] sm:$0xff] %vm352_vm0, %v417_v37  ;;  %4144 = vmatprep.subr.bf16.mxu0 %v4565_v45  ;;  %v1368_v15 = vld [vmem:[#allocation2 + $0x9a] sm:$0xff]  ;;  %v999_v26 = vld [vmem:[#allocation2 + $0x142] sm:$0xff]  ;;  %v1127_v27 = vld [vmem:[#allocation2 + $0x150] sm:$0xff] }
  0x72   : > { %v985_v17 = vld [vmem:[#allocation2 + $0x9a] sm:$0xff]  ;;  %v1395_v21 = vpack.c.bf16 %v1368_v15, %v1367_v14  ;;  %512 = vst.msk [vmem:[#allocation3 + $0x78] sm:$0xff] %vm352_vm0, %v496_v20  ;;  %v1255_v31 = vld [vmem:[#allocation2 + $0x151] sm:$0xff]  ;;  %v1434_v37 = vld [vmem:[#allocation3 + $0x58] sm:$0xff] }
  0x73   : > { %v1125_v18 = vld [vmem:[#allocation2 + $0x138] sm:$0xff]  ;;  %v1254_v22 = vld [vmem:[#allocation2 + $0x141] sm:$0xff]  ;;  %v1114_v47 = vld [vmem:[#allocation2 + $0xb0] sm:$0xff] }
  0x74   : > { %720 = vrot.lane.b32.xlu1 %v4990_v41, %s6501_s23  ;;  %v4566_v41 = vld [vmem:[%s6481_s1 + $0x80] sm:$0xff]   ;;  %4145 = vmatpush3.bf16.msra.mxu0 %v4567_v53  ;;  %1411 = vst.msk [vmem:[#allocation3 + $0x70] sm:$0xff] %vm352_vm0, %v1395_v21  ;;  %v1260_v53 = vld [vmem:[#allocation2 + $0x189] sm:$0xff]  ;;  %v923_v8 = vld [vmem:[#allocation2 + $0xb1] sm:$0xff] }
  0x75   : > { %1299 = vrot.lane.b32.xlu0 %v5012_v56, %s4698_s14  ;;  %4397 = vmatprep.subr.bf16.mxu1 %v4566_v41  ;;  %v1253_v19 = vld [vmem:[#allocation2 + $0x139] sm:$0xff]  ;;  %v471_v9 = vld [vmem:[#allocation2 + $0x90] sm:$0xff]  ;;  %v948_v12 = vpack.c.bf16 %v923_v8, %v922_v7  ;;  %v1371_v15 = vld [vmem:[#allocation2 + $0xc2] sm:$0xff] }
  0x76   : > { %4398 = vmatpush3.bf16.msra.mxu1 %v4566_v41  ;;  %v998_v23 = vld [vmem:[#allocation2 + $0x13a] sm:$0xff]  ;;  %v5193_v25 = vpack.c.bf16 %v1254_v22, %v1253_v19  ;;  %v1374_v20 = vld [vmem:[#allocation2 + $0xe2] sm:$0xff] }
  0x77   : > { %4399 = vmatprep.subr.bf16.mxu1 %v4568_v43  ;;  %v5199_v29 = vpack.c.bf16 %v999_v26, %v998_v23  ;;  %v1129_v40 = vld [vmem:[#allocation2 + $0x168] sm:$0xff]  ;;  %v472_v10 = vld [vmem:[#allocation2 + $0x98] sm:$0xff]  ;;  %964 = vst.msk [vmem:[#allocation3 + $0x98] sm:$0xff] %vm352_vm0, %v948_v12 }
  0x78   : > { %849 = vrot.lane.b32.xlu1 %v4995_v46, %s4698_s14  ;;  %v1425_v46 = vld [vmem:[#allocation3 + $0x10] sm:$0xff]  ;;  %v1257_v41 = vld [vmem:[#allocation2 + $0x169] sm:$0xff]  ;;  %970 = vst.msk [vmem:[#allocation3 + $0x128] sm:$0xff] %vm352_vm0, %v5193_v25  ;;  %v1440_v11 = vld [vmem:[#allocation3 + $0x88] sm:$0xff]  ;;  %v497_v13 = vpack.c.bf16 %v472_v10, %v471_v9 }
  0x79   : > { %1044 = vrot.lane.b32.xlu0 %v5014_v57, %s6494_s20  ;;  %v1251_v52 = vld [vmem:[#allocation2 + $0x121] sm:$0xff]  ;;  %4401 = vmatprep.mubr.msk.bf16.mxu1 %vm352_vm0, %v1425_v46  ;;  %v1002_v45 = vld [vmem:[#allocation2 + $0x16a] sm:$0xff]  ;;  %1418 = vst.msk [vmem:[#allocation3 + $0x118] sm:$0xff] %vm352_vm0, %v5199_v29  ;;  %v1120_v12 = vld [vmem:[#allocation2 + $0xf8] sm:$0xff] }
  0x7a   : > { %v996_v55 = vld [vmem:[#allocation2 + $0x122] sm:$0xff]  ;;  %v5164_v59 = vpack.c.bf16 %v1252_v54, %v1251_v52  ;;  %4400 = vmatpush3.bf16.msra.mxu1 %v4568_v43  ;;  %v1130_v43 = vld [vmem:[#allocation2 + $0x170] sm:$0xff]  ;;  %513 = vst.msk [vmem:[#allocation3 + $0x90] sm:$0xff] %vm352_vm0, %v497_v13  ;;  %v1373_v19 = vld [vmem:[#allocation2 + $0xda] sm:$0xff] }
  0x7b   : > { %v5166_v60 = vpack.c.bf16 %v997_v58, %v996_v55  ;;  %v1113_v46 = vld [vmem:[#allocation2 + $0xa8] sm:$0xff]  ;;  %v5219_v48 = vpack.c.bf16 %v1130_v43, %v1129_v40  ;;  %v1437_v2 = vld [vmem:[#allocation3 + $0x70] sm:$0xff]  ;;  %v1398_v22 = vpack.c.bf16 %v1374_v20, %v1373_v19  ;;  %v1117_v43 = vld [vmem:[#allocation2 + $0xd8] sm:$0xff] }
  0x7c   : > { %593 = vrot.lane.b32.xlu1 %v5001_v50, %s6494_s20  ;;  %v422_v50 = vld [vmem:[%s4864_s19 + $0xd8] sm:$0xff]  ;;  %s6502_s20 = smov 32   ;;  %969 = vst.msk [vmem:[#allocation3 + $0x110] sm:$0xff] %vm352_vm0, %v5164_v59  ;;  %v1119_v9 = vld [vmem:[#allocation2 + $0xf0] sm:$0xff] }
  0x7d   : > { %1173 = vrot.lane.b32.xlu0 %v5110_v34, %s6501_s23  ;;  %454 = vst.msk [vmem:[#allocation2 + $0x159] sm:$0xff] %vm352_vm0, %v422_v50  ;;  %1417 = vst.msk [vmem:[#allocation3 + $0x100] sm:$0xff] %vm352_vm0, %v5166_v60  ;;  %4402 = vmatmul.mubr.msk.bf16.vlgmr.msra.gmra.mrb[0].mxu1 %vm352_vm0, %v1428_v61  ;;  %v1003_v50 = vld [vmem:[#allocation2 + $0x172] sm:$0xff]  ;;  %v1259_v52 = vld [vmem:[#allocation2 + $0x181] sm:$0xff] }
  0x7e   : > { %4405 = vmatprep.mubr.msk.bf16.mxu1 %vm352_vm0, %v1431_v1  ;;  %v1004_v54 = vld [vmem:[#allocation2 + $0x182] sm:$0xff]  ;;  %v5232_v58 = vpack.c.bf16 %v1260_v53, %v1259_v52  ;;  %v1005_v61 = vld [vmem:[#allocation2 + $0x18a] sm:$0xff]  ;;  %522 = vst.msk [vmem:[#allocation3 + $0x168] sm:$0xff] %vm352_vm0, %v5219_v48  ;;  %1414 = vst.msk [vmem:[#allocation3 + $0xb8] sm:$0xff] %vm352_vm0, %v1398_v22 }
  0x7f   : > { %v1241_v55 = vld [vmem:[#allocation2 + $0xa9] sm:$0xff]  ;;  %v1242_v1 = vld [vmem:[#allocation2 + $0xb1] sm:$0xff]  ;;  %v5242_v5 = vpack.c.bf16 %v1005_v61, %v1004_v54  ;;  %v924_v21 = vld [vmem:[#allocation2 + $0xc1] sm:$0xff] }
  0x80   : > { %722 = vrot.lane.b32.xlu1 %v5003_v51, %s6501_s23  ;;  %v1112_v51 = vld [vmem:[#allocation2 + $0x98] sm:$0xff]  ;;  %973 = vst.msk [vmem:[#allocation3 + $0x170] sm:$0xff] %vm352_vm0, %v5232_v58  ;;  %v1268_v14 = vpack.c.bf16 %v1242_v1, %v1241_v55  ;;  %v473_v26 = vld [vmem:[#allocation2 + $0xa8] sm:$0xff] }
  0x81   : > { %1301 = vrot.lane.b32.xlu0 %v5021_v62, %s4698_s14  ;;  %v5171_v4 = vpack.c.bf16 %v1112_v51, %v1111_v44  ;;  %v1258_v44 = vld [vmem:[#allocation2 + $0x171] sm:$0xff]  ;;  %v5227_v51 = vpack.c.bf16 %v1003_v50, %v1002_v45  ;;  %1421 = vst.msk [vmem:[#allocation3 + $0x160] sm:$0xff] %vm352_vm0, %v5242_v5  ;;  %v1118_v45 = vld [vmem:[#allocation2 + $0xe0] sm:$0xff]  ;;  %v476_v50 = vld [vmem:[#allocation2 + $0xc8] sm:$0xff] }
  0x82   : > { %v5221_v49 = vpack.c.bf16 %v1258_v44, %v1257_v41  ;;  %v926_v44 = vld [vmem:[#allocation2 + $0xd9] sm:$0xff]  ;;  %v1246_v54 = vld [vmem:[#allocation2 + $0xe1] sm:$0xff]  ;;  %v928_v10 = vld [vmem:[#allocation2 + $0xf1] sm:$0xff] }
  0x83   : > { %1420 = vst.msk [vmem:[#allocation3 + $0x148] sm:$0xff] %vm352_vm0, %v5227_v51  ;;  %v1245_v53 = vld [vmem:[#allocation2 + $0xd9] sm:$0xff]  ;;  %v991_v1 = vld [vmem:[#allocation2 + $0xe2] sm:$0xff] }
  0x84   : > { %851 = vrot.lane.b32.xlu1 %v5073_v16, %s4698_s14  ;;  %v984_v16 = vld [vmem:[#allocation2 + $0x92] sm:$0xff]  ;;  %v1001_v39 = vld [vmem:[#allocation2 + $0x15a] sm:$0xff]  ;;  %972 = vst.msk [vmem:[#allocation3 + $0x158] sm:$0xff] %vm352_vm0, %v5221_v49  ;;  %v1270_v55 = vpack.c.bf16 %v1246_v54, %v1245_v53  ;;  %v484_v54 = vld [vmem:[#allocation2 + $0x128] sm:$0xff] }
  0x85   : > { %1046 = vrot.lane.b32.xlu0 %v5023_v63, %s6502_s20  ;;  %v1128_v28 = vld [vmem:[#allocation2 + $0x158] sm:$0xff]  ;;  %4406 = vmatmul.mubr.msk.bf16.gmra.mrb[4].mxu1 %vm352_vm0, %v1434_v37  ;;  %v1446_v40 = vld [vmem:[#allocation3 + $0xb8] sm:$0xff]  ;;  %v483_v53 = vld [vmem:[#allocation2 + $0x120] sm:$0xff] }
  0x86   : > { %v5201_v30 = vpack.c.bf16 %v1128_v28, %v1127_v27  ;;  %v1256_v32 = vld [vmem:[#allocation2 + $0x159] sm:$0xff]  ;;  %4409 = vmatprep.mubr.msk.bf16.mxu1 %vm352_vm0, %v1437_v2  ;;  %v474_v27 = vld [vmem:[#allocation2 + $0xb0] sm:$0xff]  ;;  %v1243_v28 = vld [vmem:[#allocation2 + $0xc1] sm:$0xff] }
  0x87   : > { %v1000_v33 = vld [vmem:[#allocation2 + $0x152] sm:$0xff]  ;;  %v5203_v38 = vpack.c.bf16 %v1256_v32, %v1255_v31  ;;  %v1244_v31 = vld [vmem:[#allocation2 + $0xc9] sm:$0xff]  ;;  %v990_v61 = vld [vmem:[#allocation2 + $0xda] sm:$0xff] }
  0x88   : > { %595 = vrot.lane.b32.xlu1 %v5012_v56, %s6502_s20  ;;  %v1126_v56 = vld [vmem:[#allocation2 + $0x140] sm:$0xff]  ;;  %v5213_v42 = vpack.c.bf16 %v1001_v39, %v1000_v33  ;;  %521 = vst.msk [vmem:[#allocation3 + $0x150] sm:$0xff] %vm352_vm0, %v5201_v30  ;;  %v989_v39 = vld [vmem:[#allocation2 + $0xca] sm:$0xff]  ;;  %v1014_v8 = vpack.c.bf16 %v991_v1, %v990_v61  ;;  %v992_v20 = vld [vmem:[#allocation2 + $0xf2] sm:$0xff]  ;;  %v503_v1 = vpack.c.bf16 %v484_v54, %v483_v53 }
  0x89   : > { %1175 = vrot.lane.b32.xlu0 %v5171_v4, %s6501_s23  ;;  %v5191_v24 = vpack.c.bf16 %v1126_v56, %v1125_v18  ;;  %971 = vst.msk [vmem:[#allocation3 + $0x140] sm:$0xff] %vm352_vm0, %v5203_v38  ;;  %v925_v56 = vld [vmem:[#allocation2 + $0xc9] sm:$0xff]  ;;  %v1376_v2 = vld [vmem:[#allocation2 + $0xfa] sm:$0xff] }
  0x8a   : > { %1419 = vst.msk [vmem:[#allocation3 + $0x130] sm:$0xff] %vm352_vm0, %v5213_v42  ;;  %v949_v23 = vpack.c.bf16 %v925_v56, %v924_v21  ;;  %v988_v33 = vld [vmem:[#allocation2 + $0xc2] sm:$0xff]  ;;  %v993_v21 = vld [vmem:[#allocation2 + $0xfa] sm:$0xff]  ;;  %519 = vst.msk [vmem:[#allocation3 + $0x120] sm:$0xff] %vm352_vm0, %v503_v1 }
  0x8b   : > { %520 = vst.msk [vmem:[#allocation3 + $0x138] sm:$0xff] %vm352_vm0, %v5191_v24  ;;  %v1013_v41 = vpack.c.bf16 %v989_v39, %v988_v33  ;;  %v1452_v56 = vld [vmem:[#allocation3 + $0xe8] sm:$0xff]  ;;  %v1015_v22 = vpack.c.bf16 %v993_v21, %v992_v20  ;;  %v481_v39 = vld [vmem:[#allocation2 + $0x108] sm:$0xff] }
  0x8c   : > { %724 = vrot.lane.b32.xlu1 %v5014_v57, %s6501_s23  ;;  %v5211_v57 = vpack.c.bf16 %v985_v17, %v984_v16  ;;  %v1372_v16 = vld [vmem:[#allocation2 + $0xca] sm:$0xff]  ;;  %965 = vst.msk [vmem:[#allocation3 + $0xb0] sm:$0xff] %vm352_vm0, %v949_v23  ;;  %v1389_v21 = vld [vmem:[#allocation2 + $0x19a] sm:$0xff] }
  0x8d   : > { %1303 = vrot.lane.b32.xlu0 %v5031_v3, %s4698_s14  ;;  %v1116_v17 = vld [vmem:[#allocation2 + $0xc8] sm:$0xff]  ;;  %4410 = vmatmul.mubr.msk.bf16.gmra.mrb[8].mxu1 %vm352_vm0, %v1440_v11  ;;  %v1397_v18 = vpack.c.bf16 %v1372_v16, %v1371_v15  ;;  %v929_v11 = vld [vmem:[#allocation2 + $0xf9] sm:$0xff] }
  0x8e   : > { %v951_v13 = vpack.c.bf16 %v929_v11, %v928_v10  ;;  %v478_v15 = vld [vmem:[#allocation2 + $0xe0] sm:$0xff]  ;;  %v1121_v23 = vld [vmem:[#allocation2 + $0x108] sm:$0xff] }
  0x8f   : > { %1413 = vst.msk [vmem:[#allocation3 + $0xa0] sm:$0xff] %vm352_vm0, %v1397_v18 }
  0x90   : > { %853 = vrot.lane.b32.xlu1 %v5110_v34, %s4698_s14  ;;  %v5240_v34 = vpack.c.bf16 %v1114_v47, %v1113_v46  ;;  %v475_v47 = vld [vmem:[#allocation2 + $0xc0] sm:$0xff]  ;;  %967 = vst.msk [vmem:[#allocation3 + $0xe0] sm:$0xff] %vm352_vm0, %v951_v13 }
  0x91   : > { %1048 = vrot.lane.b32.xlu0 %v5211_v57, %s6502_s20  ;;  %v499_v52 = vpack.c.bf16 %v476_v50, %v475_v47  ;;  %v1455_v47 = vld [vmem:[#allocation3 + $0x100] sm:$0xff]  ;;  %v1458_v50 = vld [vmem:[#allocation3 + $0x118] sm:$0xff] }
  0x93   : > { %515 = vst.msk [vmem:[#allocation3 + $0xc0] sm:$0xff] %vm352_vm0, %v499_v52 }
  0x94   : > { %597 = vrot.lane.b32.xlu1 %v5021_v62, %s6502_s20  ;;  %v1115_v62 = vld [vmem:[#allocation2 + $0xc0] sm:$0xff] }
  0x95   : > { %1177 = vrot.lane.b32.xlu0 %v5240_v34, %s6501_s23  ;;  %v1141_v32 = vpack.c.bf16 %v1116_v17, %v1115_v62  ;;  %v1247_v62 = vld [vmem:[#allocation2 + $0xf1] sm:$0xff]  ;;  %v1248_v17 = vld [vmem:[#allocation2 + $0xf9] sm:$0xff] }
  0x96   : > { %v1443_v37 = vld [vmem:[#allocation3 + $0xa0] sm:$0xff]  ;;  %v1271_v18 = vpack.c.bf16 %v1248_v17, %v1247_v62 }
  0x97   : > { %4413 = vmatprep.mubr.msk.bf16.mxu1 %vm352_vm0, %v1443_v37  ;;  %v1124_v37 = vld [vmem:[#allocation2 + $0x128] sm:$0xff] }
  0x98   : > { %726 = vrot.lane.b32.xlu1 %v5023_v63, %s6501_s23  ;;  %v498_v63 = vpack.c.bf16 %v474_v27, %v473_v26  ;;  %4414 = vmatmul.mubr.msk.bf16.gmra.mrb[12].mxu1 %vm352_vm0, %v1446_v40  ;;  %v1122_v26 = vld [vmem:[#allocation2 + $0x110] sm:$0xff] }
  0x99   : > { %1305 = vrot.lane.b32.xlu0 %v1268_v14, %s4698_s14  ;;  %v479_v27 = vld [vmem:[#allocation2 + $0xf0] sm:$0xff] }
  0x9a   : > { %514 = vst.msk [vmem:[#allocation3 + $0xa8] sm:$0xff] %vm352_vm0, %v498_v63  ;;  %v480_v63 = vld [vmem:[#allocation2 + $0xf8] sm:$0xff]  ;;  %v482_v40 = vld [vmem:[#allocation2 + $0x110] sm:$0xff] }
  0x9c   : > { %855 = vrot.lane.b32.xlu1 %v5171_v4, %s4698_s14  ;;  %v1269_v4 = vpack.c.bf16 %v1244_v31, %v1243_v28  ;;  %v501_v28 = vpack.c.bf16 %v480_v63, %v479_v27  ;;  %v1144_v31 = vpack.c.bf16 %v1122_v26, %v1121_v23  ;;  %v1131_v23 = vld [vmem:[#allocation2 + $0x180] sm:$0xff]  ;;  %v1132_v26 = vld [vmem:[#allocation2 + $0x188] sm:$0xff] }
  0x9d   : > { %1050 = vrot.lane.b32.xlu0 %v5038_v6, %s6502_s20 }
  0x9e   : > { %517 = vst.msk [vmem:[#allocation3 + $0xf0] sm:$0xff] %vm352_vm0, %v501_v28 }
  0xa0   : > { %599 = vrot.lane.b32.xlu1 %v5031_v3, %s6502_s20  ;;  %v927_v3 = vld [vmem:[#allocation2 + $0xe1] sm:$0xff] }
  0xa1   : > { %1179 = vrot.lane.b32.xlu0 %v1141_v32, %s6501_s23  ;;  %v950_v46 = vpack.c.bf16 %v927_v3, %v926_v44 }
  0xa3   : > { %966 = vst.msk [vmem:[#allocation3 + $0xc8] sm:$0xff] %vm352_vm0, %v950_v46 }
  0xa4   : > { %728 = vrot.lane.b32.xlu1 %v5211_v57, %s6501_s23  ;;  %v1142_v57 = vpack.c.bf16 %v1118_v45, %v1117_v43  ;;  %v502_v43 = vpack.c.bf16 %v482_v40, %v481_v39  ;;  %v1133_v39 = vld [vmem:[#allocation2 + $0x198] sm:$0xff]  ;;  %v1134_v40 = vld [vmem:[#allocation2 + $0x1a0] sm:$0xff] }
  0xa5   : > { %1307 = vrot.lane.b32.xlu0 %v1269_v4, %s4698_s14 }
  0xa6   : > { %518 = vst.msk [vmem:[#allocation3 + $0x108] sm:$0xff] %vm352_vm0, %v502_v43 }
  0xa8   : > { %857 = vrot.lane.b32.xlu1 %v5240_v34, %s4698_s14  ;;  %v1375_v34 = vld [vmem:[#allocation2 + $0xf2] sm:$0xff] }
  0xa9   : > { %1052 = vrot.lane.b32.xlu0 %v1013_v41, %s6502_s20  ;;  %v1399_v7 = vpack.c.bf16 %v1376_v2, %v1375_v34 }
  0xab   : > { %1415 = vst.msk [vmem:[#allocation3 + $0xd0] sm:$0xff] %vm352_vm0, %v1399_v7 }
  0xac   : > { %601 = vrot.lane.b32.xlu1 %v1268_v14, %s6502_s20  ;;  %v477_v14 = vld [vmem:[#allocation2 + $0xd8] sm:$0xff] }
  0xad   : > { %1181 = vrot.lane.b32.xlu0 %v1142_v57, %s6501_s23  ;;  %v500_v16 = vpack.c.bf16 %v478_v15, %v477_v14  ;;  %v1461_v15 = vld [vmem:[#allocation3 + $0x130] sm:$0xff] }
  0xaf   : > { %516 = vst.msk [vmem:[#allocation3 + $0xd8] sm:$0xff] %vm352_vm0, %v500_v16  ;;  %v1464_v16 = vld [vmem:[#allocation3 + $0x148] sm:$0xff] }
  0xb0   : > { %730 = vrot.lane.b32.xlu1 %v5038_v6, %s6501_s23  ;;  %v1143_v6 = vpack.c.bf16 %v1120_v12, %v1119_v9 }
  0xb1   : > { %1309 = vrot.lane.b32.xlu0 %v1270_v55, %s4698_s14 }
  0xb2   : > { %v1449_v19 = vld [vmem:[#allocation3 + $0xd0] sm:$0xff] }
  0xb3   : > { %4417 = vmatprep.mubr.msk.bf16.mxu1 %vm352_vm0, %v1449_v19 }
  0xb4   : > { %859 = vrot.lane.b32.xlu1 %v1141_v32, %s4698_s14  ;;  %4418 = vmatmul.mubr.msk.bf16.gmra.mrb[16].mxu1 %vm352_vm0, %v1452_v56  ;;  %v1390_v56 = vld [vmem:[#allocation2 + $0x1a2] sm:$0xff] }
  0xb5   : > { %1054 = vrot.lane.b32.xlu0 %v1014_v8, %s6502_s20  ;;  %4421 = vmatprep.mubr.msk.bf16.mxu1 %vm352_vm0, %v1455_v47 }
  0xb8   : > { %603 = vrot.lane.b32.xlu1 %v1269_v4, %s6502_s20  ;;  %v1123_v4 = vld [vmem:[#allocation2 + $0x120] sm:$0xff] }
  0xb9   : > { %1183 = vrot.lane.b32.xlu0 %v1143_v6, %s6501_s23  ;;  %v588_v32 = vpop.permute.xlu0 %587  ;;  %v1145_v3 = vpack.c.bf16 %v1124_v37, %v1123_v4 }
  0xba   : > { %636 = vst.msk [vmem:[#allocation3] sm:$0xff] %vm635_vm3, %v588_v32  ;;  %v717_v33 = vpop.permute.xlu1 %716 }
  0xbb   : > { %765 = vst.msk [vmem:[#allocation3] sm:$0xff] %vm764_vm4, %v717_v33  ;;  %v1467_v33 = vld [vmem:[#allocation3 + $0x160] sm:$0xff] }
  0xbc   : > { %732 = vrot.lane.b32.xlu1 %v1013_v41, %s6501_s23  ;;  %4422 = vmatmul.mubr.msk.bf16.gmra.mrb[20].mxu1 %vm352_vm0, %v1458_v50 }
  0xbd   : > { %1311 = vrot.lane.b32.xlu0 %v1271_v18, %s4698_s14  ;;  %4425 = vmatprep.mubr.msk.bf16.mxu1 %vm352_vm0, %v1461_v15 }
  0xc0   : > { %861 = vrot.lane.b32.xlu1 %v1142_v57, %s4698_s14 }
  0xc1   : > { %1056 = vrot.lane.b32.xlu0 %v1015_v22, %s6502_s20 }
  0xc4   : > { %605 = vrot.lane.b32.xlu1 %v1270_v55, %s6502_s20  ;;  %4426 = vmatmul.mubr.msk.bf16.gmra.mrb[24].mxu1 %vm352_vm0, %v1464_v16 }
  0xc5   : > { %1185 = vrot.lane.b32.xlu0 %v1144_v31, %s6501_s23  ;;  %4429 = vmatprep.mubr.msk.bf16.mxu1 %vm352_vm0, %v1467_v33 }
  0xc8   : > { %734 = vrot.lane.b32.xlu1 %v1014_v8, %s6501_s23 }
  0xc9   : > { %1313 = vrot.lane.b32.xlu0 %v5112_v35, %s4698_s14 }
  0xcb   : > { %v1039_v41 = vpop.permute.xlu0 %1038 }
  0xcc   : > { %863 = vrot.lane.b32.xlu1 %v1143_v6, %s4698_s14  ;;  %1086 = vst.msk [vmem:[#allocation3 + $0x8] sm:$0xff] %vm635_vm3, %v1039_v41 }
  0xcd   : > { %1058 = vrot.lane.b32.xlu0 %v5114_v36, %s6502_s20 }
  0xce   : > { %v1168_v44 = vpop.permute.xlu1 %1167 }
  0xcf   : > { %1215 = vst.msk [vmem:[#allocation3 + $0x8] sm:$0xff] %vm764_vm4, %v1168_v44  ;;  %v1296_v45 = vpop.permute.xlu0 %1295 }
  0xd0   : > { %607 = vrot.lane.b32.xlu1 %v1271_v18, %s6502_s20  ;;  %1343 = vst.msk [vmem:[#allocation3 + $0x8] sm:$0xff] %vm893_vm5, %v1296_v45  ;;  %v1262_v45 = vld [vmem:[#allocation2 + $0x1a1] sm:$0xff] }
  0xd1   : > { %1187 = vrot.lane.b32.xlu0 %v1145_v3, %s6501_s23 }
  0xd2   : > { %v846_v46 = vpop.permute.xlu1 %845 }
  0xd3   : > { %894 = vst.msk [vmem:[#allocation3] sm:$0xff] %vm893_vm5, %v846_v46  ;;  %v1041_v52 = vpop.permute.xlu0 %1040 }
  0xd4   : > { %736 = vrot.lane.b32.xlu1 %v1015_v22, %s6501_s23  ;;  %1087 = vst.msk [vmem:[#allocation3 + $0x20] sm:$0xff] %vm635_vm3, %v1041_v52 }
  0xd5   : > { %1315 = vrot.lane.b32.xlu0 %v5164_v59, %s4698_s14 }
  0xd6   : > { %v590_v57 = vpop.permute.xlu1 %589 }
  0xd7   : > { %637 = vst.msk [vmem:[#allocation3 + $0x18] sm:$0xff] %vm635_vm3, %v590_v57  ;;  %v1170_v55 = vpop.permute.xlu0 %1169  ;;  %v1424_v61 = vld [vmem:[#allocation3 + $0x8] sm:$0xff] }
  0xd8   : > { %865 = vrot.lane.b32.xlu1 %v1144_v31, %s4698_s14  ;;  %1216 = vst.msk [vmem:[#allocation3 + $0x20] sm:$0xff] %vm764_vm4, %v1170_v55  ;;  %1702 = vmatprep.mubr.bf16.mxu0 %v1424_v61  ;;  %v1149_v31 = vpack.c.bf16 %v1132_v26, %v1131_v23 }
  0xd9   : > { %1060 = vrot.lane.b32.xlu0 %v5166_v60, %s6502_s20 }
  0xda   : > { %v719_v34 = vpop.permute.xlu1 %718  ;;  %v1423_v2 = vld [vmem:[#allocation3] sm:$0xff] }
  0xdb   : > { %766 = vst.msk [vmem:[#allocation3 + $0x18] sm:$0xff] %vm764_vm4, %v719_v34  ;;  %1703 = vmatmul.mubr.bf16.vlgmr.msra.gmra.mrb[0].mxu0 %v1423_v2  ;;  %v1298_v7 = vpop.permute.xlu0 %1297 }
  0xdc   : > { %609 = vrot.lane.b32.xlu1 %v5112_v35, %s6502_s20  ;;  %1344 = vst.msk [vmem:[#allocation3 + $0x20] sm:$0xff] %vm893_vm5, %v1298_v7 }
  0xdd   : > { %1189 = vrot.lane.b32.xlu0 %v5191_v24, %s6501_s23 }
  0xde   : > { %v848_v8 = vpop.permute.xlu1 %847 }
  0xdf   : > { %895 = vst.msk [vmem:[#allocation3 + $0x18] sm:$0xff] %vm893_vm5, %v848_v8  ;;  %v1043_v9 = vpop.permute.xlu0 %1042 }
  0xe0   : > { %738 = vrot.lane.b32.xlu1 %v5114_v36, %s6501_s23  ;;  %1088 = vst.msk [vmem:[#allocation3 + $0x38] sm:$0xff] %vm635_vm3, %v1043_v9 }
  0xe1   : > { %1317 = vrot.lane.b32.xlu0 %v5193_v25, %s4698_s14 }
  0xe2   : > { %v592_v10 = vpop.permute.xlu1 %591 }
  0xe3   : > { %638 = vst.msk [vmem:[#allocation3 + $0x30] sm:$0xff] %vm635_vm3, %v592_v10  ;;  %v1172_v35 = vpop.permute.xlu0 %1171  ;;  %v1427_v11 = vld [vmem:[#allocation3 + $0x20] sm:$0xff] }
  0xe4   : > { %867 = vrot.lane.b32.xlu1 %v1145_v3, %s4698_s14  ;;  %1217 = vst.msk [vmem:[#allocation3 + $0x38] sm:$0xff] %vm764_vm4, %v1172_v35  ;;  %1710 = vmatprep.mubr.bf16.mxu0 %v1427_v11  ;;  %v1150_v3 = vpack.c.bf16 %v1134_v40, %v1133_v39 }
  0xe5   : > { %1062 = vrot.lane.b32.xlu0 %v5199_v29, %s6502_s20 }
  0xe6   : > { %v721_v12 = vpop.permute.xlu1 %720  ;;  %v1426_v36 = vld [vmem:[#allocation3 + $0x18] sm:$0xff] }
  0xe7   : > { %767 = vst.msk [vmem:[#allocation3 + $0x30] sm:$0xff] %vm764_vm4, %v721_v12  ;;  %1711 = vmatmul.mubr.bf16.gmra.mrb[4].mxu0 %v1426_v36  ;;  %v1300_v13 = vpop.permute.xlu0 %1299 }
  0xe8   : > { %611 = vrot.lane.b32.xlu1 %v5164_v59, %s6502_s20  ;;  %1345 = vst.msk [vmem:[#allocation3 + $0x38] sm:$0xff] %vm893_vm5, %v1300_v13 }
  0xe9   : > { %1191 = vrot.lane.b32.xlu0 %v5201_v30, %s6501_s23 }
  0xea   : > { %v850_v14 = vpop.permute.xlu1 %849 }
  0xeb   : > { %896 = vst.msk [vmem:[#allocation3 + $0x30] sm:$0xff] %vm893_vm5, %v850_v14  ;;  %v1045_v6 = vpop.permute.xlu0 %1044 }
  0xec   : > { %740 = vrot.lane.b32.xlu1 %v5166_v60, %s6501_s23  ;;  %1089 = vst.msk [vmem:[#allocation3 + $0x50] sm:$0xff] %vm635_vm3, %v1045_v6 }
  0xed   : > { %1319 = vrot.lane.b32.xlu0 %v5203_v38, %s4698_s14 }
  0xee   : > { %v594_v59 = vpop.permute.xlu1 %593 }
  0xef   : > { %639 = vst.msk [vmem:[#allocation3 + $0x48] sm:$0xff] %vm635_vm3, %v594_v59  ;;  %v1174_v62 = vpop.permute.xlu0 %1173  ;;  %v1430_v17 = vld [vmem:[#allocation3 + $0x38] sm:$0xff] }
  0xf0   : > { %869 = vrot.lane.b32.xlu1 %v5191_v24, %s4698_s14  ;;  %1218 = vst.msk [vmem:[#allocation3 + $0x50] sm:$0xff] %vm764_vm4, %v1174_v62  ;;  %1718 = vmatprep.mubr.bf16.mxu0 %v1430_v17  ;;  %v2120_v17 = vld [vmem:[#allocation2 + $0x1] sm:$0xff] }
  0xf1   : > { %1064 = vrot.lane.b32.xlu0 %v5213_v42, %s6502_s20 }
  0xf2   : > { %v723_v60 = vpop.permute.xlu1 %722  ;;  %v1429_v18 = vld [vmem:[#allocation3 + $0x30] sm:$0xff] }
  0xf3   : > { %768 = vst.msk [vmem:[#allocation3 + $0x48] sm:$0xff] %vm764_vm4, %v723_v60  ;;  %1719 = vmatmul.mubr.bf16.gmra.mrb[8].mxu0 %v1429_v18  ;;  %v1302_v19 = vpop.permute.xlu0 %1301  ;;  %v2121_v60 = vld [vmem:[#allocation2 + $0x9] sm:$0xff] }
  0xf4   : > { %613 = vrot.lane.b32.xlu1 %v5193_v25, %s6502_s20  ;;  %1346 = vst.msk [vmem:[#allocation3 + $0x50] sm:$0xff] %vm893_vm5, %v1302_v19  ;;  %v1406_v25 = vpack.c.bf16 %v1390_v56, %v1389_v21  ;;  %v2248_v21 = vld [vmem:[#allocation2 + $0x2] sm:$0xff]  ;;  %v2249_v56 = vld [vmem:[#allocation2 + $0xa] sm:$0xff] }
  0xf5   : > { %1193 = vrot.lane.b32.xlu0 %v5219_v48, %s6501_s23 }
  0xf6   : > { %v852_v24 = vpop.permute.xlu1 %851  ;;  %1422 = vst.msk [vmem:[#allocation3 + $0x178] sm:$0xff] %vm352_vm0, %v1406_v25 }
  0xf7   : > { %897 = vst.msk [vmem:[#allocation3 + $0x48] sm:$0xff] %vm893_vm5, %v852_v24  ;;  %v1047_v20 = vpop.permute.xlu0 %1046  ;;  %v2152_v24 = vpack.c.bf16 %v2121_v60, %v2120_v17 }
  0xf8   : > { %742 = vrot.lane.b32.xlu1 %v5199_v29, %s6501_s23  ;;  %1090 = vst.msk [vmem:[#allocation3 + $0x68] sm:$0xff] %vm635_vm3, %v1047_v20 }
  0xf9   : > { %1321 = vrot.lane.b32.xlu0 %v5221_v49, %s4698_s14 }
  0xfa   : > { %v596_v22 = vpop.permute.xlu1 %595 }
  0xfb   : > { %640 = vst.msk [vmem:[#allocation3 + $0x60] sm:$0xff] %vm635_vm3, %v596_v22  ;;  %v1176_v27 = vpop.permute.xlu0 %1175  ;;  %v1433_v63 = vld [vmem:[#allocation3 + $0x50] sm:$0xff] }
  0xfc   : > { %871 = vrot.lane.b32.xlu1 %v5201_v30, %s4698_s14  ;;  %1219 = vst.msk [vmem:[#allocation3 + $0x68] sm:$0xff] %vm764_vm4, %v1176_v27  ;;  %1726 = vmatprep.mubr.bf16.mxu0 %v1433_v63 }
  0xfd   : > { %1066 = vrot.lane.b32.xlu0 %v5227_v51, %s6502_s20  ;;  %v1470_v4 = vld [vmem:[#allocation3 + $0x178] sm:$0xff] }
  0xfe   : > { %v725_v29 = vpop.permute.xlu1 %724  ;;  %v1432_v28 = vld [vmem:[#allocation3 + $0x48] sm:$0xff]  ;;  %4430 = vmatmul.mubr.msk.bf16.gmra.mrb[28].mxu1 %vm352_vm0, %v1470_v4  ;;  %3015 = vst.msk [vmem:[#allocation3 + $0x178] sm:$0xff] %vm352_vm0, %v1406_v25  ;;  %v2280_v25 = vpack.c.bf16 %v2249_v56, %v2248_v21 }
  0xff   : > { %769 = vst.msk [vmem:[#allocation3 + $0x60] sm:$0xff] %vm764_vm4, %v725_v29  ;;  %1727 = vmatmul.mubr.bf16.gmra.mrb[12].mxu0 %v1432_v28  ;;  %v1304_v30 = vpop.permute.xlu0 %1303 }
 0x100   : > { %615 = vrot.lane.b32.xlu1 %v5203_v38, %s6502_s20  ;;  %1347 = vst.msk [vmem:[#allocation3 + $0x68] sm:$0xff] %vm893_vm5, %v1304_v30 }
 0x101   : > { %1195 = vrot.lane.b32.xlu0 %v1149_v31, %s6501_s23 }
 0x102   : > { %v854_v32 = vpop.permute.xlu1 %853 }
 0x103   : > { %898 = vst.msk [vmem:[#allocation3 + $0x60] sm:$0xff] %vm893_vm5, %v854_v32  ;;  %v1049_v37 = vpop.permute.xlu0 %1048 }
 0x104   : > { %744 = vrot.lane.b32.xlu1 %v5213_v42, %s6501_s23  ;;  %1091 = vst.msk [vmem:[#allocation3 + $0x80] sm:$0xff] %vm635_vm3, %v1049_v37 }
 0x105   : > { %1323 = vrot.lane.b32.xlu0 %v5232_v58, %s4698_s14  ;;  %v1261_v58 = vld [vmem:[#allocation2 + $0x199] sm:$0xff] }
 0x106   : > { %v598_v38 = vpop.permute.xlu1 %597  ;;  %v1278_v47 = vpack.c.bf16 %v1262_v45, %v1261_v58 }
 0x107   : > { %641 = vst.msk [vmem:[#allocation3 + $0x78] sm:$0xff] %vm635_vm3, %v598_v38  ;;  %v1178_v41 = vpop.permute.xlu0 %1177  ;;  %v1436_v42 = vld [vmem:[#allocation3 + $0x68] sm:$0xff] }
 0x108   : > { %873 = vrot.lane.b32.xlu1 %v5219_v48, %s4698_s14  ;;  %1220 = vst.msk [vmem:[#allocation3 + $0x80] sm:$0xff] %vm764_vm4, %v1178_v41  ;;  %1734 = vmatprep.mubr.bf16.mxu0 %v1436_v42 }
 0x109   : > { %1068 = vrot.lane.b32.xlu0 %v5242_v5, %s6502_s20 }
 0x10a   : > { %v727_v43 = vpop.permute.xlu1 %726  ;;  %v1435_v44 = vld [vmem:[#allocation3 + $0x60] sm:$0xff] }
 0x10b   : > { %770 = vst.msk [vmem:[#allocation3 + $0x78] sm:$0xff] %vm764_vm4, %v727_v43  ;;  %1735 = vmatmul.mubr.bf16.gmra.mrb[16].mxu0 %v1435_v44  ;;  %v1306_v48 = vpop.permute.xlu0 %1305  ;;  %v5460_v44 = vld [vmem:[%s6483_s3 + $0x80] sm:$0xff]  }
 0x10c   : > { %617 = vrot.lane.b32.xlu1 %v5221_v49, %s6502_s20  ;;  %1348 = vst.msk [vmem:[#allocation3 + $0x80] sm:$0xff] %vm893_vm5, %v1306_v48  ;;  %4433 = vmatprep.subr.bf16.mxu0 %v5460_v44 }
 0x10d   : > { %1197 = vrot.lane.b32.xlu0 %v1150_v3, %s6501_s23  ;;  %4434 = vmatpush3.bf16.msra.mxu0 %v5460_v44 }
 0x10e   : > { %v856_v46 = vpop.permute.xlu1 %855 }
 0x10f   : > { %899 = vst.msk [vmem:[#allocation3 + $0x78] sm:$0xff] %vm893_vm5, %v856_v46  ;;  %v1051_v5 = vpop.permute.xlu0 %1050 }
 0x110   : > { %746 = vrot.lane.b32.xlu1 %v5227_v51, %s6501_s23  ;;  %1092 = vst.msk [vmem:[#allocation3 + $0x98] sm:$0xff] %vm635_vm3, %v1051_v5 }
 0x111   : > { %1325 = vrot.lane.b32.xlu0 %v1278_v47, %s4698_s14 }
 0x112   : > { %v600_v50 = vpop.permute.xlu1 %599 }
 0x113   : > { %642 = vst.msk [vmem:[#allocation3 + $0x90] sm:$0xff] %vm635_vm3, %v600_v50  ;;  %v1180_v49 = vpop.permute.xlu0 %1179  ;;  %v1439_v52 = vld [vmem:[#allocation3 + $0x80] sm:$0xff] }
 0x114   : > { %875 = vrot.lane.b32.xlu1 %v1149_v31, %s4698_s14  ;;  %1221 = vst.msk [vmem:[#allocation3 + $0x98] sm:$0xff] %vm764_vm4, %v1180_v49  ;;  %1742 = vmatprep.mubr.bf16.mxu0 %v1439_v52  ;;  %v4570_v49 = vld [vmem:[%s6483_s3 + $0x88] sm:$0xff]  }
 0x115   : > { %2790 = vrot.lane.b32.xlu0 %v1150_v3, %s6501_s23  ;;  %4435 = vmatprep.subr.bf16.mxu0 %v4570_v49 }
 0x116   : > { %v729_v57 = vpop.permute.xlu1 %728  ;;  %v1438_v53 = vld [vmem:[#allocation3 + $0x78] sm:$0xff]  ;;  %4436 = vmatpush3.bf16.msra.mxu0 %v4570_v49 }
 0x117   : > { %771 = vst.msk [vmem:[#allocation3 + $0x90] sm:$0xff] %vm764_vm4, %v729_v57  ;;  %1743 = vmatmul.mubr.bf16.gmra.mrb[20].mxu0 %v1438_v53  ;;  %v1308_v51 = vpop.permute.xlu0 %1307 }
 0x118   : > { %1349 = vst.msk [vmem:[#allocation3 + $0x98] sm:$0xff] %vm893_vm5, %v1308_v51  ;;  %2184 = vrot.lane.b32.xlu1 %v2152_v24, %s6502_s20 }
 0x11a   : > { %v858_v54 = vpop.permute.xlu1 %857 }
 0x11b   : > { %900 = vst.msk [vmem:[#allocation3 + $0x90] sm:$0xff] %vm893_vm5, %v858_v54  ;;  %v1053_v55 = vpop.permute.xlu0 %1052 }
 0x11c   : > { %1093 = vst.msk [vmem:[#allocation3 + $0xb0] sm:$0xff] %vm635_vm3, %v1053_v55  ;;  %2312 = vrot.lane.b32.xlu1 %v2280_v25, %s6501_s23 }
 0x11e   : > { %v602_v61 = vpop.permute.xlu1 %601 }
 0x11f   : > { %643 = vst.msk [vmem:[#allocation3 + $0xa8] sm:$0xff] %vm635_vm3, %v602_v61  ;;  %v1182_v1 = vpop.permute.xlu0 %1181  ;;  %v1442_v34 = vld [vmem:[#allocation3 + $0x98] sm:$0xff] }
 0x120   : > { %1222 = vst.msk [vmem:[#allocation3 + $0xb0] sm:$0xff] %vm764_vm4, %v1182_v1  ;;  %1750 = vmatprep.mubr.bf16.mxu0 %v1442_v34 }
 0x122   : > { %v731_v2 = vpop.permute.xlu1 %730  ;;  %v1441_v7 = vld [vmem:[#allocation3 + $0x90] sm:$0xff] }
 0x123   : > { %772 = vst.msk [vmem:[#allocation3 + $0xa8] sm:$0xff] %vm764_vm4, %v731_v2  ;;  %1751 = vmatmul.mubr.bf16.gmra.mrb[24].mxu0 %v1441_v7  ;;  %v1310_v8 = vpop.permute.xlu0 %1309 }
 0x124   : > { %1350 = vst.msk [vmem:[#allocation3 + $0xb0] sm:$0xff] %vm893_vm5, %v1310_v8 }
 0x126   : > { %v860_v9 = vpop.permute.xlu1 %859 }
 0x127   : > { %901 = vst.msk [vmem:[#allocation3 + $0xa8] sm:$0xff] %vm893_vm5, %v860_v9  ;;  %v1055_v10 = vpop.permute.xlu0 %1054 }
 0x128   : > { %1094 = vst.msk [vmem:[#allocation3 + $0xc8] sm:$0xff] %vm635_vm3, %v1055_v10 }
 0x12a   : > { %v604_v35 = vpop.permute.xlu1 %603 }
 0x12b   : > { %644 = vst.msk [vmem:[#allocation3 + $0xc0] sm:$0xff] %vm635_vm3, %v604_v35  ;;  %v1184_v11 = vpop.permute.xlu0 %1183  ;;  %v1445_v12 = vld [vmem:[#allocation3 + $0xb0] sm:$0xff] }
 0x12c   : > { %1223 = vst.msk [vmem:[#allocation3 + $0xc8] sm:$0xff] %vm764_vm4, %v1184_v11  ;;  %1758 = vmatprep.mubr.bf16.mxu0 %v1445_v12 }
 0x12e   : > { %v733_v36 = vpop.permute.xlu1 %732  ;;  %v1444_v13 = vld [vmem:[#allocation3 + $0xa8] sm:$0xff] }
 0x12f   : > { %773 = vst.msk [vmem:[#allocation3 + $0xc0] sm:$0xff] %vm764_vm4, %v733_v36  ;;  %1759 = vmatmul.mubr.bf16.gmra.mrb[28].mxu0 %v1444_v13  ;;  %v1312_v14 = vpop.permute.xlu0 %1311 }
 0x130   : > { %1351 = vst.msk [vmem:[#allocation3 + $0xc8] sm:$0xff] %vm893_vm5, %v1312_v14 }
 0x132   : > { %v862_v15 = vpop.permute.xlu1 %861 }
 0x133   : > { %902 = vst.msk [vmem:[#allocation3 + $0xc0] sm:$0xff] %vm893_vm5, %v862_v15  ;;  %v1057_v16 = vpop.permute.xlu0 %1056 }
 0x134   : > { %1095 = vst.msk [vmem:[#allocation3 + $0xe0] sm:$0xff] %vm635_vm3, %v1057_v16 }
 0x136   : > { %v606_v6 = vpop.permute.xlu1 %605 }
 0x137   : > { %645 = vst.msk [vmem:[#allocation3 + $0xd8] sm:$0xff] %vm635_vm3, %v606_v6  ;;  %v1186_v59 = vpop.permute.xlu0 %1185  ;;  %v1448_v62 = vld [vmem:[#allocation3 + $0xc8] sm:$0xff] }
 0x138   : > { %1224 = vst.msk [vmem:[#allocation3 + $0xe0] sm:$0xff] %vm764_vm4, %v1186_v59  ;;  %1766 = vmatprep.mubr.bf16.mxu0 %v1448_v62 }
 0x13a   : > { %v735_v18 = vpop.permute.xlu1 %734  ;;  %v1447_v19 = vld [vmem:[#allocation3 + $0xc0] sm:$0xff] }
 0x13b   : > { %774 = vst.msk [vmem:[#allocation3 + $0xd8] sm:$0xff] %vm764_vm4, %v735_v18  ;;  %1767 = vmatmul.mubr.bf16.gmra.mrb[32].mxu0 %v1447_v19  ;;  %v1314_v20 = vpop.permute.xlu0 %1313 }
 0x13c   : > { %1352 = vst.msk [vmem:[#allocation3 + $0xe0] sm:$0xff] %vm893_vm5, %v1314_v20 }
 0x13e   : > { %v864_v22 = vpop.permute.xlu1 %863 }
 0x13f   : > { %903 = vst.msk [vmem:[#allocation3 + $0xd8] sm:$0xff] %vm893_vm5, %v864_v22  ;;  %v1059_v23 = vpop.permute.xlu0 %1058 }
 0x140   : > { %1096 = vst.msk [vmem:[#allocation3 + $0xf8] sm:$0xff] %vm635_vm3, %v1059_v23 }
 0x142   : > { %v608_v26 = vpop.permute.xlu1 %607 }
 0x143   : > { %646 = vst.msk [vmem:[#allocation3 + $0xf0] sm:$0xff] %vm635_vm3, %v608_v26  ;;  %v1188_v27 = vpop.permute.xlu0 %1187  ;;  %v1451_v63 = vld [vmem:[#allocation3 + $0xe0] sm:$0xff] }
 0x144   : > { %1225 = vst.msk [vmem:[#allocation3 + $0xf8] sm:$0xff] %vm764_vm4, %v1188_v27  ;;  %1774 = vmatprep.mubr.bf16.mxu0 %v1451_v63 }
 0x146   : > { %v737_v29 = vpop.permute.xlu1 %736  ;;  %v1450_v28 = vld [vmem:[#allocation3 + $0xd8] sm:$0xff] }
 0x147   : > { %775 = vst.msk [vmem:[#allocation3 + $0xf0] sm:$0xff] %vm764_vm4, %v737_v29  ;;  %1775 = vmatmul.mubr.bf16.gmra.mrb[36].mxu0 %v1450_v28  ;;  %v1316_v31 = vpop.permute.xlu0 %1315 }
 0x148   : > { %1353 = vst.msk [vmem:[#allocation3 + $0xf8] sm:$0xff] %vm893_vm5, %v1316_v31 }
 0x14a   : > { %v866_v30 = vpop.permute.xlu1 %865 }
 0x14b   : > { %904 = vst.msk [vmem:[#allocation3 + $0xf0] sm:$0xff] %vm893_vm5, %v866_v30  ;;  %v1061_v32 = vpop.permute.xlu0 %1060 }
 0x14c   : > { %1097 = vst.msk [vmem:[#allocation3 + $0x110] sm:$0xff] %vm635_vm3, %v1061_v32 }
 0x14e   : > { %v610_v33 = vpop.permute.xlu1 %609 }
 0x14f   : > { %647 = vst.msk [vmem:[#allocation3 + $0x108] sm:$0xff] %vm635_vm3, %v610_v33  ;;  %v1190_v4 = vpop.permute.xlu0 %1189  ;;  %v1454_v37 = vld [vmem:[#allocation3 + $0xf8] sm:$0xff] }
 0x150   : > { %1226 = vst.msk [vmem:[#allocation3 + $0x110] sm:$0xff] %vm764_vm4, %v1190_v4  ;;  %1782 = vmatprep.mubr.bf16.mxu0 %v1454_v37  ;;  %v5462_v45 = vpop.f32.mrb[0].mxu1 }
 0x151   : > { %v5465_v48 = vpop.f32.mrb[1].mxu1 }
 0x152   : > { %v739_v38 = vpop.permute.xlu1 %738  ;;  %v1453_v39 = vld [vmem:[#allocation3 + $0xf0] sm:$0xff]  ;;  %v5468_v5 = vpop.f32.mrb[2].mxu1 }
 0x153   : > { %776 = vst.msk [vmem:[#allocation3 + $0x108] sm:$0xff] %vm764_vm4, %v739_v38  ;;  %1783 = vmatmul.mubr.bf16.gmra.mrb[40].mxu0 %v1453_v39  ;;  %v1318_v40 = vpop.permute.xlu0 %1317  ;;  %v5472_v50 = vpop.f32.mrb[3].mxu1 }
 0x154   : > { %1354 = vst.msk [vmem:[#allocation3 + $0x110] sm:$0xff] %vm893_vm5, %v1318_v40 }
 0x156   : > { %v868_v41 = vpop.permute.xlu1 %867 }
 0x157   : > { %905 = vst.msk [vmem:[#allocation3 + $0x108] sm:$0xff] %vm893_vm5, %v868_v41  ;;  %v1063_v42 = vpop.permute.xlu0 %1062  ;;  %v5540_v41 = vld [vmem:[%s6482_s2] ss:$0 sm:$0xff] }
 0x158   : > { %1098 = vst.msk [vmem:[#allocation3 + $0x128] sm:$0xff] %vm635_vm3, %v1063_v42  ;;  %v5479_v51 = vpop.f32.mrb[4].mxu1  ;;  %v4571_v42 = vld [vmem:[%s6483_s3 + $0x40] sm:$0xff]  }
 0x159   : > { %v5482_v54 = vpop.f32.mrb[5].mxu1  ;;  %4260 = vmatprep.subr.bf16.mxu1 %v4571_v42 }
 0x15a   : > { %v612_v43 = vpop.permute.xlu1 %611  ;;  %v5484_v61 = vpop.f32.mrb[6].mxu1 }
 0x15b   : > { %648 = vst.msk [vmem:[#allocation3 + $0x120] sm:$0xff] %vm635_vm3, %v612_v43  ;;  %v1192_v3 = vpop.permute.xlu0 %1191  ;;  %v1457_v58 = vld [vmem:[#allocation3 + $0x110] sm:$0xff]  ;;  %v5487_v1 = vpop.f32.mrb[7].mxu1 }
 0x15c   : > { %1227 = vst.msk [vmem:[#allocation3 + $0x128] sm:$0xff] %vm764_vm4, %v1192_v3  ;;  %1790 = vmatprep.mubr.bf16.mxu0 %v1457_v58 }
 0x15e   : > { %v741_v46 = vpop.permute.xlu1 %740  ;;  %v1456_v47 = vld [vmem:[#allocation3 + $0x108] sm:$0xff] }
 0x15f   : > { %777 = vst.msk [vmem:[#allocation3 + $0x120] sm:$0xff] %vm764_vm4, %v741_v46  ;;  %1791 = vmatmul.mubr.bf16.gmra.mrb[44].mxu0 %v1456_v47  ;;  %v1320_v52 = vpop.permute.xlu0 %1319  ;;  %v4572_v46 = vld [vmem:[%s6483_s3] sm:$0xff]  }
 0x160   : > { %1355 = vst.msk [vmem:[#allocation3 + $0x128] sm:$0xff] %vm893_vm5, %v1320_v52  ;;  %v5491_v10 = vpop.f32.mrb[8].mxu1  ;;  %4261 = vmatpush3.bf16.msra.mxu1 %v4572_v46 }
 0x161   : > { %v5494_v35 = vpop.f32.mrb[9].mxu1 }
 0x162   : > { %v870_v57 = vpop.permute.xlu1 %869  ;;  %v5496_v12 = vpop.f32.mrb[10].mxu1 }
 0x163   : > { %906 = vst.msk [vmem:[#allocation3 + $0x120] sm:$0xff] %vm893_vm5, %v870_v57  ;;  %v1065_v53 = vpop.permute.xlu0 %1064  ;;  %v5499_v36 = vpop.f32.mrb[11].mxu1  ;;  %v2056_v57 = vld [vmem:[#allocation2] sm:$0xff] }
 0x164   : > { %1099 = vst.msk [vmem:[#allocation3 + $0x140] sm:$0xff] %vm635_vm3, %v1065_v53  ;;  %v2057_v53 = vld [vmem:[#allocation2 + $0x8] sm:$0xff] }
 0x166   : > { %v614_v55 = vpop.permute.xlu1 %613 }
 0x167   : > { %649 = vst.msk [vmem:[#allocation3 + $0x138] sm:$0xff] %vm635_vm3, %v614_v55  ;;  %v1194_v34 = vpop.permute.xlu0 %1193  ;;  %v1460_v2 = vld [vmem:[#allocation3 + $0x128] sm:$0xff]  ;;  %v2088_v55 = vpack.c.bf16 %v2057_v53, %v2056_v57  ;;  %v4581_v53 = vld [vmem:[%s6483_s3 + $0x68] sm:$0xff]  }
 0x168   : > { %1228 = vst.msk [vmem:[#allocation3 + $0x140] sm:$0xff] %vm764_vm4, %v1194_v34  ;;  %1798 = vmatprep.mubr.bf16.mxu0 %v1460_v2  ;;  %v4573_v34 = vld [vmem:[%s6483_s3 + $0x48] sm:$0xff]  }
 0x169   : > { %2104 = vst.msk [vmem:[#allocation3] sm:$0xff] %vm352_vm0, %v2088_v55  ;;  %4262 = vmatprep.subr.bf16.mxu1 %v4573_v34 }
 0x16a   : > { %v743_v7 = vpop.permute.xlu1 %742  ;;  %v1459_v8 = vld [vmem:[#allocation3 + $0x120] sm:$0xff] }
 0x16b   : > { %778 = vst.msk [vmem:[#allocation3 + $0x138] sm:$0xff] %vm764_vm4, %v743_v7  ;;  %1799 = vmatmul.mubr.bf16.gmra.mrb[48].mxu0 %v1459_v8  ;;  %v1322_v9 = vpop.permute.xlu0 %1321  ;;  %v5505_v17 = vpop.f32.mrb[12].mxu1  ;;  %v4574_v8 = vld [vmem:[%s6483_s3 + $0x8] sm:$0xff]  }
 0x16c   : > { %1356 = vst.msk [vmem:[#allocation3 + $0x140] sm:$0xff] %vm893_vm5, %v1322_v9  ;;  %v5508_v60 = vpop.f32.mrb[13].mxu1  ;;  %4263 = vmatpush3.bf16.msra.mxu1 %v4574_v8 }
 0x16d   : > { %v5510_v19 = vpop.f32.mrb[14].mxu1 }
 0x16e   : > { %v872_v11 = vpop.permute.xlu1 %871  ;;  %v5513_v24 = vpop.f32.mrb[15].mxu1 }
 0x16f   : > { %907 = vst.msk [vmem:[#allocation3 + $0x138] sm:$0xff] %vm893_vm5, %v872_v11  ;;  %v1067_v13 = vpop.permute.xlu0 %1066 }
 0x170   : > { %1100 = vst.msk [vmem:[#allocation3 + $0x158] sm:$0xff] %vm635_vm3, %v1067_v13 }
 0x172   : > { %v616_v14 = vpop.permute.xlu1 %615 }
 0x173   : > { %650 = vst.msk [vmem:[#allocation3 + $0x150] sm:$0xff] %vm635_vm3, %v616_v14  ;;  %v1196_v15 = vpop.permute.xlu0 %1195  ;;  %v1463_v16 = vld [vmem:[#allocation3 + $0x140] sm:$0xff] }
 0x174   : > { %1229 = vst.msk [vmem:[#allocation3 + $0x158] sm:$0xff] %vm764_vm4, %v1196_v15  ;;  %1806 = vmatprep.mubr.bf16.mxu0 %v1463_v16  ;;  %v4576_v15 = vld [vmem:[%s6483_s3 + $0x10] sm:$0xff]  }
 0x176   : > { %v745_v6 = vpop.permute.xlu1 %744  ;;  %v1462_v59 = vld [vmem:[#allocation3 + $0x138] sm:$0xff] }
 0x177   : > { %779 = vst.msk [vmem:[#allocation3 + $0x150] sm:$0xff] %vm764_vm4, %v745_v6  ;;  %1807 = vmatmul.mubr.bf16.gmra.mrb[52].mxu0 %v1462_v59  ;;  %v1324_v62 = vpop.permute.xlu0 %1323  ;;  %v4577_v6 = vld [vmem:[%s6483_s3 + $0x58] sm:$0xff]  }
 0x178   : > { %1357 = vst.msk [vmem:[#allocation3 + $0x158] sm:$0xff] %vm893_vm5, %v1324_v62 }
 0x17a   : > { %v874_v18 = vpop.permute.xlu1 %873 }
 0x17b   : > { %908 = vst.msk [vmem:[#allocation3 + $0x150] sm:$0xff] %vm893_vm5, %v874_v18  ;;  %v1069_v20 = vpop.permute.xlu0 %1068  ;;  %v4578_v18 = vld [vmem:[%s6483_s3 + $0x18] sm:$0xff]  }
 0x17c   : > { %1101 = vst.msk [vmem:[#allocation3 + $0x170] sm:$0xff] %vm635_vm3, %v1069_v20 }
 0x17e   : > { %v618_v21 = vpop.permute.xlu1 %617 }
 0x17f   : > { %651 = vst.msk [vmem:[#allocation3 + $0x168] sm:$0xff] %vm635_vm3, %v618_v21  ;;  %v1198_v56 = vpop.permute.xlu0 %1197  ;;  %v1466_v22 = vld [vmem:[#allocation3 + $0x158] sm:$0xff] }
 0x180   : > { %1230 = vst.msk [vmem:[#allocation3 + $0x170] sm:$0xff] %vm764_vm4, %v1198_v56  ;;  %1814 = vmatprep.mubr.bf16.mxu0 %v1466_v22  ;;  %v4579_v22 = vld [vmem:[%s6483_s3 + $0x60] sm:$0xff]  }
 0x182   : > { %v747_v25 = vpop.permute.xlu1 %746  ;;  %v1465_v23 = vld [vmem:[#allocation3 + $0x150] sm:$0xff] }
 0x183   : > { %780 = vst.msk [vmem:[#allocation3 + $0x168] sm:$0xff] %vm764_vm4, %v747_v25  ;;  %1815 = vmatmul.mubr.bf16.gmra.mrb[56].mxu0 %v1465_v23  ;;  %v1326_v26 = vpop.permute.xlu0 %1325 }
 0x184   : > { %1358 = vst.msk [vmem:[#allocation3 + $0x170] sm:$0xff] %vm893_vm5, %v1326_v26 }
 0x186   : > { %v876_v27 = vpop.permute.xlu1 %875 }
 0x187   : > { %909 = vst.msk [vmem:[#allocation3 + $0x168] sm:$0xff] %vm893_vm5, %v876_v27  ;;  %v5521_v28 = vpop.f32.mrb[16].mxu1 }
 0x188   : > { %v5523_v31 = vpop.f32.mrb[17].mxu1 }
 0x189   : > { %v5525_v30 = vpop.f32.mrb[18].mxu1 }
 0x18a   : > { %v5527_v32 = vpop.f32.mrb[19].mxu1  ;;  %v2185_v58 = vpop.permute.xlu1 %2184 }
 0x18b   : > { %v1469_v63 = vld [vmem:[#allocation3 + $0x170] sm:$0xff]  ;;  %2232 = vst.msk [vmem:[#allocation3] sm:$0xff] %vm635_vm3, %v2185_v58 }
 0x18c   : > { %1822 = vmatprep.mubr.bf16.mxu0 %v1469_v63  ;;  %v4580_v63 = vld [vmem:[%s6483_s3 + $0x20] sm:$0xff]  }
 0x18e   : > { %v1468_v29 = vld [vmem:[#allocation3 + $0x168] sm:$0xff]  ;;  %v2313_v13 = vpop.permute.xlu1 %2312 }
 0x18f   : > { %1823 = vmatmul.mubr.bf16.gmra.mrb[60].mxu0 %v1468_v29  ;;  %v5529_v33 = vpop.f32.mrb[20].mxu1  ;;  %2360 = vst.msk [vmem:[#allocation3] sm:$0xff] %vm764_vm4, %v2313_v13 }
 0x190   : > { %v5531_v4 = vpop.f32.mrb[21].mxu1 }
 0x191   : > { %v5533_v37 = vpop.f32.mrb[22].mxu1 }
 0x192   : > { %v5535_v38 = vpop.f32.mrb[23].mxu1 }
 0x197   : > { %v5581_v27 = vpop.f32.mrb[24].mxu1 }
 0x198   : > { %v5586_v42 = vpop.f32.mrb[25].mxu1 }
 0x1ae   : > { %v4146_v39 = vpop.f32.mrb[0].mxu0 }
 0x1af   : > { %v4147_v40 = vpop.f32.mrb[1].mxu0 }
 0x1b0   : > { %v4148_v43 = vadd.f32 %v4147_v40, %v4146_v39  ;;  %v4149_v3 = vpop.f32.mrb[2].mxu0 }
 0x1b1   : > { %v4150_v47 = vpop.f32.mrb[3].mxu0 }
 0x1b2   : > { %v4151_v49 = vadd.f32 %v4150_v47, %v4149_v3  ;;  %v1705_v52 = vadd.f32 %v4148_v43, %v5540_v41 }
 0x1b4   : > { %v1866_v2 = vadd.f32 %v5465_v48, %v1705_v52  ;;  %v1708_v7 = vadd.f32 %v4151_v49, %v5540_v41  ;;  %v4575_v48 = vld [vmem:[%s6483_s3 + $0x50] sm:$0xff]   ;;  %v5589_v49 = vpop.f32.mrb[26].mxu1 }
 0x1b5   : > { %4264 = vmatprep.subr.bf16.mxu1 %v4575_v48  ;;  %v5591_v57 = vpop.f32.mrb[27].mxu1 }
 0x1b6   : > { %v1992_v9 = vmax.f32 %v1866_v2, 0.0  ;;  %v1869_v11 = vadd.f32 %v5472_v50, %v1708_v7  ;;  %4265 = vmatpush3.bf16.msra.mxu1 %v4576_v15  ;;  %v4583_v7 = vld [vmem:[%s6483_s3 + $0x70] sm:$0xff]  }
 0x1b7   : > { %4266 = vmatprep.subr.bf16.mxu1 %v4577_v6 }
 0x1b8   : > { %2024 = vst.msk [vmem:[#allocation2 + $0x19] sm:$0xff] %vm352_vm0, %v1992_v9  ;;  %v1993_v14 = vmax.f32 %v1869_v11, 0.0  ;;  %v4584_v11 = vld [vmem:[%s6483_s3 + $0x30] sm:$0xff]  }
 0x1ba   : > { %2025 = vst.msk [vmem:[#allocation2 + $0x21] sm:$0xff] %vm352_vm0, %v1993_v14  ;;  %v4152_v50 = vpop.f32.mrb[4].mxu0  ;;  %4267 = vmatpush3.bf16.msra.mxu1 %v4578_v18 }
 0x1bb   : > { %v4153_v16 = vpop.f32.mrb[5].mxu0  ;;  %4268 = vmatprep.subr.bf16.mxu1 %v4579_v22 }
 0x1bc   : > { %v4154_v59 = vadd.f32 %v4153_v16, %v4152_v50  ;;  %v4155_v62 = vpop.f32.mrb[6].mxu0 }
 0x1bd   : > { %v4156_v20 = vpop.f32.mrb[7].mxu0 }
 0x1be   : > { %v1713_v21 = vadd.f32 %v4154_v59, %v5540_v41  ;;  %v4157_v56 = vadd.f32 %v4156_v20, %v4155_v62  ;;  %4269 = vmatpush3.bf16.msra.mxu1 %v4580_v63  ;;  %v4585_v59 = vld [vmem:[%s6483_s3 + $0x78] sm:$0xff]  }
 0x1bf   : > { %v2376_v26 = vld [vmem:[#allocation2 + $0x18] sm:$0xff]  ;;  %4270 = vmatprep.subr.bf16.mxu1 %v4581_v53 }
 0x1c0   : > { %v1874_v25 = vadd.f32 %v5462_v45, %v1713_v21  ;;  %v1716_v23 = vadd.f32 %v4157_v56, %v5540_v41  ;;  %v2122_v46 = vld [vmem:[#allocation2 + $0x19] sm:$0xff] }
 0x1c1   : > { %v2568_v29 = vld [vmem:[#allocation2 + $0x1a] sm:$0xff]  ;;  %v2569_v39 = vld [vmem:[#allocation2 + $0x22] sm:$0xff] }
 0x1c2   : > { %v2377_v40 = vld [vmem:[#allocation2 + $0x20] sm:$0xff]  ;;  %v1994_v43 = vmax.f32 %v1874_v25, 0.0  ;;  %v1877_v3 = vadd.f32 %v5468_v5, %v1716_v23  ;;  %v2600_v58 = vpack.c.bf16 %v2569_v39, %v2568_v29  ;;  %v4582_v5 = vld [vmem:[%s6483_s3 + $0x28] sm:$0xff]   ;;  %v4586_v62 = vld [vmem:[%s6483_s3 + $0x38] sm:$0xff]  }
 0x1c3   : > { %v2408_v45 = vpack.c.bf16 %v2377_v40, %v2376_v26  ;;  %v2123_v47 = vld [vmem:[#allocation2 + $0x21] sm:$0xff]  ;;  %4271 = vmatpush3.bf16.msra.mxu1 %v4582_v5 }
 0x1c4   : > { %v2153_v52 = vpack.c.bf16 %v2123_v47, %v2122_v46  ;;  %2026 = vst.msk [vmem:[#allocation2 + $0x31] sm:$0xff] %vm352_vm0, %v1994_v43  ;;  %v1995_v55 = vmax.f32 %v1877_v3, 0.0  ;;  %2632 = vrot.lane.b32.xlu0 %v2600_v58, %s6502_s20  ;;  %4272 = vmatprep.subr.bf16.mxu1 %v4583_v7 }
 0x1c5   : > { %2440 = vrot.lane.b32.xlu1 %v2408_v45, %s4698_s14  ;;  %2105 = vst.msk [vmem:[#allocation3 + $0x18] sm:$0xff] %vm352_vm0, %v2408_v45 }
 0x1c6   : > { %2552 = vst.msk [vmem:[#allocation3 + $0x8] sm:$0xff] %vm352_vm0, %v2153_v52  ;;  %2027 = vst.msk [vmem:[#allocation2 + $0x39] sm:$0xff] %vm352_vm0, %v1995_v55  ;;  %v4158_v34 = vpop.f32.mrb[8].mxu0 }
 0x1c7   : > { %v4159_v2 = vpop.f32.mrb[9].mxu0  ;;  %4273 = vmatpush3.bf16.msra.mxu1 %v4584_v11 }
 0x1c8   : > { %v4160_v8 = vadd.f32 %v4159_v2, %v4158_v34  ;;  %v4161_v9 = vpop.f32.mrb[10].mxu0  ;;  %4274 = vmatprep.subr.bf16.mxu1 %v4585_v59 }
 0x1c9   : > { %2186 = vrot.lane.b32.xlu1 %v2153_v52, %s6502_s20  ;;  %v4162_v13 = vpop.f32.mrb[11].mxu0 }
 0x1ca   : > { %v1721_v48 = vadd.f32 %v4160_v8, %v5540_v41  ;;  %v4163_v14 = vadd.f32 %v4162_v13, %v4161_v9 }
 0x1cb   : > { %v2696_v15 = vld [vmem:[#allocation2 + $0x30] sm:$0xff]  ;;  %4275 = vmatpush3.bf16.msra.mxu1 %v4586_v62 }
 0x1cc   : > { %v1882_v50 = vadd.f32 %v5482_v54, %v1721_v48  ;;  %v1724_v16 = vadd.f32 %v4163_v14, %v5540_v41  ;;  %v2060_v6 = vld [vmem:[#allocation2 + $0x30] sm:$0xff]  ;;  %4491 = vmatprep.subr.bf16.mxu1 %v5460_v44 }
 0x1cd   : > { %2314 = vrot.lane.b32.xlu1 %v2600_v58, %s6501_s23  ;;  %v2697_v18 = vld [vmem:[#allocation2 + $0x38] sm:$0xff] }
 0x1ce   : > { %v2952_v20 = vld [vmem:[#allocation2 + $0x32] sm:$0xff]  ;;  %v1996_v56 = vmax.f32 %v1882_v50, 0.0  ;;  %v1885_v22 = vadd.f32 %v5487_v1, %v1724_v16  ;;  %v2728_v54 = vpack.c.bf16 %v2697_v18, %v2696_v15  ;;  %v2953_v25 = vld [vmem:[#allocation2 + $0x3a] sm:$0xff] }
 0x1cf   : > { %v2506_v21 = vld [vmem:[#allocation2 + $0x31] sm:$0xff]  ;;  %v2507_v26 = vld [vmem:[#allocation2 + $0x39] sm:$0xff]  ;;  %v2984_v29 = vpack.c.bf16 %v2953_v25, %v2952_v20 }
 0x1d0   : > { %v2061_v23 = vld [vmem:[#allocation2 + $0x38] sm:$0xff]  ;;  %v2537_v40 = vpack.c.bf16 %v2507_v26, %v2506_v21  ;;  %2028 = vst.msk [vmem:[#allocation2 + $0x49] sm:$0xff] %vm352_vm0, %v1996_v56  ;;  %v1997_v43 = vmax.f32 %v1885_v22, 0.0  ;;  %2760 = vrot.lane.b32.xlu0 %v2728_v54, %s6501_s23 }
 0x1d1   : > { %v2825_v63 = vld [vmem:[#allocation2 + $0x39] sm:$0xff]  ;;  %v2090_v39 = vpack.c.bf16 %v2061_v23, %v2060_v6  ;;  %2442 = vrot.lane.b32.xlu1 %v2728_v54, %s4698_s14  ;;  %v2824_v3 = vld [vmem:[#allocation2 + $0x31] sm:$0xff]  ;;  %3000 = vst.msk [vmem:[#allocation3 + $0x10] sm:$0xff] %vm352_vm0, %v2984_v29  ;;  %v5638_v8 = vpop.f32.mrb[28].mxu1 }
 0x1d2   : > { %2553 = vst.msk [vmem:[#allocation3 + $0x20] sm:$0xff] %vm352_vm0, %v2537_v40  ;;  %2029 = vst.msk [vmem:[#allocation2 + $0x51] sm:$0xff] %vm352_vm0, %v1997_v43  ;;  %v4164_v1 = vpop.f32.mrb[12].mxu0  ;;  %v2856_v58 = vpack.c.bf16 %v2825_v63, %v2824_v3  ;;  %v5641_v48 = vpop.f32.mrb[29].mxu1 }
 0x1d3   : > { %2106 = vst.msk [vmem:[#allocation3 + $0x30] sm:$0xff] %vm352_vm0, %v2090_v39  ;;  %v4165_v45 = vpop.f32.mrb[13].mxu0  ;;  %v5644_v59 = vpop.f32.mrb[30].mxu1 }
 0x1d4   : > { %v4166_v46 = vadd.f32 %v4165_v45, %v4164_v1  ;;  %v4167_v47 = vpop.f32.mrb[14].mxu0  ;;  %2888 = vrot.lane.b32.xlu0 %v2856_v58, %s4698_s14  ;;  %v5646_v56 = vpop.f32.mrb[31].mxu1 }
 0x1d5   : > { %2188 = vrot.lane.b32.xlu1 %v2856_v58, %s6502_s20  ;;  %v4168_v52 = vpop.f32.mrb[15].mxu0 }
 0x1d6   : > { %v1729_v53 = vadd.f32 %v4166_v46, %v5540_v41  ;;  %v4169_v55 = vadd.f32 %v4168_v52, %v4167_v47 }
 0x1d7   : > { %v2698_v2 = vld [vmem:[#allocation2 + $0x48] sm:$0xff] }
 0x1d8   : > { %v1890_v5 = vadd.f32 %v5479_v51, %v1729_v53  ;;  %v1732_v34 = vadd.f32 %v4169_v55, %v5540_v41  ;;  %v3018_v44 = vld [vmem:[#allocation3 + $0x10] sm:$0xff]  ;;  %2634 = vrot.lane.b32.xlu0 %v2984_v29, %s6502_s20  ;;  %v2062_v7 = vld [vmem:[#allocation2 + $0x48] sm:$0xff] }
 0x1d9   : > { %2316 = vrot.lane.b32.xlu1 %v2984_v29, %s6501_s23  ;;  %4437 = vmatprep.mubr.msk.bf16.mxu0 %vm352_vm0, %v3018_v44  ;;  %v2699_v9 = vld [vmem:[#allocation2 + $0x50] sm:$0xff] }
 0x1da   : > { %v2954_v11 = vld [vmem:[#allocation2 + $0x4a] sm:$0xff]  ;;  %v1998_v14 = vmax.f32 %v1890_v5, 0.0  ;;  %v1893_v51 = vadd.f32 %v5484_v61, %v1732_v34  ;;  %v2729_v15 = vpack.c.bf16 %v2699_v9, %v2698_v2  ;;  %v2955_v50 = vld [vmem:[#allocation2 + $0x52] sm:$0xff] }
 0x1db   : > { %v2508_v13 = vld [vmem:[#allocation2 + $0x49] sm:$0xff]  ;;  %v2509_v6 = vld [vmem:[#allocation2 + $0x51] sm:$0xff]  ;;  %v2985_v18 = vpack.c.bf16 %v2955_v50, %v2954_v11 }
 0x1dc   : > { %v2063_v16 = vld [vmem:[#allocation2 + $0x50] sm:$0xff]  ;;  %v2538_v21 = vpack.c.bf16 %v2509_v6, %v2508_v13  ;;  %2030 = vst.msk [vmem:[#allocation2 + $0x61] sm:$0xff] %vm352_vm0, %v1998_v14  ;;  %v1999_v22 = vmax.f32 %v1893_v51, 0.0  ;;  %2762 = vrot.lane.b32.xlu0 %v2729_v15, %s6501_s23 }
 0x1dd   : > { %v2827_v62 = vld [vmem:[#allocation2 + $0x51] sm:$0xff]  ;;  %v2091_v20 = vpack.c.bf16 %v2063_v16, %v2062_v7  ;;  %2444 = vrot.lane.b32.xlu1 %v2729_v15, %s4698_s14  ;;  %v2826_v61 = vld [vmem:[#allocation2 + $0x49] sm:$0xff]  ;;  %3001 = vst.msk [vmem:[#allocation3 + $0x28] sm:$0xff] %vm352_vm0, %v2985_v18 }
 0x1de   : > { %2554 = vst.msk [vmem:[#allocation3 + $0x38] sm:$0xff] %vm352_vm0, %v2538_v21  ;;  %2031 = vst.msk [vmem:[#allocation2 + $0x69] sm:$0xff] %vm352_vm0, %v1999_v22  ;;  %v4170_v54 = vpop.f32.mrb[16].mxu0  ;;  %v2857_v25 = vpack.c.bf16 %v2827_v62, %v2826_v61 }
 0x1df   : > { %2107 = vst.msk [vmem:[#allocation3 + $0x48] sm:$0xff] %vm352_vm0, %v2091_v20  ;;  %v4171_v23 = vpop.f32.mrb[17].mxu0 }
 0x1e0   : > { %v4172_v26 = vadd.f32 %v4171_v23, %v4170_v54  ;;  %v4173_v63 = vpop.f32.mrb[18].mxu0  ;;  %2890 = vrot.lane.b32.xlu0 %v2857_v25, %s4698_s14 }
 0x1e1   : > { %2190 = vrot.lane.b32.xlu1 %v2857_v25, %s6502_s20  ;;  %v4174_v29 = vpop.f32.mrb[19].mxu0 }
 0x1e2   : > { %v1737_v39 = vadd.f32 %v4172_v26, %v5540_v41  ;;  %v4175_v40 = vadd.f32 %v4174_v29, %v4173_v63 }
 0x1e3   : > { %v2700_v58 = vld [vmem:[#allocation2 + $0x60] sm:$0xff] }
 0x1e4   : > { %v1898_v43 = vadd.f32 %v5494_v35, %v1737_v39  ;;  %v1740_v3 = vadd.f32 %v4175_v40, %v5540_v41  ;;  %v3021_v1 = vld [vmem:[#allocation3 + $0x28] sm:$0xff]  ;;  %2636 = vrot.lane.b32.xlu0 %v2985_v18, %s6502_s20  ;;  %v2064_v45 = vld [vmem:[#allocation2 + $0x60] sm:$0xff] }
 0x1e5   : > { %2318 = vrot.lane.b32.xlu1 %v2985_v18, %s6501_s23  ;;  %4438 = vmatmul.mubr.msk.bf16.vlgmr.msra.gmra.mrb[64].mxu0 %vm352_vm0, %v3021_v1  ;;  %v2701_v46 = vld [vmem:[#allocation2 + $0x68] sm:$0xff] }
 0x1e6   : > { %v2956_v47 = vld [vmem:[#allocation2 + $0x62] sm:$0xff]  ;;  %v2000_v53 = vmax.f32 %v1898_v43, 0.0  ;;  %v1901_v55 = vadd.f32 %v5499_v36, %v1740_v3  ;;  %v2730_v5 = vpack.c.bf16 %v2701_v46, %v2700_v58  ;;  %v2957_v34 = vld [vmem:[#allocation2 + $0x6a] sm:$0xff] }
 0x1e7   : > { %v2510_v52 = vld [vmem:[#allocation2 + $0x61] sm:$0xff]  ;;  %v2511_v44 = vld [vmem:[#allocation2 + $0x69] sm:$0xff]  ;;  %v2986_v7 = vpack.c.bf16 %v2957_v34, %v2956_v47 }
 0x1e8   : > { %v2065_v35 = vld [vmem:[#allocation2 + $0x68] sm:$0xff]  ;;  %v2539_v11 = vpack.c.bf16 %v2511_v44, %v2510_v52  ;;  %2032 = vst.msk [vmem:[#allocation2 + $0x79] sm:$0xff] %vm352_vm0, %v2000_v53  ;;  %v2001_v13 = vmax.f32 %v1901_v55, 0.0  ;;  %2764 = vrot.lane.b32.xlu0 %v2730_v5, %s6501_s23 }
 0x1e9   : > { %v2829_v2 = vld [vmem:[#allocation2 + $0x69] sm:$0xff]  ;;  %v2092_v9 = vpack.c.bf16 %v2065_v35, %v2064_v45  ;;  %2446 = vrot.lane.b32.xlu1 %v2730_v5, %s4698_s14  ;;  %v2828_v14 = vld [vmem:[#allocation2 + $0x61] sm:$0xff]  ;;  %3002 = vst.msk [vmem:[#allocation3 + $0x40] sm:$0xff] %vm352_vm0, %v2986_v7 }
 0x1ea   : > { %2555 = vst.msk [vmem:[#allocation3 + $0x50] sm:$0xff] %vm352_vm0, %v2539_v11  ;;  %2033 = vst.msk [vmem:[#allocation2 + $0x81] sm:$0xff] %vm352_vm0, %v2001_v13  ;;  %v4176_v36 = vpop.f32.mrb[20].mxu0  ;;  %v2858_v51 = vpack.c.bf16 %v2829_v2, %v2828_v14 }
 0x1eb   : > { %2108 = vst.msk [vmem:[#allocation3 + $0x60] sm:$0xff] %vm352_vm0, %v2092_v9  ;;  %v4177_v15 = vpop.f32.mrb[21].mxu0 }
 0x1ec   : > { %v4178_v50 = vadd.f32 %v4177_v15, %v4176_v36  ;;  %v4179_v16 = vpop.f32.mrb[22].mxu0  ;;  %2892 = vrot.lane.b32.xlu0 %v2858_v51, %s4698_s14 }
 0x1ed   : > { %2192 = vrot.lane.b32.xlu1 %v2858_v51, %s6502_s20  ;;  %v4180_v6 = vpop.f32.mrb[23].mxu0 }
 0x1ee   : > { %v1745_v62 = vadd.f32 %v4178_v50, %v5540_v41  ;;  %v4181_v18 = vadd.f32 %v4180_v6, %v4179_v16 }
 0x1ef   : > { %v2702_v61 = vld [vmem:[#allocation2 + $0x78] sm:$0xff] }
 0x1f0   : > { %v1906_v20 = vadd.f32 %v5491_v10, %v1745_v62  ;;  %v1748_v21 = vadd.f32 %v4181_v18, %v5540_v41  ;;  %v3024_v22 = vld [vmem:[#allocation3 + $0x40] sm:$0xff]  ;;  %2638 = vrot.lane.b32.xlu0 %v2986_v7, %s6502_s20  ;;  %v2066_v54 = vld [vmem:[#allocation2 + $0x78] sm:$0xff] }
 0x1f1   : > { %2320 = vrot.lane.b32.xlu1 %v2986_v7, %s6501_s23  ;;  %4441 = vmatprep.mubr.msk.bf16.mxu0 %vm352_vm0, %v3024_v22  ;;  %v2703_v25 = vld [vmem:[#allocation2 + $0x80] sm:$0xff] }
 0x1f2   : > { %v2958_v23 = vld [vmem:[#allocation2 + $0x7a] sm:$0xff]  ;;  %v2002_v63 = vmax.f32 %v1906_v20, 0.0  ;;  %v1909_v29 = vadd.f32 %v5496_v12, %v1748_v21  ;;  %v2731_v39 = vpack.c.bf16 %v2703_v25, %v2702_v61  ;;  %v2959_v40 = vld [vmem:[#allocation2 + $0x82] sm:$0xff] }
 0x1f3   : > { %v2512_v26 = vld [vmem:[#allocation2 + $0x79] sm:$0xff]  ;;  %v2513_v43 = vld [vmem:[#allocation2 + $0x81] sm:$0xff]  ;;  %v2987_v1 = vpack.c.bf16 %v2959_v40, %v2958_v23 }
 0x1f4   : > { %v2067_v10 = vld [vmem:[#allocation2 + $0x80] sm:$0xff]  ;;  %v2540_v45 = vpack.c.bf16 %v2513_v43, %v2512_v26  ;;  %2034 = vst.msk [vmem:[#allocation2 + $0x91] sm:$0xff] %vm352_vm0, %v2002_v63  ;;  %v2003_v46 = vmax.f32 %v1909_v29, 0.0  ;;  %2766 = vrot.lane.b32.xlu0 %v2731_v39, %s6501_s23 }
 0x1f5   : > { %v2831_v3 = vld [vmem:[#allocation2 + $0x81] sm:$0xff]  ;;  %v2093_v58 = vpack.c.bf16 %v2067_v10, %v2066_v54  ;;  %2448 = vrot.lane.b32.xlu1 %v2731_v39, %s4698_s14  ;;  %v2830_v47 = vld [vmem:[#allocation2 + $0x79] sm:$0xff]  ;;  %3003 = vst.msk [vmem:[#allocation3 + $0x58] sm:$0xff] %vm352_vm0, %v2987_v1 }
 0x1f6   : > { %2556 = vst.msk [vmem:[#allocation3 + $0x68] sm:$0xff] %vm352_vm0, %v2540_v45  ;;  %2035 = vst.msk [vmem:[#allocation2 + $0x99] sm:$0xff] %vm352_vm0, %v2003_v46  ;;  %v4182_v12 = vpop.f32.mrb[24].mxu0  ;;  %v2859_v52 = vpack.c.bf16 %v2831_v3, %v2830_v47 }
 0x1f7   : > { %2109 = vst.msk [vmem:[#allocation3 + $0x78] sm:$0xff] %vm352_vm0, %v2093_v58  ;;  %v4183_v53 = vpop.f32.mrb[25].mxu0 }
 0x1f8   : > { %v4184_v55 = vadd.f32 %v4183_v53, %v4182_v12  ;;  %v4185_v5 = vpop.f32.mrb[26].mxu0  ;;  %2894 = vrot.lane.b32.xlu0 %v2859_v52, %s4698_s14 }
 0x1f9   : > { %2194 = vrot.lane.b32.xlu1 %v2859_v52, %s6502_s20  ;;  %v4186_v34 = vpop.f32.mrb[27].mxu0 }
 0x1fa   : > { %v1753_v35 = vadd.f32 %v4184_v55, %v5540_v41  ;;  %v4187_v44 = vadd.f32 %v4186_v34, %v4185_v5 }
 0x1fb   : > { %v2704_v11 = vld [vmem:[#allocation2 + $0x90] sm:$0xff] }
 0x1fc   : > { %v1914_v2 = vadd.f32 %v5508_v60, %v1753_v35  ;;  %v1756_v7 = vadd.f32 %v4187_v44, %v5540_v41  ;;  %v3027_v9 = vld [vmem:[#allocation3 + $0x58] sm:$0xff]  ;;  %2640 = vrot.lane.b32.xlu0 %v2987_v1, %s6502_s20  ;;  %v2068_v13 = vld [vmem:[#allocation2 + $0x90] sm:$0xff] }
 0x1fd   : > { %2322 = vrot.lane.b32.xlu1 %v2987_v1, %s6501_s23  ;;  %4442 = vmatmul.mubr.msk.bf16.gmra.mrb[68].mxu0 %vm352_vm0, %v3027_v9  ;;  %v2705_v14 = vld [vmem:[#allocation2 + $0x98] sm:$0xff] }
 0x1fe   : > { %v2960_v36 = vld [vmem:[#allocation2 + $0x92] sm:$0xff]  ;;  %v2004_v15 = vmax.f32 %v1914_v2, 0.0  ;;  %v1917_v50 = vadd.f32 %v5513_v24, %v1756_v7  ;;  %v2732_v16 = vpack.c.bf16 %v2705_v14, %v2704_v11  ;;  %v2961_v6 = vld [vmem:[#allocation2 + $0x9a] sm:$0xff] }
 0x1ff   : > { %v2514_v51 = vld [vmem:[#allocation2 + $0x91] sm:$0xff]  ;;  %v2515_v62 = vld [vmem:[#allocation2 + $0x99] sm:$0xff]  ;;  %v2988_v20 = vpack.c.bf16 %v2961_v6, %v2960_v36 }
 0x200   : > { %v2069_v60 = vld [vmem:[#allocation2 + $0x98] sm:$0xff]  ;;  %v2541_v22 = vpack.c.bf16 %v2515_v62, %v2514_v51  ;;  %2036 = vst.msk [vmem:[#allocation2 + $0xa9] sm:$0xff] %vm352_vm0, %v2004_v15  ;;  %v2005_v61 = vmax.f32 %v1917_v50, 0.0  ;;  %2768 = vrot.lane.b32.xlu0 %v2732_v16, %s6501_s23 }
 0x201   : > { %v2833_v18 = vld [vmem:[#allocation2 + $0x99] sm:$0xff]  ;;  %v2094_v21 = vpack.c.bf16 %v2069_v60, %v2068_v13  ;;  %2450 = vrot.lane.b32.xlu1 %v2732_v16, %s4698_s14  ;;  %v2832_v54 = vld [vmem:[#allocation2 + $0x91] sm:$0xff]  ;;  %3004 = vst.msk [vmem:[#allocation3 + $0x70] sm:$0xff] %vm352_vm0, %v2988_v20 }
 0x202   : > { %2557 = vst.msk [vmem:[#allocation3 + $0x80] sm:$0xff] %vm352_vm0, %v2541_v22  ;;  %2037 = vst.msk [vmem:[#allocation2 + $0xb1] sm:$0xff] %vm352_vm0, %v2005_v61  ;;  %v4188_v24 = vpop.f32.mrb[28].mxu0  ;;  %v2860_v25 = vpack.c.bf16 %v2833_v18, %v2832_v54 }
 0x203   : > { %2110 = vst.msk [vmem:[#allocation3 + $0x90] sm:$0xff] %vm352_vm0, %v2094_v21  ;;  %v4189_v23 = vpop.f32.mrb[29].mxu0 }
 0x204   : > { %v4190_v26 = vadd.f32 %v4189_v23, %v4188_v24  ;;  %v4191_v63 = vpop.f32.mrb[30].mxu0  ;;  %2896 = vrot.lane.b32.xlu0 %v2860_v25, %s4698_s14 }
 0x205   : > { %2196 = vrot.lane.b32.xlu1 %v2860_v25, %s6502_s20  ;;  %v4192_v29 = vpop.f32.mrb[31].mxu0 }
 0x206   : > { %v1761_v39 = vadd.f32 %v4190_v26, %v5540_v41  ;;  %v4193_v40 = vadd.f32 %v4192_v29, %v4191_v63 }
 0x207   : > { %v2706_v1 = vld [vmem:[#allocation2 + $0xa8] sm:$0xff] }
 0x208   : > { %v1922_v10 = vadd.f32 %v5505_v17, %v1761_v39  ;;  %v1764_v43 = vadd.f32 %v4193_v40, %v5540_v41  ;;  %v3030_v3 = vld [vmem:[#allocation3 + $0x70] sm:$0xff]  ;;  %2642 = vrot.lane.b32.xlu0 %v2988_v20, %s6502_s20  ;;  %v2070_v58 = vld [vmem:[#allocation2 + $0xa8] sm:$0xff] }
 0x209   : > { %2324 = vrot.lane.b32.xlu1 %v2988_v20, %s6501_s23  ;;  %4445 = vmatprep.mubr.msk.bf16.mxu0 %vm352_vm0, %v3030_v3  ;;  %v2707_v45 = vld [vmem:[#allocation2 + $0xb0] sm:$0xff] }
 0x20a   : > { %v2962_v46 = vld [vmem:[#allocation2 + $0xaa] sm:$0xff]  ;;  %v2006_v12 = vmax.f32 %v1922_v10, 0.0  ;;  %v1925_v52 = vadd.f32 %v5510_v19, %v1764_v43  ;;  %v2733_v53 = vpack.c.bf16 %v2707_v45, %v2706_v1  ;;  %v2963_v55 = vld [vmem:[#allocation2 + $0xb2] sm:$0xff] }
 0x20b   : > { %v2516_v47 = vld [vmem:[#allocation2 + $0xa9] sm:$0xff]  ;;  %v2517_v5 = vld [vmem:[#allocation2 + $0xb1] sm:$0xff]  ;;  %v2989_v35 = vpack.c.bf16 %v2963_v55, %v2962_v46 }
 0x20c   : > { %v2071_v17 = vld [vmem:[#allocation2 + $0xb0] sm:$0xff]  ;;  %v2542_v2 = vpack.c.bf16 %v2517_v5, %v2516_v47  ;;  %2038 = vst.msk [vmem:[#allocation2 + $0xc1] sm:$0xff] %vm352_vm0, %v2006_v12  ;;  %v2007_v7 = vmax.f32 %v1925_v52, 0.0  ;;  %2770 = vrot.lane.b32.xlu0 %v2733_v53, %s6501_s23 }
 0x20d   : > { %v2835_v34 = vld [vmem:[#allocation2 + $0xb1] sm:$0xff]  ;;  %v2095_v44 = vpack.c.bf16 %v2071_v17, %v2070_v58  ;;  %2452 = vrot.lane.b32.xlu1 %v2733_v53, %s4698_s14  ;;  %v2834_v9 = vld [vmem:[#allocation2 + $0xa9] sm:$0xff]  ;;  %3005 = vst.msk [vmem:[#allocation3 + $0x88] sm:$0xff] %vm352_vm0, %v2989_v35 }
 0x20e   : > { %2558 = vst.msk [vmem:[#allocation3 + $0x98] sm:$0xff] %vm352_vm0, %v2542_v2  ;;  %2039 = vst.msk [vmem:[#allocation2 + $0xc9] sm:$0xff] %vm352_vm0, %v2007_v7  ;;  %v4194_v19 = vpop.f32.mrb[32].mxu0  ;;  %v2861_v11 = vpack.c.bf16 %v2835_v34, %v2834_v9 }
 0x20f   : > { %2111 = vst.msk [vmem:[#allocation3 + $0xa8] sm:$0xff] %vm352_vm0, %v2095_v44  ;;  %v4195_v13 = vpop.f32.mrb[33].mxu0 }
 0x210   : > { %v4196_v14 = vadd.f32 %v4195_v13, %v4194_v19  ;;  %v4197_v36 = vpop.f32.mrb[34].mxu0  ;;  %2898 = vrot.lane.b32.xlu0 %v2861_v11, %s4698_s14 }
 0x211   : > { %2198 = vrot.lane.b32.xlu1 %v2861_v11, %s6502_s20  ;;  %v4198_v51 = vpop.f32.mrb[35].mxu0 }
 0x212   : > { %v1769_v15 = vadd.f32 %v4196_v14, %v5540_v41  ;;  %v4199_v50 = vadd.f32 %v4198_v51, %v4197_v36 }
 0x213   : > { %v2708_v62 = vld [vmem:[#allocation2 + $0xc0] sm:$0xff] }
 0x214   : > { %v1930_v16 = vadd.f32 %v5523_v31, %v1769_v15  ;;  %v1772_v6 = vadd.f32 %v4199_v50, %v5540_v41  ;;  %v3033_v60 = vld [vmem:[#allocation3 + $0x88] sm:$0xff]  ;;  %2644 = vrot.lane.b32.xlu0 %v2989_v35, %s6502_s20  ;;  %v2072_v18 = vld [vmem:[#allocation2 + $0xc0] sm:$0xff] }
 0x215   : > { %2326 = vrot.lane.b32.xlu1 %v2989_v35, %s6501_s23  ;;  %4446 = vmatmul.mubr.msk.bf16.gmra.mrb[72].mxu0 %vm352_vm0, %v3033_v60  ;;  %v2709_v20 = vld [vmem:[#allocation2 + $0xc8] sm:$0xff] }
 0x216   : > { %v2964_v21 = vld [vmem:[#allocation2 + $0xc2] sm:$0xff]  ;;  %v2008_v61 = vmax.f32 %v1930_v16, 0.0  ;;  %v1933_v54 = vadd.f32 %v5527_v32, %v1772_v6  ;;  %v2734_v24 = vpack.c.bf16 %v2709_v20, %v2708_v62  ;;  %v2965_v25 = vld [vmem:[#allocation2 + $0xca] sm:$0xff] }
 0x217   : > { %v2518_v22 = vld [vmem:[#allocation2 + $0xc1] sm:$0xff]  ;;  %v2519_v23 = vld [vmem:[#allocation2 + $0xc9] sm:$0xff]  ;;  %v2990_v63 = vpack.c.bf16 %v2965_v25, %v2964_v21 }
 0x218   : > { %v2073_v31 = vld [vmem:[#allocation2 + $0xc8] sm:$0xff]  ;;  %v2543_v39 = vpack.c.bf16 %v2519_v23, %v2518_v22  ;;  %2040 = vst.msk [vmem:[#allocation2 + $0xd9] sm:$0xff] %vm352_vm0, %v2008_v61  ;;  %v2009_v40 = vmax.f32 %v1933_v54, 0.0  ;;  %2772 = vrot.lane.b32.xlu0 %v2734_v24, %s6501_s23 }
 0x219   : > { %v2837_v26 = vld [vmem:[#allocation2 + $0xc9] sm:$0xff]  ;;  %v2096_v29 = vpack.c.bf16 %v2073_v31, %v2072_v18  ;;  %2454 = vrot.lane.b32.xlu1 %v2734_v24, %s4698_s14  ;;  %v2836_v10 = vld [vmem:[#allocation2 + $0xc1] sm:$0xff]  ;;  %3006 = vst.msk [vmem:[#allocation3 + $0xa0] sm:$0xff] %vm352_vm0, %v2990_v63 }
 0x21a   : > { %2559 = vst.msk [vmem:[#allocation3 + $0xb0] sm:$0xff] %vm352_vm0, %v2543_v39  ;;  %2041 = vst.msk [vmem:[#allocation2 + $0xe1] sm:$0xff] %vm352_vm0, %v2009_v40  ;;  %v4200_v32 = vpop.f32.mrb[36].mxu0  ;;  %v2862_v43 = vpack.c.bf16 %v2837_v26, %v2836_v10 }
 0x21b   : > { %2112 = vst.msk [vmem:[#allocation3 + $0xc0] sm:$0xff] %vm352_vm0, %v2096_v29  ;;  %v4201_v3 = vpop.f32.mrb[37].mxu0 }
 0x21c   : > { %v4202_v1 = vadd.f32 %v4201_v3, %v4200_v32  ;;  %v4203_v58 = vpop.f32.mrb[38].mxu0  ;;  %2900 = vrot.lane.b32.xlu0 %v2862_v43, %s4698_s14 }
 0x21d   : > { %2200 = vrot.lane.b32.xlu1 %v2862_v43, %s6502_s20  ;;  %v4204_v45 = vpop.f32.mrb[39].mxu0 }
 0x21e   : > { %v1777_v46 = vadd.f32 %v4202_v1, %v5540_v41  ;;  %v4205_v47 = vadd.f32 %v4204_v45, %v4203_v58  ;;  %v5763_v58 = vpop.permute.xlu0 %2790 }
 0x21f   : > { %v2710_v55 = vld [vmem:[#allocation2 + $0xd8] sm:$0xff] }
 0x220   : > { %v1938_v12 = vadd.f32 %v5521_v28, %v1777_v46  ;;  %v1780_v52 = vadd.f32 %v4205_v47, %v5540_v41  ;;  %v3036_v53 = vld [vmem:[#allocation3 + $0xa0] sm:$0xff]  ;;  %2646 = vrot.lane.b32.xlu0 %v2990_v63, %s6502_s20  ;;  %v2074_v17 = vld [vmem:[#allocation2 + $0xd8] sm:$0xff] }
 0x221   : > { %2328 = vrot.lane.b32.xlu1 %v2990_v63, %s6501_s23  ;;  %4449 = vmatprep.mubr.msk.bf16.mxu0 %vm352_vm0, %v3036_v53  ;;  %v2711_v5 = vld [vmem:[#allocation2 + $0xe0] sm:$0xff] }
 0x222   : > { %v2966_v34 = vld [vmem:[#allocation2 + $0xda] sm:$0xff]  ;;  %v2010_v44 = vmax.f32 %v1938_v12, 0.0  ;;  %v1941_v2 = vadd.f32 %v5525_v30, %v1780_v52  ;;  %v2735_v7 = vpack.c.bf16 %v2711_v5, %v2710_v55  ;;  %v2967_v9 = vld [vmem:[#allocation2 + $0xe2] sm:$0xff] }
 0x223   : > { %v2520_v35 = vld [vmem:[#allocation2 + $0xd9] sm:$0xff]  ;;  %v2521_v19 = vld [vmem:[#allocation2 + $0xe1] sm:$0xff]  ;;  %v2991_v13 = vpack.c.bf16 %v2967_v9, %v2966_v34 }
 0x224   : > { %v2075_v28 = vld [vmem:[#allocation2 + $0xe0] sm:$0xff]  ;;  %v2544_v36 = vpack.c.bf16 %v2521_v19, %v2520_v35  ;;  %2042 = vst.msk [vmem:[#allocation2 + $0xf1] sm:$0xff] %vm352_vm0, %v2010_v44  ;;  %v2011_v51 = vmax.f32 %v1941_v2, 0.0  ;;  %2774 = vrot.lane.b32.xlu0 %v2735_v7, %s6501_s23 }
 0x225   : > { %v2839_v11 = vld [vmem:[#allocation2 + $0xe1] sm:$0xff]  ;;  %v2097_v14 = vpack.c.bf16 %v2075_v28, %v2074_v17  ;;  %2456 = vrot.lane.b32.xlu1 %v2735_v7, %s4698_s14  ;;  %v2838_v15 = vld [vmem:[#allocation2 + $0xd9] sm:$0xff]  ;;  %3007 = vst.msk [vmem:[#allocation3 + $0xb8] sm:$0xff] %vm352_vm0, %v2991_v13 }
 0x226   : > { %2560 = vst.msk [vmem:[#allocation3 + $0xc8] sm:$0xff] %vm352_vm0, %v2544_v36  ;;  %2043 = vst.msk [vmem:[#allocation2 + $0xf9] sm:$0xff] %vm352_vm0, %v2011_v51  ;;  %v4206_v30 = vpop.f32.mrb[40].mxu0  ;;  %v2863_v50 = vpack.c.bf16 %v2839_v11, %v2838_v15 }
 0x227   : > { %2113 = vst.msk [vmem:[#allocation3 + $0xd8] sm:$0xff] %vm352_vm0, %v2097_v14  ;;  %v4207_v16 = vpop.f32.mrb[41].mxu0 }
 0x228   : > { %v4208_v6 = vadd.f32 %v4207_v16, %v4206_v30  ;;  %v4209_v60 = vpop.f32.mrb[42].mxu0  ;;  %2902 = vrot.lane.b32.xlu0 %v2863_v50, %s4698_s14 }
 0x229   : > { %2202 = vrot.lane.b32.xlu1 %v2863_v50, %s6502_s20  ;;  %v4210_v62 = vpop.f32.mrb[43].mxu0 }
 0x22a   : > { %v1785_v18 = vadd.f32 %v4208_v6, %v5540_v41  ;;  %v4211_v20 = vadd.f32 %v4210_v62, %v4209_v60 }
 0x22b   : > { %v2712_v54 = vld [vmem:[#allocation2 + $0xf0] sm:$0xff] }
 0x22c   : > { %v1946_v21 = vadd.f32 %v5531_v4, %v1785_v18  ;;  %v1788_v22 = vadd.f32 %v4211_v20, %v5540_v41  ;;  %v3039_v61 = vld [vmem:[#allocation3 + $0xb8] sm:$0xff]  ;;  %2648 = vrot.lane.b32.xlu0 %v2991_v13, %s6502_s20  ;;  %v2076_v24 = vld [vmem:[#allocation2 + $0xf0] sm:$0xff] }
 0x22d   : > { %2330 = vrot.lane.b32.xlu1 %v2991_v13, %s6501_s23  ;;  %4450 = vmatmul.mubr.msk.bf16.gmra.mrb[76].mxu0 %vm352_vm0, %v3039_v61  ;;  %v2713_v25 = vld [vmem:[#allocation2 + $0xf8] sm:$0xff] }
 0x22e   : > { %v2968_v31 = vld [vmem:[#allocation2 + $0xf2] sm:$0xff]  ;;  %v2012_v26 = vmax.f32 %v1946_v21, 0.0  ;;  %v1949_v63 = vadd.f32 %v5535_v38, %v1788_v22  ;;  %v2736_v29 = vpack.c.bf16 %v2713_v25, %v2712_v54  ;;  %v2969_v39 = vld [vmem:[#allocation2 + $0xfa] sm:$0xff] }
 0x22f   : > { %v2522_v23 = vld [vmem:[#allocation2 + $0xf1] sm:$0xff]  ;;  %v2523_v40 = vld [vmem:[#allocation2 + $0xf9] sm:$0xff]  ;;  %v2992_v32 = vpack.c.bf16 %v2969_v39, %v2968_v31 }
 0x230   : > { %v2077_v4 = vld [vmem:[#allocation2 + $0xf8] sm:$0xff]  ;;  %v2545_v3 = vpack.c.bf16 %v2523_v40, %v2522_v23  ;;  %2044 = vst.msk [vmem:[#allocation2 + $0x109] sm:$0xff] %vm352_vm0, %v2012_v26  ;;  %v2013_v1 = vmax.f32 %v1949_v63, 0.0  ;;  %2776 = vrot.lane.b32.xlu0 %v2736_v29, %s6501_s23 }
 0x231   : > { %v2841_v10 = vld [vmem:[#allocation2 + $0xf9] sm:$0xff]  ;;  %v2098_v43 = vpack.c.bf16 %v2077_v4, %v2076_v24  ;;  %2458 = vrot.lane.b32.xlu1 %v2736_v29, %s4698_s14  ;;  %v2840_v45 = vld [vmem:[#allocation2 + $0xf1] sm:$0xff]  ;;  %3008 = vst.msk [vmem:[#allocation3 + $0xd0] sm:$0xff] %vm352_vm0, %v2992_v32 }
 0x232   : > { %2561 = vst.msk [vmem:[#allocation3 + $0xe0] sm:$0xff] %vm352_vm0, %v2545_v3  ;;  %2045 = vst.msk [vmem:[#allocation2 + $0x111] sm:$0xff] %vm352_vm0, %v2013_v1  ;;  %v4212_v38 = vpop.f32.mrb[44].mxu0  ;;  %v2864_v46 = vpack.c.bf16 %v2841_v10, %v2840_v45 }
 0x233   : > { %2114 = vst.msk [vmem:[#allocation3 + $0xf0] sm:$0xff] %vm352_vm0, %v2098_v43  ;;  %v4213_v47 = vpop.f32.mrb[45].mxu0 }
 0x234   : > { %v4214_v12 = vadd.f32 %v4213_v47, %v4212_v38  ;;  %v4215_v52 = vpop.f32.mrb[46].mxu0  ;;  %2904 = vrot.lane.b32.xlu0 %v2864_v46, %s4698_s14 }
 0x235   : > { %2204 = vrot.lane.b32.xlu1 %v2864_v46, %s6502_s20  ;;  %v4216_v53 = vpop.f32.mrb[47].mxu0 }
 0x236   : > { %v1793_v55 = vadd.f32 %v4214_v12, %v5540_v41  ;;  %v4217_v17 = vadd.f32 %v4216_v53, %v4215_v52  ;;  %v2633_v5 = vpop.permute.xlu0 %2632  ;;  %v5816_v52 = vld [vmem:[%s6482_s2] ss:$0 sm:$0xff] }
 0x237   : > { %v2441_v34 = vpop.permute.xlu1 %2440  ;;  %2680 = vst.msk [vmem:[#allocation3 + $0x8] sm:$0xff] %vm635_vm3, %v2633_v5  ;;  %v2714_v7 = vld [vmem:[#allocation2 + $0x108] sm:$0xff] }
 0x238   : > { %2488 = vst.msk [vmem:[#allocation3] sm:$0xff] %vm893_vm5, %v2441_v34  ;;  %v1954_v35 = vadd.f32 %v5529_v33, %v1793_v55  ;;  %v1796_v44 = vadd.f32 %v4217_v17, %v5540_v41  ;;  %v3042_v2 = vld [vmem:[#allocation3 + $0xd0] sm:$0xff]  ;;  %2650 = vrot.lane.b32.xlu0 %v2992_v32, %s6502_s20  ;;  %v2842_v9 = vld [vmem:[#allocation2 + $0x109] sm:$0xff] }
 0x239   : > { %2332 = vrot.lane.b32.xlu1 %v2992_v32, %s6501_s23  ;;  %4453 = vmatprep.mubr.msk.bf16.mxu0 %vm352_vm0, %v3042_v2  ;;  %v2715_v28 = vld [vmem:[#allocation2 + $0x110] sm:$0xff] }
 0x23a   : > { %v2843_v19 = vld [vmem:[#allocation2 + $0x111] sm:$0xff]  ;;  %v2014_v13 = vmax.f32 %v1954_v35, 0.0  ;;  %v1957_v14 = vadd.f32 %v5533_v37, %v1796_v44  ;;  %v2737_v51 = vpack.c.bf16 %v2715_v28, %v2714_v7 }
 0x23b   : > { %v2970_v11 = vld [vmem:[#allocation2 + $0x10a] sm:$0xff]  ;;  %v2187_v36 = vpop.permute.xlu1 %2186  ;;  %v2865_v33 = vpack.c.bf16 %v2843_v19, %v2842_v9  ;;  %v2971_v15 = vld [vmem:[#allocation2 + $0x112] sm:$0xff] }
 0x23c   : > { %2233 = vst.msk [vmem:[#allocation3 + $0x18] sm:$0xff] %vm635_vm3, %v2187_v36  ;;  %v2993_v30 = vpack.c.bf16 %v2971_v15, %v2970_v11  ;;  %v2015_v50 = vmax.f32 %v1957_v14, 0.0  ;;  %2778 = vrot.lane.b32.xlu0 %v2737_v51, %s6501_s23 }
 0x23d   : > { %2046 = vst.msk [vmem:[#allocation2 + $0x121] sm:$0xff] %vm352_vm0, %v2014_v13  ;;  %2460 = vrot.lane.b32.xlu1 %v2737_v51, %s4698_s14  ;;  %2115 = vst.msk [vmem:[#allocation3 + $0x108] sm:$0xff] %vm352_vm0, %v2737_v51 }
 0x23e   : > { %2562 = vst.msk [vmem:[#allocation3 + $0xf8] sm:$0xff] %vm352_vm0, %v2865_v33  ;;  %3009 = vst.msk [vmem:[#allocation3 + $0xe8] sm:$0xff] %vm352_vm0, %v2993_v30  ;;  %v4218_v37 = vpop.f32.mrb[48].mxu0 }
 0x23f   : > { %2047 = vst.msk [vmem:[#allocation2 + $0x129] sm:$0xff] %vm352_vm0, %v2015_v50  ;;  %v2315_v16 = vpop.permute.xlu1 %2314  ;;  %v4219_v6 = vpop.f32.mrb[49].mxu0  ;;  %v3016_v35 = vld [vmem:[#allocation3] sm:$0xff] }
 0x240   : > { %2361 = vst.msk [vmem:[#allocation3 + $0x18] sm:$0xff] %vm764_vm4, %v2315_v16  ;;  %v4220_v60 = vadd.f32 %v4219_v6, %v4218_v37  ;;  %v4221_v62 = vpop.f32.mrb[50].mxu0  ;;  %2906 = vrot.lane.b32.xlu0 %v2865_v33, %s4698_s14  ;;  %v4593_v16 = vld [vmem:[%s6483_s3 + $0x88] sm:$0xff]  }
 0x241   : > { %2206 = vrot.lane.b32.xlu1 %v2865_v33, %s6502_s20  ;;  %v4222_v18 = vpop.f32.mrb[51].mxu0 }
 0x242   : > { %v1801_v20 = vadd.f32 %v4220_v60, %v5540_v41  ;;  %v4223_v21 = vadd.f32 %v4222_v18, %v4221_v62  ;;  %v2761_v22 = vpop.permute.xlu0 %2760 }
 0x243   : > { %v2443_v61 = vpop.permute.xlu1 %2442  ;;  %2808 = vst.msk [vmem:[#allocation3 + $0x8] sm:$0xff] %vm764_vm4, %v2761_v22 }
 0x244   : > { %2489 = vst.msk [vmem:[#allocation3 + $0x18] sm:$0xff] %vm893_vm5, %v2443_v61  ;;  %v1962_v54 = vadd.f32 %v5586_v42, %v1801_v20  ;;  %v1804_v24 = vadd.f32 %v4223_v21, %v5540_v41  ;;  %2652 = vrot.lane.b32.xlu0 %v2993_v30, %s6502_s20  ;;  %v2716_v31 = vld [vmem:[#allocation2 + $0x120] sm:$0xff] }
 0x245   : > { %v3045_v25 = vld [vmem:[#allocation3 + $0xe8] sm:$0xff]  ;;  %2334 = vrot.lane.b32.xlu1 %v2993_v30, %s6501_s23  ;;  %v2844_v23 = vld [vmem:[#allocation2 + $0x121] sm:$0xff] }
 0x246   : > { %4454 = vmatmul.mubr.msk.bf16.gmra.mrb[80].mxu0 %vm352_vm0, %v3045_v25  ;;  %v2717_v26 = vld [vmem:[#allocation2 + $0x128] sm:$0xff]  ;;  %v2016_v39 = vmax.f32 %v1962_v54, 0.0  ;;  %v1965_v4 = vadd.f32 %v5591_v57, %v1804_v24  ;;  %v2889_v40 = vpop.permute.xlu0 %2888  ;;  %v4592_v30 = vld [vmem:[%s6483_s3 + $0x80] sm:$0xff]  }
 0x247   : > { %v2845_v63 = vld [vmem:[#allocation2 + $0x129] sm:$0xff]  ;;  %v2189_v10 = vpop.permute.xlu1 %2188  ;;  %v2738_v42 = vpack.c.bf16 %v2717_v26, %v2716_v31  ;;  %2936 = vst.msk [vmem:[#allocation3 + $0x8] sm:$0xff] %vm893_vm5, %v2889_v40 }
 0x248   : > { %v2972_v29 = vld [vmem:[#allocation2 + $0x122] sm:$0xff]  ;;  %v2866_v32 = vpack.c.bf16 %v2845_v63, %v2844_v23  ;;  %v2973_v41 = vld [vmem:[#allocation2 + $0x12a] sm:$0xff]  ;;  %2234 = vst.msk [vmem:[#allocation3 + $0x30] sm:$0xff] %vm635_vm3, %v2189_v10  ;;  %v2017_v3 = vmax.f32 %v1965_v4, 0.0 }
 0x249   : > { %v2994_v43 = vpack.c.bf16 %v2973_v41, %v2972_v29  ;;  %2048 = vst.msk [vmem:[#allocation2 + $0x139] sm:$0xff] %vm352_vm0, %v2016_v39  ;;  %2780 = vrot.lane.b32.xlu0 %v2738_v42, %s6501_s23  ;;  %2462 = vrot.lane.b32.xlu1 %v2738_v42, %s4698_s14  ;;  %2116 = vst.msk [vmem:[#allocation3 + $0x120] sm:$0xff] %vm352_vm0, %v2738_v42 }
 0x24a   : > { %2563 = vst.msk [vmem:[#allocation3 + $0x110] sm:$0xff] %vm352_vm0, %v2866_v32  ;;  %2049 = vst.msk [vmem:[#allocation2 + $0x141] sm:$0xff] %vm352_vm0, %v2017_v3  ;;  %v4224_v57 = vpop.f32.mrb[52].mxu0  ;;  %v2635_v1 = vpop.permute.xlu0 %2634 }
 0x24b   : > { %3010 = vst.msk [vmem:[#allocation3 + $0x100] sm:$0xff] %vm352_vm0, %v2994_v43  ;;  %v2317_v45 = vpop.permute.xlu1 %2316  ;;  %v4225_v38 = vpop.f32.mrb[53].mxu0  ;;  %v3019_v23 = vld [vmem:[#allocation3 + $0x18] sm:$0xff] }
 0x24c   : > { %2681 = vst.msk [vmem:[#allocation3 + $0x20] sm:$0xff] %vm635_vm3, %v2635_v1  ;;  %v4226_v46 = vadd.f32 %v4225_v38, %v4224_v57  ;;  %v4227_v47 = vpop.f32.mrb[54].mxu0 }
 0x24d   : > { %2362 = vst.msk [vmem:[#allocation3 + $0x30] sm:$0xff] %vm764_vm4, %v2317_v45  ;;  %2908 = vrot.lane.b32.xlu0 %v2866_v32, %s4698_s14  ;;  %2208 = vrot.lane.b32.xlu1 %v2866_v32, %s6502_s20  ;;  %v4228_v12 = vpop.f32.mrb[55].mxu0 }
 0x24e   : > { %v1809_v53 = vadd.f32 %v5816_v52, %v4226_v46  ;;  %v4229_v55 = vadd.f32 %v4228_v12, %v4227_v47  ;;  %v2763_v17 = vpop.permute.xlu0 %2762  ;;  %v3017_v5 = vld [vmem:[#allocation3 + $0x8] sm:$0xff] }
 0x24f   : > { %2809 = vst.msk [vmem:[#allocation3 + $0x20] sm:$0xff] %vm764_vm4, %v2763_v17  ;;  %v2445_v34 = vpop.permute.xlu1 %2444  ;;  %3295 = vmatprep.mubr.bf16.mxu1 %v3017_v5 }
 0x250   : > { %v1970_v44 = vadd.f32 %v5581_v27, %v1809_v53  ;;  %v1812_v2 = vadd.f32 %v5816_v52, %v4229_v55  ;;  %2490 = vst.msk [vmem:[#allocation3 + $0x30] sm:$0xff] %vm893_vm5, %v2445_v34  ;;  %3296 = vmatmul.mubr.bf16.vlgmr.msra.gmra.mrb[32].mxu1 %v3016_v35  ;;  %v2718_v9 = vld [vmem:[#allocation2 + $0x138] sm:$0xff] }
 0x251   : > { %2654 = vrot.lane.b32.xlu0 %v2994_v43, %s6502_s20  ;;  %v2846_v28 = vld [vmem:[#allocation2 + $0x139] sm:$0xff]  ;;  %2336 = vrot.lane.b32.xlu1 %v2994_v43, %s6501_s23  ;;  %v2847_v11 = vld [vmem:[#allocation2 + $0x141] sm:$0xff] }
 0x252   : > { %v3048_v7 = vld [vmem:[#allocation3 + $0x100] sm:$0xff]  ;;  %v2719_v19 = vld [vmem:[#allocation2 + $0x140] sm:$0xff]  ;;  %v2018_v14 = vmax.f32 %v1970_v44, 0.0  ;;  %v1973_v27 = vadd.f32 %v5589_v49, %v1812_v2  ;;  %v2891_v36 = vpop.permute.xlu0 %2890  ;;  %v2867_v33 = vpack.c.bf16 %v2847_v11, %v2846_v28  ;;  %4493 = vmatpush3.bf16.msra.mxu1 %v4592_v30 }
 0x253   : > { %4457 = vmatprep.mubr.msk.bf16.mxu0 %vm352_vm0, %v3048_v7  ;;  %v2974_v13 = vld [vmem:[#allocation2 + $0x13a] sm:$0xff]  ;;  %v2739_v51 = vpack.c.bf16 %v2719_v19, %v2718_v9  ;;  %v2975_v15 = vld [vmem:[#allocation2 + $0x142] sm:$0xff]  ;;  %2937 = vst.msk [vmem:[#allocation3 + $0x20] sm:$0xff] %vm893_vm5, %v2891_v36  ;;  %v2191_v50 = vpop.permute.xlu1 %2190  ;;  %4492 = vmatprep.subr.bf16.mxu1 %v4593_v16 }
 0x254   : > { %v2995_v37 = vpack.c.bf16 %v2975_v15, %v2974_v13  ;;  %2050 = vst.msk [vmem:[#allocation2 + $0x151] sm:$0xff] %vm352_vm0, %v2018_v14  ;;  %v2019_v49 = vmax.f32 %v1973_v27, 0.0  ;;  %2564 = vst.msk [vmem:[#allocation3 + $0x128] sm:$0xff] %vm352_vm0, %v2867_v33 }
 0x255   : > { %2235 = vst.msk [vmem:[#allocation3 + $0x48] sm:$0xff] %vm635_vm3, %v2191_v50  ;;  %2782 = vrot.lane.b32.xlu0 %v2739_v51, %s6501_s23  ;;  %2464 = vrot.lane.b32.xlu1 %v2739_v51, %s4698_s14 }
 0x256   : > { %2117 = vst.msk [vmem:[#allocation3 + $0x138] sm:$0xff] %vm352_vm0, %v2739_v51  ;;  %3011 = vst.msk [vmem:[#allocation3 + $0x118] sm:$0xff] %vm352_vm0, %v2995_v37  ;;  %v4230_v6 = vpop.f32.mrb[56].mxu0  ;;  %v2637_v60 = vpop.permute.xlu0 %2636  ;;  %4494 = vmatpush3.bf16.msra.mxu1 %v4593_v16 }
 0x257   : > { %2051 = vst.msk [vmem:[#allocation2 + $0x159] sm:$0xff] %vm352_vm0, %v2019_v49  ;;  %v2319_v62 = vpop.permute.xlu1 %2318  ;;  %v4231_v18 = vpop.f32.mrb[57].mxu0  ;;  %v3022_v7 = vld [vmem:[#allocation3 + $0x30] sm:$0xff] }
 0x258   : > { %2682 = vst.msk [vmem:[#allocation3 + $0x38] sm:$0xff] %vm635_vm3, %v2637_v60  ;;  %v4232_v20 = vadd.f32 %v4231_v18, %v4230_v6  ;;  %v4233_v21 = vpop.f32.mrb[58].mxu0 }
 0x259   : > { %2363 = vst.msk [vmem:[#allocation3 + $0x48] sm:$0xff] %vm764_vm4, %v2319_v62  ;;  %2910 = vrot.lane.b32.xlu0 %v2867_v33, %s4698_s14  ;;  %2210 = vrot.lane.b32.xlu1 %v2867_v33, %s6502_s20  ;;  %v4234_v22 = vpop.f32.mrb[59].mxu0 }
 0x25a   : > { %v1817_v61 = vadd.f32 %v5816_v52, %v4232_v20  ;;  %v4235_v54 = vadd.f32 %v4234_v22, %v4233_v21  ;;  %v2765_v24 = vpop.permute.xlu0 %2764  ;;  %v3020_v25 = vld [vmem:[#allocation3 + $0x20] sm:$0xff] }
 0x25b   : > { %2810 = vst.msk [vmem:[#allocation3 + $0x38] sm:$0xff] %vm764_vm4, %v2765_v24  ;;  %v2447_v31 = vpop.permute.xlu1 %2446  ;;  %3303 = vmatprep.mubr.bf16.mxu1 %v3020_v25  ;;  %v2720_v39 = vld [vmem:[#allocation2 + $0x150] sm:$0xff] }
 0x25c   : > { %v1978_v26 = vadd.f32 %v5641_v48, %v1817_v61  ;;  %v1820_v63 = vadd.f32 %v5816_v52, %v4235_v54  ;;  %2491 = vst.msk [vmem:[#allocation3 + $0x48] sm:$0xff] %vm893_vm5, %v2447_v31  ;;  %3304 = vmatmul.mubr.bf16.gmra.mrb[36].mxu1 %v3019_v23  ;;  %v2848_v4 = vld [vmem:[#allocation2 + $0x151] sm:$0xff] }
 0x25d   : > { %v3051_v29 = vld [vmem:[#allocation3 + $0x118] sm:$0xff]  ;;  %2656 = vrot.lane.b32.xlu0 %v2995_v37, %s6502_s20  ;;  %2338 = vrot.lane.b32.xlu1 %v2995_v37, %s6501_s23 }
 0x25e   : > { %4458 = vmatmul.mubr.msk.bf16.gmra.mrb[84].mxu0 %vm352_vm0, %v3051_v29  ;;  %v2721_v40 = vld [vmem:[#allocation2 + $0x158] sm:$0xff]  ;;  %v2020_v32 = vmax.f32 %v1978_v26, 0.0  ;;  %v1981_v48 = vadd.f32 %v5646_v56, %v1820_v63  ;;  %v2893_v41 = vpop.permute.xlu0 %2892 }
 0x25f   : > { %v2849_v10 = vld [vmem:[#allocation2 + $0x159] sm:$0xff]  ;;  %v2740_v43 = vpack.c.bf16 %v2721_v40, %v2720_v39  ;;  %2938 = vst.msk [vmem:[#allocation3 + $0x38] sm:$0xff] %vm893_vm5, %v2893_v41  ;;  %v2193_v1 = vpop.permute.xlu1 %2192 }
 0x260   : > { %v2976_v42 = vld [vmem:[#allocation2 + $0x152] sm:$0xff]  ;;  %v2868_v3 = vpack.c.bf16 %v2849_v10, %v2848_v4  ;;  %v2977_v57 = vld [vmem:[#allocation2 + $0x15a] sm:$0xff]  ;;  %2052 = vst.msk [vmem:[#allocation2 + $0x169] sm:$0xff] %vm352_vm0, %v2020_v32  ;;  %v2021_v38 = vmax.f32 %v1981_v48, 0.0 }
 0x261   : > { %v2996_v45 = vpack.c.bf16 %v2977_v57, %v2976_v42  ;;  %2236 = vst.msk [vmem:[#allocation3 + $0x60] sm:$0xff] %vm635_vm3, %v2193_v1  ;;  %2784 = vrot.lane.b32.xlu0 %v2740_v43, %s6501_s23  ;;  %2466 = vrot.lane.b32.xlu1 %v2740_v43, %s4698_s14  ;;  %v2854_v40 = vld [vmem:[#allocation2 + $0x199] sm:$0xff]  ;;  %v2855_v10 = vld [vmem:[#allocation2 + $0x1a1] sm:$0xff] }
 0x262   : > { %2118 = vst.msk [vmem:[#allocation3 + $0x150] sm:$0xff] %vm352_vm0, %v2740_v43  ;;  %2565 = vst.msk [vmem:[#allocation3 + $0x140] sm:$0xff] %vm352_vm0, %v2868_v3  ;;  %v4236_v56 = vpop.f32.mrb[60].mxu0  ;;  %v2639_v46 = vpop.permute.xlu0 %2638  ;;  %v2871_v43 = vpack.c.bf16 %v2855_v10, %v2854_v40 }
 0x263   : > { %3012 = vst.msk [vmem:[#allocation3 + $0x130] sm:$0xff] %vm352_vm0, %v2996_v45  ;;  %2053 = vst.msk [vmem:[#allocation2 + $0x171] sm:$0xff] %vm352_vm0, %v2021_v38  ;;  %v2321_v47 = vpop.permute.xlu1 %2320  ;;  %v4237_v12 = vpop.f32.mrb[61].mxu0  ;;  %v3025_v18 = vld [vmem:[#allocation3 + $0x48] sm:$0xff] }
 0x264   : > { %2683 = vst.msk [vmem:[#allocation3 + $0x50] sm:$0xff] %vm635_vm3, %v2639_v46  ;;  %v4238_v53 = vadd.f32 %v4237_v12, %v4236_v56  ;;  %v4239_v55 = vpop.f32.mrb[62].mxu0 }
 0x265   : > { %2364 = vst.msk [vmem:[#allocation3 + $0x60] sm:$0xff] %vm764_vm4, %v2321_v47  ;;  %2912 = vrot.lane.b32.xlu0 %v2868_v3, %s4698_s14  ;;  %2212 = vrot.lane.b32.xlu1 %v2868_v3, %s6502_s20  ;;  %v4240_v17 = vpop.f32.mrb[63].mxu0 }
 0x266   : > { %v1825_v5 = vadd.f32 %v5816_v52, %v4238_v53  ;;  %v4241_v34 = vadd.f32 %v4240_v17, %v4239_v55  ;;  %v2767_v35 = vpop.permute.xlu0 %2766  ;;  %v3023_v44 = vld [vmem:[#allocation3 + $0x38] sm:$0xff] }
 0x267   : > { %2811 = vst.msk [vmem:[#allocation3 + $0x50] sm:$0xff] %vm764_vm4, %v2767_v35  ;;  %v2449_v2 = vpop.permute.xlu1 %2448  ;;  %3311 = vmatprep.mubr.bf16.mxu1 %v3023_v44  ;;  %v2722_v11 = vld [vmem:[#allocation2 + $0x168] sm:$0xff] }
 0x268   : > { %v1986_v9 = vadd.f32 %v5638_v8, %v1825_v5  ;;  %v1828_v28 = vadd.f32 %v5816_v52, %v4241_v34  ;;  %2492 = vst.msk [vmem:[#allocation3 + $0x60] sm:$0xff] %vm893_vm5, %v2449_v2  ;;  %3312 = vmatmul.mubr.bf16.gmra.mrb[40].mxu1 %v3022_v7  ;;  %v2850_v13 = vld [vmem:[#allocation2 + $0x169] sm:$0xff] }
 0x269   : > { %2658 = vrot.lane.b32.xlu0 %v2996_v45, %s6502_s20  ;;  %2340 = vrot.lane.b32.xlu1 %v2996_v45, %s6501_s23 }
 0x26a   : > { %v3054_v19 = vld [vmem:[#allocation3 + $0x130] sm:$0xff]  ;;  %v2723_v14 = vld [vmem:[#allocation2 + $0x170] sm:$0xff]  ;;  %v2022_v51 = vmax.f32 %v1986_v9, 0.0  ;;  %v1989_v8 = vadd.f32 %v5644_v59, %v1828_v28  ;;  %v2895_v33 = vpop.permute.xlu0 %2894 }
 0x26b   : > { %4461 = vmatprep.mubr.msk.bf16.mxu0 %vm352_vm0, %v3054_v19  ;;  %v2851_v27 = vld [vmem:[#allocation2 + $0x171] sm:$0xff]  ;;  %v2741_v52 = vpack.c.bf16 %v2723_v14, %v2722_v11  ;;  %2939 = vst.msk [vmem:[#allocation3 + $0x50] sm:$0xff] %vm893_vm5, %v2895_v33  ;;  %v2195_v50 = vpop.permute.xlu1 %2194 }
 0x26c   : > { %v2978_v36 = vld [vmem:[#allocation2 + $0x16a] sm:$0xff]  ;;  %v2869_v15 = vpack.c.bf16 %v2851_v27, %v2850_v13  ;;  %v2979_v30 = vld [vmem:[#allocation2 + $0x172] sm:$0xff]  ;;  %2054 = vst.msk [vmem:[#allocation2 + $0x181] sm:$0xff] %vm352_vm0, %v2022_v51  ;;  %v2023_v16 = vmax.f32 %v1989_v8, 0.0 }
 0x26d   : > { %v2997_v37 = vpack.c.bf16 %v2979_v30, %v2978_v36  ;;  %2237 = vst.msk [vmem:[#allocation3 + $0x78] sm:$0xff] %vm635_vm3, %v2195_v50  ;;  %2786 = vrot.lane.b32.xlu0 %v2741_v52, %s6501_s23  ;;  %2468 = vrot.lane.b32.xlu1 %v2741_v52, %s4698_s14 }
 0x26e   : > { %2119 = vst.msk [vmem:[#allocation3 + $0x168] sm:$0xff] %vm352_vm0, %v2741_v52  ;;  %2566 = vst.msk [vmem:[#allocation3 + $0x158] sm:$0xff] %vm352_vm0, %v2869_v15  ;;  %v2641_v59 = vpop.permute.xlu0 %2640 }
 0x26f   : > { %3013 = vst.msk [vmem:[#allocation3 + $0x148] sm:$0xff] %vm352_vm0, %v2997_v37  ;;  %2055 = vst.msk [vmem:[#allocation2 + $0x189] sm:$0xff] %vm352_vm0, %v2023_v16  ;;  %v2323_v49 = vpop.permute.xlu1 %2322  ;;  %v3028_v41 = vld [vmem:[#allocation3 + $0x60] sm:$0xff] }
 0x270   : > { %2684 = vst.msk [vmem:[#allocation3 + $0x68] sm:$0xff] %vm635_vm3, %v2641_v59 }
 0x271   : > { %2365 = vst.msk [vmem:[#allocation3 + $0x78] sm:$0xff] %vm764_vm4, %v2323_v49  ;;  %2914 = vrot.lane.b32.xlu0 %v2869_v15, %s4698_s14  ;;  %2214 = vrot.lane.b32.xlu1 %v2869_v15, %s6502_s20 }
 0x272   : > { %v2769_v6 = vpop.permute.xlu0 %2768  ;;  %v3026_v60 = vld [vmem:[#allocation3 + $0x50] sm:$0xff] }
 0x273   : > { %2812 = vst.msk [vmem:[#allocation3 + $0x68] sm:$0xff] %vm764_vm4, %v2769_v6  ;;  %v2451_v62 = vpop.permute.xlu1 %2450  ;;  %3319 = vmatprep.mubr.bf16.mxu1 %v3026_v60  ;;  %v2724_v21 = vld [vmem:[#allocation2 + $0x180] sm:$0xff] }
 0x274   : > { %2493 = vst.msk [vmem:[#allocation3 + $0x78] sm:$0xff] %vm893_vm5, %v2451_v62  ;;  %3320 = vmatmul.mubr.bf16.gmra.mrb[44].mxu1 %v3025_v18  ;;  %v2852_v22 = vld [vmem:[#allocation2 + $0x181] sm:$0xff] }
 0x275   : > { %2660 = vrot.lane.b32.xlu0 %v2997_v37, %s6502_s20  ;;  %2342 = vrot.lane.b32.xlu1 %v2997_v37, %s6501_s23 }
 0x276   : > { %v3057_v20 = vld [vmem:[#allocation3 + $0x148] sm:$0xff]  ;;  %v2725_v61 = vld [vmem:[#allocation2 + $0x188] sm:$0xff]  ;;  %v2897_v25 = vpop.permute.xlu0 %2896 }
 0x277   : > { %4462 = vmatmul.mubr.msk.bf16.gmra.mrb[88].mxu0 %vm352_vm0, %v3057_v20  ;;  %v2853_v54 = vld [vmem:[#allocation2 + $0x189] sm:$0xff]  ;;  %v2742_v31 = vpack.c.bf16 %v2725_v61, %v2724_v21  ;;  %2940 = vst.msk [vmem:[#allocation3 + $0x68] sm:$0xff] %vm893_vm5, %v2897_v25  ;;  %v2197_v63 = vpop.permute.xlu1 %2196 }
 0x278   : > { %v2598_v24 = vld [vmem:[#allocation2 + $0x182] sm:$0xff]  ;;  %v2870_v23 = vpack.c.bf16 %v2853_v54, %v2852_v22  ;;  %v2599_v26 = vld [vmem:[#allocation2 + $0x18a] sm:$0xff]  ;;  %2238 = vst.msk [vmem:[#allocation3 + $0x90] sm:$0xff] %vm635_vm3, %v2197_v63 }
 0x279   : > { %v2615_v29 = vpack.c.bf16 %v2599_v26, %v2598_v24  ;;  %2788 = vrot.lane.b32.xlu0 %v2742_v31, %s6501_s23  ;;  %2470 = vrot.lane.b32.xlu1 %v2742_v31, %s4698_s14  ;;  %s6404_s23 = scalar_lea.hbm %s6489_s9, %s4129_s28 }
 0x27a   : > { %2567 = vst.msk [vmem:[#allocation3 + $0x170] sm:$0xff] %vm352_vm0, %v2870_v23  ;;  %v2643_v39 = vpop.permute.xlu0 %2642 }
 0x27b   : > { %3014 = vst.msk [vmem:[#allocation3 + $0x160] sm:$0xff] %vm352_vm0, %v2615_v29  ;;  %v2325_v4 = vpop.permute.xlu1 %2324  ;;  %v3031_v47 = vld [vmem:[#allocation3 + $0x78] sm:$0xff] }
 0x27c   : > { %2685 = vst.msk [vmem:[#allocation3 + $0x80] sm:$0xff] %vm635_vm3, %v2643_v39 }
 0x27d   : > { %2366 = vst.msk [vmem:[#allocation3 + $0x90] sm:$0xff] %vm764_vm4, %v2325_v4  ;;  %2916 = vrot.lane.b32.xlu0 %v2870_v23, %s4698_s14 }
 0x27e   : > { %v2771_v42 = vpop.permute.xlu0 %2770  ;;  %v3029_v32 = vld [vmem:[#allocation3 + $0x68] sm:$0xff] }
 0x27f   : > { %2813 = vst.msk [vmem:[#allocation3 + $0x80] sm:$0xff] %vm764_vm4, %v2771_v42  ;;  %v2453_v48 = vpop.permute.xlu1 %2452  ;;  %3327 = vmatprep.mubr.bf16.mxu1 %v3029_v32 }
 0x280   : > { %2494 = vst.msk [vmem:[#allocation3 + $0x90] sm:$0xff] %vm893_vm5, %v2453_v48  ;;  %3328 = vmatmul.mubr.bf16.gmra.mrb[48].mxu1 %v3028_v41 }
 0x281   : > { %2662 = vrot.lane.b32.xlu0 %v2615_v29, %s6502_s20  ;;  %s4624_s20 = scalar_lea.vmem %s6408_s16, 4096 }
 0x282   : > { %v2899_v3 = vpop.permute.xlu0 %2898  ;;  %p4625_p6 = scmp.ne.s32.totalorder %s6408_s16, %s4624_s20  ;;  %p4632_p10 = scmp.lt.s32.totalorder %s4630_s26, %s4624_s20 }
 0x283   : > { %2941 = vst.msk [vmem:[#allocation3 + $0x80] sm:$0xff] %vm893_vm5, %v2899_v3  ;;  %v2199_v57 = vpop.permute.xlu1 %2198 }
 0x284   : > { %2239 = vst.msk [vmem:[#allocation3 + $0xa8] sm:$0xff] %vm635_vm3, %v2199_v57  ;;  %p4626_p12 = pnand %p4625_p6, %p6512_p11  ;;  %p4633_p0 = por %p4632_p10, %p4631_p8 }
 0x285   : > { %2918 = vrot.lane.b32.xlu0 %v2871_v43, %s4698_s14 }
 0x286   : > { %v2645_v1 = vpop.permute.xlu0 %2644  ;;  %p4627_p13 = pneg %p4626_p12 }
 0x287   : > { %2686 = vst.msk [vmem:[#allocation3 + $0x98] sm:$0xff] %vm635_vm3, %v2645_v1  ;;  %v2327_v45 = vpop.permute.xlu1 %2326  ;;  %v3034_v44 = vld [vmem:[#allocation3 + $0x90] sm:$0xff] }
 0x288   : > { %2367 = vst.msk [vmem:[#allocation3 + $0xa8] sm:$0xff] %vm764_vm4, %v2327_v45  ;;  %p4634_p2 = pnand %p4633_p0, %p4627_p13 }
 0x28a   : > { %v2773_v38 = vpop.permute.xlu0 %2772  ;;  %v3032_v56 = vld [vmem:[#allocation3 + $0x80] sm:$0xff] }
 0x28b   : > { %2814 = vst.msk [vmem:[#allocation3 + $0x98] sm:$0xff] %vm764_vm4, %v2773_v38  ;;  %v2455_v46 = vpop.permute.xlu1 %2454  ;;  %3335 = vmatprep.mubr.bf16.mxu1 %v3032_v56 }
 0x28c   : > { %2495 = vst.msk [vmem:[#allocation3 + $0xa8] sm:$0xff] %vm893_vm5, %v2455_v46  ;;  %3336 = vmatmul.mubr.bf16.gmra.mrb[52].mxu1 %v3031_v47 }
 0x28e   : > { %v2901_v12 = vpop.permute.xlu0 %2900 }
 0x28f   : > { %2942 = vst.msk [vmem:[#allocation3 + $0x98] sm:$0xff] %vm893_vm5, %v2901_v12  ;;  %v2201_v53 = vpop.permute.xlu1 %2200 }
 0x290   : > { %2240 = vst.msk [vmem:[#allocation3 + $0xc0] sm:$0xff] %vm635_vm3, %v2201_v53 }
 0x292   : > { %v2647_v55 = vpop.permute.xlu0 %2646 }
 0x293   : > { %2687 = vst.msk [vmem:[#allocation3 + $0xb0] sm:$0xff] %vm635_vm3, %v2647_v55  ;;  %v2329_v17 = vpop.permute.xlu1 %2328  ;;  %v3037_v14 = vld [vmem:[#allocation3 + $0xa8] sm:$0xff] }
 0x294   : > { %2368 = vst.msk [vmem:[#allocation3 + $0xc0] sm:$0xff] %vm764_vm4, %v2329_v17 }
 0x296   : > { %v2775_v5 = vpop.permute.xlu0 %2774  ;;  %v3035_v34 = vld [vmem:[#allocation3 + $0x98] sm:$0xff] }
 0x297   : > { %2815 = vst.msk [vmem:[#allocation3 + $0xb0] sm:$0xff] %vm764_vm4, %v2775_v5  ;;  %v2457_v35 = vpop.permute.xlu1 %2456  ;;  %3343 = vmatprep.mubr.bf16.mxu1 %v3035_v34 }
 0x298   : > { %2496 = vst.msk [vmem:[#allocation3 + $0xc0] sm:$0xff] %vm893_vm5, %v2457_v35  ;;  %3344 = vmatmul.mubr.bf16.gmra.mrb[56].mxu1 %v3034_v44 }
 0x29a   : > { %v2903_v2 = vpop.permute.xlu0 %2902 }
 0x29b   : > { %2943 = vst.msk [vmem:[#allocation3 + $0xb0] sm:$0xff] %vm893_vm5, %v2903_v2  ;;  %v2203_v7 = vpop.permute.xlu1 %2202 }
 0x29c   : > { %2241 = vst.msk [vmem:[#allocation3 + $0xd8] sm:$0xff] %vm635_vm3, %v2203_v7 }
 0x29e   : > { %v2649_v9 = vpop.permute.xlu0 %2648 }
 0x29f   : > { %2688 = vst.msk [vmem:[#allocation3 + $0xc8] sm:$0xff] %vm635_vm3, %v2649_v9  ;;  %v2331_v28 = vpop.permute.xlu1 %2330  ;;  %v3040_v30 = vld [vmem:[#allocation3 + $0xc0] sm:$0xff] }
 0x2a0   : > { %2369 = vst.msk [vmem:[#allocation3 + $0xd8] sm:$0xff] %vm764_vm4, %v2331_v28 }
 0x2a2   : > { %v2777_v19 = vpop.permute.xlu0 %2776  ;;  %v3038_v11 = vld [vmem:[#allocation3 + $0xb0] sm:$0xff] }
 0x2a3   : > { %2816 = vst.msk [vmem:[#allocation3 + $0xc8] sm:$0xff] %vm764_vm4, %v2777_v19  ;;  %v2459_v13 = vpop.permute.xlu1 %2458  ;;  %3351 = vmatprep.mubr.bf16.mxu1 %v3038_v11 }
 0x2a4   : > { %2497 = vst.msk [vmem:[#allocation3 + $0xd8] sm:$0xff] %vm893_vm5, %v2459_v13  ;;  %3352 = vmatmul.mubr.bf16.gmra.mrb[60].mxu1 %v3037_v14 }
 0x2a6   : > { %v2905_v27 = vpop.permute.xlu0 %2904 }
 0x2a7   : > { %2944 = vst.msk [vmem:[#allocation3 + $0xc8] sm:$0xff] %vm893_vm5, %v2905_v27  ;;  %v2205_v36 = vpop.permute.xlu1 %2204 }
 0x2a8   : > { %2242 = vst.msk [vmem:[#allocation3 + $0xf0] sm:$0xff] %vm635_vm3, %v2205_v36 }
 0x2aa   : > { %v2651_v51 = vpop.permute.xlu0 %2650 }
 0x2ab   : > { %2689 = vst.msk [vmem:[#allocation3 + $0xe0] sm:$0xff] %vm635_vm3, %v2651_v51  ;;  %v2333_v8 = vpop.permute.xlu1 %2332  ;;  %v3043_v22 = vld [vmem:[#allocation3 + $0xd8] sm:$0xff] }
 0x2ac   : > { %2370 = vst.msk [vmem:[#allocation3 + $0xf0] sm:$0xff] %vm764_vm4, %v2333_v8 }
 0x2ae   : > { %v2779_v33 = vpop.permute.xlu0 %2778  ;;  %v3041_v52 = vld [vmem:[#allocation3 + $0xc8] sm:$0xff] }
 0x2af   : > { %2817 = vst.msk [vmem:[#allocation3 + $0xe0] sm:$0xff] %vm764_vm4, %v2779_v33  ;;  %v2461_v15 = vpop.permute.xlu1 %2460  ;;  %3359 = vmatprep.mubr.bf16.mxu1 %v3041_v52 }
 0x2b0   : > { %2498 = vst.msk [vmem:[#allocation3 + $0xf0] sm:$0xff] %vm893_vm5, %v2461_v15  ;;  %3360 = vmatmul.mubr.bf16.gmra.mrb[64].mxu1 %v3040_v30  ;;  %v3060_v15 = vld [vmem:[#allocation3 + $0x160] sm:$0xff] }
 0x2b2   : > { %v2907_v50 = vpop.permute.xlu0 %2906 }
 0x2b3   : > { %2945 = vst.msk [vmem:[#allocation3 + $0xe0] sm:$0xff] %vm893_vm5, %v2907_v50  ;;  %v2207_v37 = vpop.permute.xlu1 %2206 }
 0x2b4   : > { %2243 = vst.msk [vmem:[#allocation3 + $0x108] sm:$0xff] %vm635_vm3, %v2207_v37  ;;  %v3063_v37 = vld [vmem:[#allocation3 + $0x178] sm:$0xff] }
 0x2b6   : > { %v2653_v16 = vpop.permute.xlu0 %2652 }
 0x2b7   : > { %2690 = vst.msk [vmem:[#allocation3 + $0xf8] sm:$0xff] %vm635_vm3, %v2653_v16  ;;  %v2335_v59 = vpop.permute.xlu1 %2334  ;;  %v3046_v63 = vld [vmem:[#allocation3 + $0xf0] sm:$0xff] }
 0x2b8   : > { %2371 = vst.msk [vmem:[#allocation3 + $0x108] sm:$0xff] %vm764_vm4, %v2335_v59  ;;  %v5936_v49 = vpop.f32.mrb[64].mxu0 }
 0x2b9   : > { %v5938_v6 = vpop.f32.mrb[65].mxu0 }
 0x2ba   : > { %v5940_v60 = vpop.f32.mrb[66].mxu0  ;;  %v3044_v18 = vld [vmem:[#allocation3 + $0xe0] sm:$0xff] }
 0x2bb   : > { %v2781_v62 = vpop.permute.xlu0 %2780  ;;  %v5942_v20 = vpop.f32.mrb[67].mxu0  ;;  %3367 = vmatprep.mubr.bf16.mxu1 %v3044_v18 }
 0x2bc   : > { %2818 = vst.msk [vmem:[#allocation3 + $0xf8] sm:$0xff] %vm764_vm4, %v2781_v62  ;;  %v2463_v21 = vpop.permute.xlu1 %2462  ;;  %3368 = vmatmul.mubr.bf16.gmra.mrb[68].mxu1 %v3043_v22  ;;  %v6012_v22 = vld [vmem:[%s6484_s4] ss:$0 sm:$0xff] }
 0x2bd   : > { %2499 = vst.msk [vmem:[#allocation3 + $0x108] sm:$0xff] %vm893_vm5, %v2463_v21 }
 0x2bf   : > { %v2909_v61 = vpop.permute.xlu0 %2908 }
 0x2c0   : > { %2946 = vst.msk [vmem:[#allocation3 + $0xf8] sm:$0xff] %vm893_vm5, %v2909_v61  ;;  %v2209_v54 = vpop.permute.xlu1 %2208 }
 0x2c1   : > { %2244 = vst.msk [vmem:[#allocation3 + $0x120] sm:$0xff] %vm635_vm3, %v2209_v54 }
 0x2c3   : > { %v2655_v24 = vpop.permute.xlu0 %2654 }
 0x2c4   : > { %2691 = vst.msk [vmem:[#allocation3 + $0x110] sm:$0xff] %vm635_vm3, %v2655_v24  ;;  %v2337_v25 = vpop.permute.xlu1 %2336  ;;  %v3049_v57 = vld [vmem:[#allocation3 + $0x108] sm:$0xff] }
 0x2c5   : > { %2372 = vst.msk [vmem:[#allocation3 + $0x120] sm:$0xff] %vm764_vm4, %v2337_v25 }
 0x2c7   : > { %v2783_v31 = vpop.permute.xlu0 %2782  ;;  %v3047_v23 = vld [vmem:[#allocation3 + $0xf8] sm:$0xff] }
 0x2c8   : > { %2819 = vst.msk [vmem:[#allocation3 + $0x110] sm:$0xff] %vm764_vm4, %v2783_v31  ;;  %v2465_v26 = vpop.permute.xlu1 %2464  ;;  %3375 = vmatprep.mubr.bf16.mxu1 %v3047_v23 }
 0x2c9   : > { %2500 = vst.msk [vmem:[#allocation3 + $0x120] sm:$0xff] %vm893_vm5, %v2465_v26  ;;  %3376 = vmatmul.mubr.bf16.gmra.mrb[72].mxu1 %v3046_v63 }
 0x2cb   : > { %v2911_v29 = vpop.permute.xlu0 %2910 }
 0x2cc   : > { %2947 = vst.msk [vmem:[#allocation3 + $0x110] sm:$0xff] %vm893_vm5, %v2911_v29  ;;  %v2211_v39 = vpop.permute.xlu1 %2210 }
 0x2cd   : > { %2245 = vst.msk [vmem:[#allocation3 + $0x138] sm:$0xff] %vm635_vm3, %v2211_v39 }
 0x2cf   : > { %v2657_v4 = vpop.permute.xlu0 %2656 }
 0x2d0   : > { %2692 = vst.msk [vmem:[#allocation3 + $0x128] sm:$0xff] %vm635_vm3, %v2657_v4  ;;  %v2339_v40 = vpop.permute.xlu1 %2338  ;;  %v5956_v10 = vpop.f32.mrb[68].mxu0  ;;  %v3052_v53 = vld [vmem:[#allocation3 + $0x120] sm:$0xff] }
 0x2d1   : > { %2373 = vst.msk [vmem:[#allocation3 + $0x138] sm:$0xff] %vm764_vm4, %v2339_v40  ;;  %v5958_v42 = vpop.f32.mrb[69].mxu0 }
 0x2d2   : > { %v5960_v32 = vpop.f32.mrb[70].mxu0 }
 0x2d3   : > { %v2785_v48 = vpop.permute.xlu0 %2784  ;;  %v3050_v41 = vld [vmem:[#allocation3 + $0x110] sm:$0xff]  ;;  %v5962_v43 = vpop.f32.mrb[71].mxu0 }
 0x2d4   : > { %2820 = vst.msk [vmem:[#allocation3 + $0x128] sm:$0xff] %vm764_vm4, %v2785_v48  ;;  %v2467_v3 = vpop.permute.xlu1 %2466  ;;  %3383 = vmatprep.mubr.bf16.mxu1 %v3050_v41 }
 0x2d5   : > { %2501 = vst.msk [vmem:[#allocation3 + $0x138] sm:$0xff] %vm893_vm5, %v2467_v3  ;;  %3384 = vmatmul.mubr.bf16.gmra.mrb[76].mxu1 %v3049_v57 }
 0x2d7   : > { %v2913_v1 = vpop.permute.xlu0 %2912 }
 0x2d8   : > { %2948 = vst.msk [vmem:[#allocation3 + $0x128] sm:$0xff] %vm893_vm5, %v2913_v1  ;;  %v2213_v45 = vpop.permute.xlu1 %2212 }
 0x2d9   : > { %2246 = vst.msk [vmem:[#allocation3 + $0x150] sm:$0xff] %vm635_vm3, %v2213_v45 }
 0x2db   : > { %v2659_v38 = vpop.permute.xlu0 %2658 }
 0x2dc   : > { %2693 = vst.msk [vmem:[#allocation3 + $0x140] sm:$0xff] %vm635_vm3, %v2659_v38  ;;  %v2341_v56 = vpop.permute.xlu1 %2340  ;;  %v3055_v11 = vld [vmem:[#allocation3 + $0x138] sm:$0xff] }
 0x2dd   : > { %2374 = vst.msk [vmem:[#allocation3 + $0x150] sm:$0xff] %vm764_vm4, %v2341_v56 }
 0x2df   : > { %v2787_v46 = vpop.permute.xlu0 %2786  ;;  %v3053_v47 = vld [vmem:[#allocation3 + $0x128] sm:$0xff] }
 0x2e0   : > { %2821 = vst.msk [vmem:[#allocation3 + $0x140] sm:$0xff] %vm764_vm4, %v2787_v46  ;;  %v2469_v12 = vpop.permute.xlu1 %2468  ;;  %3391 = vmatprep.mubr.bf16.mxu1 %v3053_v47 }
 0x2e1   : > { %2502 = vst.msk [vmem:[#allocation3 + $0x150] sm:$0xff] %vm893_vm5, %v2469_v12  ;;  %3392 = vmatmul.mubr.bf16.gmra.mrb[80].mxu1 %v3052_v53 }
 0x2e3   : > { %v2915_v55 = vpop.permute.xlu0 %2914 }
 0x2e4   : > { %2949 = vst.msk [vmem:[#allocation3 + $0x140] sm:$0xff] %vm893_vm5, %v2915_v55  ;;  %v2215_v17 = vpop.permute.xlu1 %2214 }
 0x2e5   : > { %2247 = vst.msk [vmem:[#allocation3 + $0x168] sm:$0xff] %vm635_vm3, %v2215_v17 }
 0x2e7   : > { %v2661_v5 = vpop.permute.xlu0 %2660 }
 0x2e8   : > { %2694 = vst.msk [vmem:[#allocation3 + $0x158] sm:$0xff] %vm635_vm3, %v2661_v5  ;;  %v2343_v34 = vpop.permute.xlu1 %2342  ;;  %v5976_v35 = vpop.f32.mrb[72].mxu0  ;;  %v3058_v51 = vld [vmem:[#allocation3 + $0x150] sm:$0xff] }
 0x2e9   : > { %2375 = vst.msk [vmem:[#allocation3 + $0x168] sm:$0xff] %vm764_vm4, %v2343_v34  ;;  %v5978_v44 = vpop.f32.mrb[73].mxu0 }
 0x2ea   : > { %v5980_v2 = vpop.f32.mrb[74].mxu0 }
 0x2eb   : > { %v2789_v7 = vpop.permute.xlu0 %2788  ;;  %v3056_v9 = vld [vmem:[#allocation3 + $0x140] sm:$0xff]  ;;  %v5982_v28 = vpop.f32.mrb[75].mxu0 }
 0x2ec   : > { %2822 = vst.msk [vmem:[#allocation3 + $0x158] sm:$0xff] %vm764_vm4, %v2789_v7  ;;  %v2471_v19 = vpop.permute.xlu1 %2470  ;;  %3399 = vmatprep.mubr.bf16.mxu1 %v3056_v9 }
 0x2ed   : > { %2503 = vst.msk [vmem:[#allocation3 + $0x168] sm:$0xff] %vm893_vm5, %v2471_v19  ;;  %3400 = vmatmul.mubr.bf16.gmra.mrb[84].mxu1 %v3055_v11 }
 0x2ef   : > { %v2917_v13 = vpop.permute.xlu0 %2916 }
 0x2f0   : > { %2950 = vst.msk [vmem:[#allocation3 + $0x158] sm:$0xff] %vm893_vm5, %v2917_v13 }
 0x2f3   : > { %v2663_v14 = vpop.permute.xlu0 %2662 }
 0x2f4   : > { %2695 = vst.msk [vmem:[#allocation3 + $0x170] sm:$0xff] %vm635_vm3, %v2663_v14  ;;  %v3061_v33 = vld [vmem:[#allocation3 + $0x168] sm:$0xff] }
 0x2f5   : > { %2823 = vst.msk [vmem:[#allocation3 + $0x170] sm:$0xff] %vm764_vm4, %v5763_v58 }
 0x2f7   : > { %v2919_v27 = vpop.permute.xlu0 %2918  ;;  %v3059_v36 = vld [vmem:[#allocation3 + $0x158] sm:$0xff] }
 0x2f8   : > { %2951 = vst.msk [vmem:[#allocation3 + $0x170] sm:$0xff] %vm893_vm5, %v2919_v27  ;;  %3407 = vmatprep.mubr.bf16.mxu1 %v3059_v36 }
 0x2f9   : > { %3408 = vmatmul.mubr.bf16.gmra.mrb[88].mxu1 %v3058_v51 }
 0x2ff   : > { %v3062_v8 = vld [vmem:[#allocation3 + $0x170] sm:$0xff] }
 0x300   : > { %3415 = vmatprep.mubr.bf16.mxu1 %v3062_v8  ;;  %v5991_v52 = vpop.f32.mrb[76].mxu0 }
 0x301   : > { %3416 = vmatmul.mubr.bf16.gmra.mrb[92].mxu1 %v3061_v33  ;;  %v5993_v30 = vpop.f32.mrb[77].mxu0 }
 0x302   : > { %4465 = vmatprep.mubr.msk.bf16.mxu1 %vm352_vm0, %v3060_v15  ;;  %v5996_v50 = vpop.f32.mrb[78].mxu0 }
 0x303   : > { %v5998_v58 = vpop.f32.mrb[79].mxu0 }
 0x309   : > { %4466 = vmatmul.mubr.msk.bf16.vlgmr.msra.gmra.mrb[96].mxu1 %vm352_vm0, %v3063_v37 }
 0x30a   : > { %4477 = vmatprep.mubr.msk.f32.mxu1 %vm4700_vm6, %v4695_v0 }
 0x319   : > { %v6001_v16 = vpop.f32.mrb[80].mxu0 }
 0x31a   : > { %v6003_v59 = vpop.f32.mrb[81].mxu0 }
 0x31b   : > { %v6005_v62 = vpop.f32.mrb[82].mxu0 }
 0x31c   : > { %v6007_v18 = vpop.f32.mrb[83].mxu0 }
 0x323   : > { %v4276_v21 = vpop.f32.mrb[32].mxu1 }
 0x324   : > { %v4277_v61 = vpop.f32.mrb[33].mxu1 }
 0x325   : > { %v4278_v54 = vadd.f32 %v4277_v61, %v4276_v21  ;;  %v4279_v24 = vpop.f32.mrb[34].mxu1 }
 0x326   : > { %v4280_v25 = vpop.f32.mrb[35].mxu1 }
 0x327   : > { %v3298_v31 = vadd.f32 %v4278_v54, %v6012_v22  ;;  %v4281_v23 = vadd.f32 %v4280_v25, %v4279_v24 }
 0x329   : > { %v6016_v26 = vadd.f32 %v5938_v6, %v3298_v31  ;;  %v3301_v63 = vadd.f32 %v4281_v23, %v6012_v22 }
 0x32b   : > { %v6020_v29 = vadd.f32 %v5942_v20, %v3301_v63 }
 0x32f   : > { %v4282_v39 = vpop.f32.mrb[36].mxu1 }
 0x330   : > { %v4283_v40 = vpop.f32.mrb[37].mxu1 }
 0x331   : > { %v6022_v4 = vpop.f32.mrb[84].mxu0  ;;  %v4284_v48 = vadd.f32 %v4283_v40, %v4282_v39  ;;  %v4285_v3 = vpop.f32.mrb[38].mxu1 }
 0x332   : > { %v6024_v41 = vpop.f32.mrb[85].mxu0  ;;  %v4286_v1 = vpop.f32.mrb[39].mxu1 }
 0x333   : > { %v6026_v57 = vpop.f32.mrb[86].mxu0  ;;  %v3306_v45 = vadd.f32 %v4284_v48, %v6012_v22  ;;  %v4287_v6 = vadd.f32 %v4286_v1, %v4285_v3 }
 0x334   : > { %v6029_v38 = vpop.f32.mrb[87].mxu0 }
 0x335   : > { %v6032_v56 = vadd.f32 %v5936_v49, %v3306_v45  ;;  %v3309_v20 = vadd.f32 %v4287_v6, %v6012_v22 }
 0x337   : > { %v6036_v46 = vadd.f32 %v5940_v60, %v3309_v20 }
 0x33b   : > { %v4288_v47 = vpop.f32.mrb[40].mxu1 }
 0x33c   : > { %v4289_v12 = vpop.f32.mrb[41].mxu1 }
 0x33d   : > { %v4290_v53 = vadd.f32 %v4289_v12, %v4288_v47  ;;  %v4291_v55 = vpop.f32.mrb[42].mxu1 }
 0x33e   : > { %v4292_v17 = vpop.f32.mrb[43].mxu1 }
 0x33f   : > { %v3314_v5 = vadd.f32 %v4290_v53, %v6012_v22  ;;  %v4293_v34 = vadd.f32 %v4292_v17, %v4291_v55  ;;  %v3656_v17 = vld [vmem:[%s6485_s5] sm:$0xff] }
 0x341   : > { %v6040_v7 = vadd.f32 %v5958_v42, %v3314_v5  ;;  %v3317_v9 = vadd.f32 %v4293_v34, %v6012_v22  ;;  %v3657_v5 = vld [vmem:[%s6485_s5 + $0x8] sm:$0xff] }
 0x343   : > { %v6044_v49 = vadd.f32 %v5962_v43, %v3317_v9 }
 0x347   : > { %v4294_v19 = vpop.f32.mrb[44].mxu1 }
 0x348   : > { %v4295_v60 = vpop.f32.mrb[45].mxu1 }
 0x349   : > { %v4296_v13 = vadd.f32 %v4295_v60, %v4294_v19  ;;  %v4297_v27 = vpop.f32.mrb[46].mxu1  ;;  %v4699_v60 = vmov 0.0|0.0  }
 0x34a   : > { %v6046_v11 = vpop.f32.mrb[88].mxu0  ;;  %v4298_v51 = vpop.f32.mrb[47].mxu1  ;;  %4485 = vmatprep.subr.bf16.mxu1 %v4699_v60 }
 0x34b   : > { %v6048_v14 = vpop.f32.mrb[89].mxu0  ;;  %v3322_v8 = vadd.f32 %v4296_v13, %v6012_v22  ;;  %v4299_v42 = vadd.f32 %v4298_v51, %v4297_v27  ;;  %v3659_v13 = vld [vmem:[%s6485_s5 + $0x18] sm:$0xff] }
 0x34c   : > { %v6050_v36 = vpop.f32.mrb[90].mxu0 }
 0x34d   : > { %v6053_v33 = vpop.f32.mrb[91].mxu0  ;;  %v6056_v15 = vadd.f32 %v5956_v10, %v3322_v8  ;;  %v3325_v43 = vadd.f32 %v4299_v42, %v6012_v22 }
 0x34f   : > { %v6060_v37 = vadd.f32 %v5960_v32, %v3325_v43 }
 0x353   : > { %v4300_v21 = vpop.f32.mrb[48].mxu1 }
 0x354   : > { %v4301_v61 = vpop.f32.mrb[49].mxu1 }
 0x355   : > { %v4302_v54 = vadd.f32 %v4301_v61, %v4300_v21  ;;  %v4303_v24 = vpop.f32.mrb[50].mxu1 }
 0x356   : > { %v4304_v25 = vpop.f32.mrb[51].mxu1 }
 0x357   : > { %v3330_v31 = vadd.f32 %v4302_v54, %v6012_v22  ;;  %v4305_v23 = vadd.f32 %v4304_v25, %v4303_v24 }
 0x359   : > { %v6064_v63 = vadd.f32 %v5978_v44, %v3330_v31  ;;  %v3333_v39 = vadd.f32 %v4305_v23, %v6012_v22 }
 0x35b   : > { %v6068_v10 = vadd.f32 %v5982_v28, %v3333_v39 }
 0x35f   : > { %v4306_v40 = vpop.f32.mrb[52].mxu1 }
 0x360   : > { %v4307_v48 = vpop.f32.mrb[53].mxu1 }
 0x361   : > { %v4308_v32 = vadd.f32 %v4307_v48, %v4306_v40  ;;  %v4309_v3 = vpop.f32.mrb[54].mxu1 }
 0x362   : > { %v4310_v1 = vpop.f32.mrb[55].mxu1 }
 0x363   : > { %v3338_v45 = vadd.f32 %v4308_v32, %v6012_v22  ;;  %v4311_v6 = vadd.f32 %v4310_v1, %v4309_v3 }
 0x365   : > { %v6072_v20 = vadd.f32 %v5976_v35, %v3338_v45  ;;  %v3341_v47 = vadd.f32 %v4311_v6, %v6012_v22  ;;  %v4486_v35 = vpack.c.bf16 %v3657_v5, %v3656_v17 }
 0x367   : > { %v6076_v44 = vadd.f32 %v5980_v2, %v3341_v47  ;;  %4487 = vmatpush3.bf16.msra.mxu1 %v4486_v35  ;;  %v3658_v2 = vld [vmem:[%s6485_s5 + $0x10] sm:$0xff] }
 0x368   : > { %4488 = vmatprep.subr.bf16.mxu1 %v4699_v60  ;;  %v4489_v8 = vpack.c.bf16 %v3659_v13, %v3658_v2  ;;  %v3592_v60 = vsel %vm352_vm0, %v6040_v7, 0.0 }
 0x36b   : > { %v4312_v12 = vpop.f32.mrb[56].mxu1  ;;  %4490 = vmatpush3.bf16.msra.mxu1 %v4489_v8 }
 0x36c   : > { %v4313_v53 = vpop.f32.mrb[57].mxu1  ;;  %4480 = vmatprep.subr.mxu1 %v4695_v0 }
 0x36d   : > { %v4314_v28 = vadd.f32 %v4313_v53, %v4312_v12  ;;  %v4315_v55 = vpop.f32.mrb[58].mxu1  ;;  %v3585_v12 = vsel %vm352_vm0, %v6016_v26, 0.0  ;;  %v3588_v53 = vsel %vm352_vm0, %v6032_v56, 0.0 }
 0x36e   : > { %v4316_v34 = vpop.f32.mrb[59].mxu1 }
 0x36f   : > { %v3346_v9 = vadd.f32 %v4314_v28, %v6012_v22  ;;  %v4317_v19 = vadd.f32 %v4316_v34, %v4315_v55 }
 0x371   : > { %v6092_v27 = vadd.f32 %v5993_v30, %v3346_v9  ;;  %v3349_v51 = vadd.f32 %v4317_v19, %v6012_v22 }
 0x373   : > { %v6098_v42 = vadd.f32 %v5998_v58, %v3349_v51 }
 0x377   : > { %v4318_v43 = vpop.f32.mrb[60].mxu1 }
 0x378   : > { %v4319_v21 = vpop.f32.mrb[61].mxu1 }
 0x379   : > { %v4320_v61 = vadd.f32 %v4319_v21, %v4318_v43  ;;  %v4321_v54 = vpop.f32.mrb[62].mxu1  ;;  %v3594_v21 = vsel %vm352_vm0, %v6044_v49, 0.0 }
 0x37a   : > { %v4322_v30 = vpop.f32.mrb[63].mxu1 }
 0x37b   : > { %v3354_v24 = vadd.f32 %v4320_v61, %v6012_v22  ;;  %v4323_v25 = vadd.f32 %v4322_v30, %v4321_v54  ;;  %v3596_v61 = vsel %vm352_vm0, %v6056_v15, 0.0 }
 0x37d   : > { %v6103_v31 = vadd.f32 %v5991_v52, %v3354_v24  ;;  %v3357_v23 = vadd.f32 %v4323_v25, %v6012_v22 }
 0x37f   : > { %v6107_v39 = vadd.f32 %v5996_v50, %v3357_v23  ;;  %v3586_v50 = vsel %vm352_vm0, %v6020_v29, 0.0 }
 0x380   : > { %v3587_v55 = vadd.f32 %v3586_v50, %v3585_v12  ;;  %v3602_v12 = vsel %vm352_vm0, %v6068_v10, 0.0 }
 0x382   : > { %v3589_v34 = vadd.f32 %v3588_v53, %v3587_v55  ;;  %v3604_v53 = vsel %vm352_vm0, %v6072_v20, 0.0 }
 0x383   : > { %v4324_v58 = vpop.f32.mrb[64].mxu1 }
 0x384   : > { %v4325_v40 = vpop.f32.mrb[65].mxu1 }
 0x385   : > { %v4326_v48 = vadd.f32 %v4325_v40, %v4324_v58  ;;  %v4327_v32 = vpop.f32.mrb[66].mxu1  ;;  %v3598_v40 = vsel %vm352_vm0, %v6060_v37, 0.0 }
 0x386   : > { %v4328_v3 = vpop.f32.mrb[67].mxu1 }
 0x387   : > { %v3362_v1 = vadd.f32 %v4326_v48, %v6012_v22  ;;  %v4329_v45 = vadd.f32 %v4328_v3, %v4327_v32  ;;  %v3600_v32 = vsel %vm352_vm0, %v6064_v63, 0.0 }
 0x389   : > { %v6111_v6 = vadd.f32 %v6003_v59, %v3362_v1  ;;  %v3365_v47 = vadd.f32 %v4329_v45, %v6012_v22 }
 0x38b   : > { %v6115_v52 = vadd.f32 %v6007_v18, %v3365_v47  ;;  %v3590_v18 = vsel %vm352_vm0, %v6036_v46, 0.0 }
 0x38c   : > { %v3591_v51 = vadd.f32 %v3590_v18, %v3589_v34 }
 0x38e   : > { %v3593_v43 = vadd.f32 %v3592_v60, %v3591_v51 }
 0x38f   : > { %v4330_v28 = vpop.f32.mrb[68].mxu1 }
 0x390   : > { %v4331_v17 = vpop.f32.mrb[69].mxu1  ;;  %v3595_v30 = vadd.f32 %v3594_v21, %v3593_v43  ;;  %v3610_v21 = vsel %vm352_vm0, %v6098_v42, 0.0 }
 0x391   : > { %v4332_v5 = vadd.f32 %v4331_v17, %v4330_v28  ;;  %v4333_v59 = vpop.f32.mrb[70].mxu1 }
 0x392   : > { %v4334_v35 = vpop.f32.mrb[71].mxu1 }
 0x393   : > { %v3370_v9 = vadd.f32 %v4332_v5, %v6012_v22  ;;  %v4335_v19 = vadd.f32 %v4334_v35, %v4333_v59  ;;  %v3606_v35 = vsel %vm352_vm0, %v6076_v44, 0.0 }
 0x395   : > { %v6129_v2 = vadd.f32 %v6001_v16, %v3370_v9  ;;  %v3373_v13 = vadd.f32 %v4335_v19, %v6012_v22  ;;  %v3597_v16 = vadd.f32 %v3596_v61, %v3595_v30  ;;  %v3608_v9 = vsel %vm352_vm0, %v6092_v27, 0.0 }
 0x396   : > { %v3612_v61 = vsel %vm352_vm0, %v6103_v31, 0.0 }
 0x397   : > { %v6133_v8 = vadd.f32 %v6005_v62, %v3373_v13  ;;  %v3599_v45 = vadd.f32 %v3598_v40, %v3597_v16 }
 0x399   : > { %v3601_v50 = vadd.f32 %v3600_v32, %v3599_v45 }
 0x39b   : > { %v3603_v55 = vadd.f32 %v3602_v12, %v3601_v50  ;;  %v3618_v12 = vsel %vm352_vm0, %v6115_v52, 0.0 }
 0x39c   : > { %v4336_v54 = vpop.f32.mrb[72].mxu1 }
 0x39d   : > { %v4337_v24 = vpop.f32.mrb[73].mxu1 }
 0x39e   : > { %v4338_v25 = vadd.f32 %v4337_v24, %v4336_v54  ;;  %v4339_v23 = vpop.f32.mrb[74].mxu1 }
 0x39f   : > { %v4340_v58 = vpop.f32.mrb[75].mxu1 }
 0x3a0   : > { %v3378_v62 = vadd.f32 %v4338_v25, %v6012_v22  ;;  %v4341_v48 = vadd.f32 %v4340_v58, %v4339_v23  ;;  %v3614_v58 = vsel %vm352_vm0, %v6107_v39, 0.0 }
 0x3a2   : > { %v6145_v3 = vadd.f32 %v6024_v41, %v3378_v62  ;;  %v3381_v1 = vadd.f32 %v4341_v48, %v6012_v22  ;;  %v3605_v41 = vadd.f32 %v3604_v53, %v3603_v55  ;;  %v3616_v62 = vsel %vm352_vm0, %v6111_v6, 0.0 }
 0x3a3   : > { %v3620_v53 = vsel %vm352_vm0, %v6129_v2, 0.0 }
 0x3a4   : > { %v6149_v47 = vadd.f32 %v6029_v38, %v3381_v1  ;;  %v3607_v13 = vadd.f32 %v3606_v35, %v3605_v41 }
 0x3a6   : > { %v3609_v43 = vadd.f32 %v3608_v9, %v3607_v13 }
 0x3a8   : > { %v4342_v28 = vpop.f32.mrb[76].mxu1  ;;  %v3611_v30 = vadd.f32 %v3610_v21, %v3609_v43  ;;  %v3626_v21 = vsel %vm352_vm0, %v6149_v47, 0.0 }
 0x3a9   : > { %v4343_v17 = vpop.f32.mrb[77].mxu1 }
 0x3aa   : > { %v4344_v5 = vadd.f32 %v4343_v17, %v4342_v28  ;;  %v4345_v59 = vpop.f32.mrb[78].mxu1 }
 0x3ab   : > { %v4346_v34 = vpop.f32.mrb[79].mxu1 }
 0x3ac   : > { %v3386_v38 = vadd.f32 %v4344_v5, %v6012_v22  ;;  %v4347_v18 = vadd.f32 %v4346_v34, %v4345_v59  ;;  %v3622_v34 = vsel %vm352_vm0, %v6133_v8, 0.0 }
 0x3ae   : > { %v6161_v19 = vadd.f32 %v6022_v4, %v3386_v38  ;;  %v3389_v60 = vadd.f32 %v4347_v18, %v6012_v22  ;;  %v3613_v4 = vadd.f32 %v3612_v61, %v3611_v30  ;;  %v3624_v38 = vsel %vm352_vm0, %v6145_v3, 0.0 }
 0x3b0   : > { %v6165_v51 = vadd.f32 %v6026_v57, %v3389_v60  ;;  %v3615_v1 = vadd.f32 %v3614_v58, %v3613_v4  ;;  %v3628_v61 = vsel %vm352_vm0, %v6161_v19, 0.0 }
 0x3b2   : > { %v3617_v50 = vadd.f32 %v3616_v62, %v3615_v1 }
 0x3b4   : > { %v4348_v54 = vpop.f32.mrb[80].mxu1  ;;  %v3619_v55 = vadd.f32 %v3618_v12, %v3617_v50 }
 0x3b5   : > { %v4349_v24 = vpop.f32.mrb[81].mxu1 }
 0x3b6   : > { %v4350_v25 = vadd.f32 %v4349_v24, %v4348_v54  ;;  %v4351_v23 = vpop.f32.mrb[82].mxu1 }
 0x3b7   : > { %v4352_v16 = vpop.f32.mrb[83].mxu1 }
 0x3b8   : > { %v3394_v57 = vadd.f32 %v4350_v25, %v6012_v22  ;;  %v4353_v40 = vadd.f32 %v4352_v16, %v4351_v23  ;;  %v3630_v16 = vsel %vm352_vm0, %v6165_v51, 0.0 }
 0x3ba   : > { %v6177_v48 = vadd.f32 %v6048_v14, %v3394_v57  ;;  %v3397_v32 = vadd.f32 %v4353_v40, %v6012_v22  ;;  %v3621_v14 = vadd.f32 %v3620_v53, %v3619_v55 }
 0x3bc   : > { %v6181_v45 = vadd.f32 %v6053_v33, %v3397_v32  ;;  %v3623_v60 = vadd.f32 %v3622_v34, %v3621_v14 }
 0x3be   : > { %v3625_v43 = vadd.f32 %v3624_v38, %v3623_v60  ;;  %v3634_v1 = vsel %vm352_vm0, %v6181_v45, 0.0 }
 0x3c0   : > { %v4354_v28 = vpop.f32.mrb[84].mxu1  ;;  %v3627_v30 = vadd.f32 %v3626_v21, %v3625_v43 }
 0x3c1   : > { %v4355_v17 = vpop.f32.mrb[85].mxu1 }
 0x3c2   : > { %v4356_v5 = vadd.f32 %v4355_v17, %v4354_v28  ;;  %v4357_v59 = vpop.f32.mrb[86].mxu1 }
 0x3c3   : > { %v4358_v41 = vpop.f32.mrb[87].mxu1 }
 0x3c4   : > { %v3402_v33 = vadd.f32 %v4356_v5, %v6012_v22  ;;  %v4359_v35 = vadd.f32 %v4358_v41, %v4357_v59 }
 0x3c6   : > { %v6193_v18 = vadd.f32 %v6046_v11, %v3402_v33  ;;  %v3405_v9 = vadd.f32 %v4359_v35, %v6012_v22  ;;  %v3629_v11 = vadd.f32 %v3628_v61, %v3627_v30 }
 0x3c8   : > { %v6197_v13 = vadd.f32 %v6050_v36, %v3405_v9  ;;  %v3632_v36 = vsel %vm352_vm0, %v6177_v48, 0.0  ;;  %v3631_v57 = vadd.f32 %v3630_v16, %v3629_v11  ;;  %v3636_v28 = vsel %vm352_vm0, %v6193_v18, 0.0 }
 0x3ca   : > { %v3633_v62 = vadd.f32 %v3632_v36, %v3631_v57  ;;  %v3638_v34 = vsel %vm352_vm0, %v6197_v13, 0.0 }
 0x3cc   : > { %v4360_v54 = vpop.f32.mrb[88].mxu1  ;;  %v3635_v17 = vadd.f32 %v3634_v1, %v3633_v62 }
 0x3cd   : > { %v4361_v24 = vpop.f32.mrb[89].mxu1 }
 0x3ce   : > { %v4362_v25 = vadd.f32 %v4361_v24, %v4360_v54  ;;  %v4363_v23 = vpop.f32.mrb[90].mxu1  ;;  %v3637_v59 = vadd.f32 %v3636_v28, %v3635_v17 }
 0x3cf   : > { %v4364_v4 = vpop.f32.mrb[91].mxu1 }
 0x3d0   : > { %v4365_v58 = vadd.f32 %v4364_v4, %v4363_v23  ;;  %v3410_v41 = vadd.f32 %v4362_v25, %v6012_v22  ;;  %v3639_v21 = vadd.f32 %v3638_v34, %v3637_v59 }
 0x3d2   : > { %v3413_v43 = vadd.f32 %v4365_v58, %v6012_v22 }
 0x3d4   : > { %v4366_v40 = vpop.f32.mrb[92].mxu1 }
 0x3d5   : > { %v4367_v32 = vpop.f32.mrb[93].mxu1 }
 0x3d6   : > { %v4368_v50 = vadd.f32 %v4367_v32, %v4366_v40  ;;  %v4369_v12 = vpop.f32.mrb[94].mxu1 }
 0x3d7   : > { %v4370_v53 = vpop.f32.mrb[95].mxu1 }
 0x3d8   : > { %v4371_v55 = vadd.f32 %v4370_v53, %v4369_v12  ;;  %v3418_v5 = vadd.f32 %v4368_v50, %v6012_v22  ;;  %v3735_v12 = vld [vmem:[%s6487_s7] sm:$0xf] }
 0x3d9   : > { %v3660_v53 = vld [vmem:[%s6486_s6] sm:$0x1] }
 0x3da   : > { %v3421_v38 = vadd.f32 %v4371_v55, %v6012_v22 }
 0x3dc   : > { %v4467_v14 = vpop.f32.mrb[96].mxu1 }
 0x3dd   : > { %v6215_v33 = vadd.f32 %v4467_v14, %v3418_v5  ;;  %v3570_v35 = vpop.f32.mrb[97].mxu1 }
 0x3de   : > { %v6218_v9 = vadd.f32 %v3570_v35, %v3410_v41  ;;  %v4468_v60 = vpop.f32.mrb[98].mxu1 }
 0x3df   : > { %v6221_v61 = vadd.f32 %v4468_v60, %v3421_v38  ;;  %v3573_v54 = vpop.f32.mrb[99].mxu1  ;;  %v3644_v4 = vsel %vm352_vm0, %v6215_v33, 0.0  ;;  %v3821_v60 = vlaneseq }
 0x3e0   : > { %v3640_v30 = vsel %vm352_vm0, %v6218_v9, 0.0  ;;  %v6225_v24 = vadd.f32 %v3573_v54, %v3413_v43 }
 0x3e1   : > { %v3641_v25 = vadd.f32 %v3640_v30, %v3639_v21  ;;  %v3646_v22 = vsel %vm352_vm0, %v6221_v61, 0.0  ;;  %v3822_v43 = vshrl.u32 %v3821_v60, 7  ;;  %v3877_v60 = vld [vmem:[%s4864_s19 + $0xa0] sm:$0xff] }
 0x3e2   : > { %v3642_v23 = vsel %vm352_vm0, %v6225_v24, 0.0 }
 0x3e3   : > { %v3643_v11 = vadd.f32 %v3642_v23, %v3641_v25  ;;  %v3823_v21 = vsub.s32 0, %v3822_v43  ;;  %v3879_v43 = vld [vmem:[%s4864_s19 + $0xb0] sm:$0xff] }
 0x3e5   : > { %v3645_v16 = vadd.f32 %v3644_v4, %v3643_v11 }
 0x3e7   : > { %v3647_v58 = vadd.f32 %v3646_v22, %v3645_v16 }
 0x3e9   : > { %v3648_v36 = vrot.slane %v3647_v58, 4 }
 0x3eb   : > { %v3649_v57 = vadd.f32 %v3648_v36, %v3647_v58 }
 0x3ed   : > { %v3650_v40 = vrot.slane %v3649_v57, 2 }
 0x3ef   : > { %v3651_v62 = vadd.f32 %v3650_v40, %v3649_v57  ;;  %v3857_v57 = vld [vmem:[%s4864_s19] sm:$0xff]  ;;  %v3860_v40 = vld [vmem:[%s4864_s19 + $0x18] sm:$0xff] }
 0x3f1   : > { %v3652_v32 = vrot.slane %v3651_v62, 1 }
 0x3f3   : > { %v3653_v1 = vadd.f32 %v3652_v32, %v3651_v62  ;;  %v3864_v32 = vld [vmem:[%s4864_s19 + $0x38] sm:$0xff] }
 0x3f5   : > { %v3655_v50 = vmul.f32 0.00390625, %v3653_v1 }
 0x3f7   : > { %4478 = vmatmul.mubr.msk.f32.vlgmr.msra.gmra.mrb[100].mxu1 %vm352_vm0, %v3655_v50 }
 0x3f8   : > { %4482 = vmatprep.mubr.msk.f32.mxu1 %vm4700_vm6, %v4695_v0  ;;  %4481 = vmatpush3.msk.msra.mxu1 %vm3741_vm7, %v3735_v12  ;;  %v3736_v0 = vld [vmem:[%s6488_s8] sm:$0x1] }
 0x3f9   : > { %v3867_v12 = vld [vmem:[%s4864_s19 + $0x50] sm:$0xff] }
 0x4ca   : > { %v3730_v28 = vpop.f32.mrb[100].mxu1 }
 0x4cb   : > { %v3731_v55 = vadd.f32 %v3730_v28, %v3660_v53  ;;  %v4479_v17 = vpop.f32.mrb[101].mxu1  ;;  %v3869_v28 = vld [vmem:[%s4864_s19 + $0x60] sm:$0xff] }
 0x4cd   : > { %v3734_v5 = vmax.f32 %v3731_v55, 0.0  ;;  %v3870_v55 = vld [vmem:[%s4864_s19 + $0x68] sm:$0xff] }
 0x4cf   : > { %4483 = vmatmul.mubr.msk.f32.vlgmr.msra.gmra.mrb[102].mxu1 %vm3737_vm8, %v3734_v5  ;;  %v3872_v5 = vld [vmem:[%s4864_s19 + $0x78] sm:$0xff] }
 0x5a2   : > { %v3811_v59 = vpop.f32.mrb[102].mxu1 }
 0x5a3   : > { %v3812_v14 = vadd.f32 %v3811_v59, %v3736_v0  ;;  %v4484_v41 = vpop.f32.mrb[103].mxu1  ;;  %v3873_v0 = vld [vmem:[%s4864_s19 + $0x80] sm:$0xff] }
 0x5a4   : > { %v3876_v41 = vld [vmem:[%s4864_s19 + $0x98] sm:$0xff] }
 0x5a5   : > { %v4122_v34 = vmul.f32 -1.442695, %v3812_v14  ;;  %v3875_v14 = vld [vmem:[%s4864_s19 + $0x90] sm:$0xff] }
 0x5a7   : > { %4587 = vpow2.f32 %v4122_v34 }
 0x5b1   : > { %v4588_v35 = vpop.eup %4587 }
 0x5b2   : > { %v3818_v38 = vadd.f32 1.0, %v4588_v35 }
 0x5b4   : > { %4589 = vrcp.f32 %v3818_v38 }
 0x5be   : > { %v4590_v54 = vpop.eup %4589 }
 0x5bf   : > { %v3824_v30 = vrot.slane %v4590_v54, %v3823_v21 }
 0x5c1   : > { %v3825_v25 = vmul.f32 %v3824_v30, %v6016_v26  ;;  %v3826_v23 = vmul.f32 %v3824_v30, %v6020_v29  ;;  %v3827_v11 = vmul.f32 %v3824_v30, %v6032_v56  ;;  %v3828_v4 = vmul.f32 %v3824_v30, %v6036_v46 }
 0x5c2   : > { %v3829_v16 = vmul.f32 %v3824_v30, %v6040_v7  ;;  %v3830_v22 = vmul.f32 %v3824_v30, %v6044_v49  ;;  %v3831_v58 = vmul.f32 %v3824_v30, %v6056_v15  ;;  %v3832_v36 = vmul.f32 %v3824_v30, %v6060_v37  ;;  %v3858_v7 = vld [vmem:[%s4864_s19 + $0x8] sm:$0xff]  ;;  %v3859_v49 = vld [vmem:[%s4864_s19 + $0x10] sm:$0xff] }
 0x5c3   : > { %v3833_v26 = vmul.f32 %v3824_v30, %v6064_v63  ;;  %v3834_v29 = vmul.f32 %v3824_v30, %v6068_v10  ;;  %v3835_v56 = vmul.f32 %v3824_v30, %v6072_v20  ;;  %v3836_v46 = vmul.f32 %v3824_v30, %v6076_v44  ;;  %v3861_v10 = vld [vmem:[%s4864_s19 + $0x20] sm:$0xff]  ;;  %v3862_v20 = vld [vmem:[%s4864_s19 + $0x28] sm:$0xff]  ;;  %v3863_v44 = vld [vmem:[%s4864_s19 + $0x30] sm:$0xff] }
 0x5c4   : > { %v3837_v15 = vmul.f32 %v3824_v30, %v6092_v27  ;;  %v3838_v37 = vmul.f32 %v3824_v30, %v6098_v42  ;;  %v3839_v62 = vmul.f32 %v3824_v30, %v6103_v31  ;;  %v3840_v63 = vmul.f32 %v3824_v30, %v6107_v39  ;;  %v3865_v31 = vld [vmem:[%s4864_s19 + $0x40] sm:$0xff]  ;;  %v3866_v39 = vld [vmem:[%s4864_s19 + $0x48] sm:$0xff] }
 0x5c5   : > { %v6270_v1 = vmul.f32 %v3824_v30, %v6111_v6  ;;  %v6273_v50 = vmul.f32 %v3824_v30, %v6115_v52  ;;  %v6276_v27 = vmul.f32 %v3824_v30, %v6129_v2  ;;  %v6279_v42 = vmul.f32 %v3824_v30, %v6133_v8  ;;  %v3868_v8 = vld [vmem:[%s4864_s19 + $0x58] sm:$0xff] }
 0x5c6   : > { %v6285_v53 = vmul.f32 %v3824_v30, %v6145_v3  ;;  %v6288_v6 = vmul.f32 %v3824_v30, %v6149_v47  ;;  %v6291_v52 = vmul.f32 %v3824_v30, %v6161_v19  ;;  %v6294_v2 = vmul.f32 %v3824_v30, %v6165_v51  ;;  %v3871_v51 = vld [vmem:[%s4864_s19 + $0x70] sm:$0xff] }
 0x5c7   : > { %v6300_v17 = vmul.f32 %v3824_v30, %v6177_v48  ;;  %v6303_v3 = vmul.f32 %v3824_v30, %v6181_v45  ;;  %v6306_v47 = vmul.f32 %v3824_v30, %v6193_v18  ;;  %v6309_v19 = vmul.f32 %v3824_v30, %v6197_v13  ;;  %v3874_v13 = vld [vmem:[%s4864_s19 + $0x88] sm:$0xff] }
 0x5c8   : > { %v6315_v59 = vmul.f32 %v3824_v30, %v6218_v9  ;;  %v6318_v48 = vmul.f32 %v3824_v30, %v6225_v24  ;;  %v6321_v45 = vmul.f32 %v3824_v30, %v6215_v33  ;;  %v6324_v18 = vmul.f32 %v3824_v30, %v6221_v61  ;;  %v3878_v24 = vld [vmem:[%s4864_s19 + $0xa8] sm:$0xff]  ;;  %v3880_v30 = vld [vmem:[%s4864_s19 + $0xb8] sm:$0xff] }
 0x5c9   : > { %v3889_v34 = vadd.f32 %v3857_v57, %v3825_v25  ;;  %v3890_v35 = vadd.f32 %v3858_v7, %v3826_v23  ;;  %v3891_v38 = vadd.f32 %v3859_v49, %v3827_v11  ;;  %v3892_v9 = vadd.f32 %v3860_v40, %v3828_v4  ;;  %v3883_v11 = vld [vmem:[%s4864_s19 + $0xd0] sm:$0xff]  ;;  %v3884_v4 = vld [vmem:[%s4864_s19 + $0xd8] sm:$0xff] }
 0x5ca   : > { %6503 = vst [vmem:[#allocation10_spill] sm:$0xff] %v6315_v59  ;;  %6504 = vst [vmem:[#allocation11_spill] sm:$0xff] %v6318_v48  ;;  %v3893_v21 = vadd.f32 %v3861_v10, %v3829_v16  ;;  %v3894_v33 = vadd.f32 %v3862_v20, %v3830_v22  ;;  %v3895_v54 = vadd.f32 %v3863_v44, %v3831_v58  ;;  %v3887_v16 = vld [vmem:[%s4864_s19 + $0xf0] sm:$0xff] }
 0x5cb   : > { %6505 = vst [vmem:[#allocation12_spill] sm:$0xff] %v6321_v45  ;;  %6506 = vst [vmem:[#allocation13_spill] sm:$0xff] %v6324_v18  ;;  %v3896_v61 = vadd.f32 %v3864_v32, %v3832_v36  ;;  %v3881_v18 = vld [vmem:[%s4864_s19 + $0xc0] sm:$0xff]  ;;  %v3882_v45 = vld [vmem:[%s4864_s19 + $0xc8] sm:$0xff]  ;;  %v3897_v48 = vadd.f32 %v3865_v31, %v3833_v26  ;;  %v3898_v59 = vadd.f32 %v3866_v39, %v3834_v29 }
 0x5cc   : > { %v3899_v25 = vadd.f32 %v3867_v12, %v3835_v56  ;;  %v3900_v23 = vadd.f32 %v3868_v8, %v3836_v46  ;;  %3921 = vst.msk [vmem:[%s6337_s24] sm:$0xff] %vm352_vm0, %v3889_v34  ;;  %3922 = vst.msk [vmem:[%s6337_s24 + $0x8] sm:$0xff] %vm352_vm0, %v3890_v35  ;;  %v3901_v22 = vadd.f32 %v3869_v28, %v3837_v15  ;;  %v3885_v29 = vld [vmem:[%s4864_s19 + $0xe0] sm:$0xff]  ;;  %v3888_v56 = vld [vmem:[%s4864_s19 + $0xf8] sm:$0xff] }
 0x5cd   : > { %3923 = vst.msk [vmem:[%s6337_s24 + $0x10] sm:$0xff] %vm352_vm0, %v3891_v38  ;;  %3924 = vst.msk [vmem:[%s6337_s24 + $0x18] sm:$0xff] %vm352_vm0, %v3892_v9  ;;  %v3902_v58 = vadd.f32 %v3870_v55, %v3838_v37  ;;  %v3903_v36 = vadd.f32 %v3871_v51, %v3839_v62  ;;  %v3904_v26 = vadd.f32 %v3872_v5, %v3840_v63  ;;  %v3886_v46 = vld [vmem:[%s4864_s19 + $0xe8] sm:$0xff] }
 0x5ce   : > { %3925 = vst.msk [vmem:[%s6337_s24 + $0x20] sm:$0xff] %vm352_vm0, %v3893_v21  ;;  %3926 = vst.msk [vmem:[%s6337_s24 + $0x28] sm:$0xff] %vm352_vm0, %v3894_v33  ;;  %v3905_v57 = vadd.f32 %v3873_v0, %v6270_v1  ;;  %v3906_v7 = vadd.f32 %v3874_v13, %v6273_v50  ;;  %v3907_v49 = vadd.f32 %v3875_v14, %v6276_v27 }
 0x5cf   : > { %3927 = vst.msk [vmem:[%s6337_s24 + $0x30] sm:$0xff] %vm352_vm0, %v3895_v54  ;;  %3928 = vst.msk [vmem:[%s6337_s24 + $0x38] sm:$0xff] %vm352_vm0, %v3896_v61  ;;  %v3908_v40 = vadd.f32 %v3876_v41, %v6279_v42  ;;  %v3909_v15 = vadd.f32 %v3877_v60, %v6285_v53  ;;  %v3910_v37 = vadd.f32 %v3878_v24, %v6288_v6 }
 0x5d0   : > { %3929 = vst.msk [vmem:[%s6337_s24 + $0x40] sm:$0xff] %vm352_vm0, %v3897_v48  ;;  %3930 = vst.msk [vmem:[%s6337_s24 + $0x48] sm:$0xff] %vm352_vm0, %v3898_v59  ;;  %v3911_v62 = vadd.f32 %v3879_v43, %v6291_v52  ;;  %v3912_v63 = vadd.f32 %v3880_v30, %v6294_v2  ;;  %v3913_v10 = vadd.f32 %v3881_v18, %v6300_v17 }
 0x5d1   : > { %3931 = vst.msk [vmem:[%s6337_s24 + $0x50] sm:$0xff] %vm352_vm0, %v3899_v25  ;;  %3932 = vst.msk [vmem:[%s6337_s24 + $0x58] sm:$0xff] %vm352_vm0, %v3900_v23  ;;  %v3914_v20 = vadd.f32 %v3882_v45, %v6303_v3  ;;  %v3915_v44 = vadd.f32 %v3883_v11, %v6306_v47  ;;  %v3916_v32 = vadd.f32 %v3884_v4, %v6309_v19  ;;  %v6508_v1 = vld [vmem:[#allocation10_spill] sm:$0xff]  ;;  %v6509_v27 = vld [vmem:[#allocation11_spill] sm:$0xff] }
 0x5d2   : > { %3933 = vst.msk [vmem:[%s6337_s24 + $0x60] sm:$0xff] %vm352_vm0, %v3901_v22  ;;  %3934 = vst.msk [vmem:[%s6337_s24 + $0x68] sm:$0xff] %vm352_vm0, %v3902_v58  ;;  %v3917_v50 = vadd.f32 %v3885_v29, %v6508_v1  ;;  %v3918_v42 = vadd.f32 %v3886_v46, %v6509_v27  ;;  %v6510_v31 = vld [vmem:[#allocation12_spill] sm:$0xff]  ;;  %v6511_v12 = vld [vmem:[#allocation13_spill] sm:$0xff] }
 0x5d3   : > { %3935 = vst.msk [vmem:[%s6337_s24 + $0x70] sm:$0xff] %vm352_vm0, %v3903_v36  ;;  %3936 = vst.msk [vmem:[%s6337_s24 + $0x78] sm:$0xff] %vm352_vm0, %v3904_v26  ;;  %v3919_v39 = vadd.f32 %v3887_v16, %v6510_v31  ;;  %v3920_v53 = vadd.f32 %v3888_v56, %v6511_v12 }
 0x5d4   : > { %3937 = vst.msk [vmem:[%s6337_s24 + $0x80] sm:$0xff] %vm352_vm0, %v3905_v57  ;;  %3938 = vst.msk [vmem:[%s6337_s24 + $0x88] sm:$0xff] %vm352_vm0, %v3906_v7 }
 0x5d5   : > { %3939 = vst.msk [vmem:[%s6337_s24 + $0x90] sm:$0xff] %vm352_vm0, %v3907_v49  ;;  %3940 = vst.msk [vmem:[%s6337_s24 + $0x98] sm:$0xff] %vm352_vm0, %v3908_v40 }
 0x5d6   : > { %3941 = vst.msk [vmem:[%s6337_s24 + $0xa0] sm:$0xff] %vm352_vm0, %v3909_v15  ;;  %3942 = vst.msk [vmem:[%s6337_s24 + $0xa8] sm:$0xff] %vm352_vm0, %v3910_v37 }
 0x5d7   : > { %3943 = vst.msk [vmem:[%s6337_s24 + $0xb0] sm:$0xff] %vm352_vm0, %v3911_v62  ;;  %3944 = vst.msk [vmem:[%s6337_s24 + $0xb8] sm:$0xff] %vm352_vm0, %v3912_v63 }
 0x5d8   : > { %3945 = vst.msk [vmem:[%s6337_s24 + $0xc0] sm:$0xff] %vm352_vm0, %v3913_v10  ;;  %3946 = vst.msk [vmem:[%s6337_s24 + $0xc8] sm:$0xff] %vm352_vm0, %v3914_v20 }
 0x5d9   : > { %3947 = vst.msk [vmem:[%s6337_s24 + $0xd0] sm:$0xff] %vm352_vm0, %v3915_v44  ;;  %3948 = vst.msk [vmem:[%s6337_s24 + $0xd8] sm:$0xff] %vm352_vm0, %v3916_v32 }
 0x5da   : > { %3949 = vst.msk [vmem:[%s6337_s24 + $0xe0] sm:$0xff] %vm352_vm0, %v3917_v50  ;;  %3950 = vst.msk [vmem:[%s6337_s24 + $0xe8] sm:$0xff] %vm352_vm0, %v3918_v42 }
 0x5db   : > { %3951 = vst.msk [vmem:[%s6337_s24 + $0xf0] sm:$0xff] %vm352_vm0, %v3919_v39  ;;  %3952 = vst.msk [vmem:[%s6337_s24 + $0xf8] sm:$0xff] %vm352_vm0, %v3920_v53 }
 0x5dc   : > { %4637 = shalt.err (!%p4634_p2)
}
 0x5dd   : > { %s4638_s25 = scalar_lea.hbm %s6404_s23, 4096  ;;  %s4642_s19 = scalar_lea.hbm %s6489_s9, 8192 }
 0x5de   : > { %p4639_p4 = scmp.ne.s32.totalorder %s6404_s23, %s4638_s25  ;;  %p4643_p9 = scmp.lt.u32.totalorder %s6404_s23, %s6489_s9 }
 0x5df   : > { %p4644_p1 = scmp.lt.u32.totalorder %s4642_s19, %s4638_s25  ;;  %p4646_p6 = scmp.lt.u32.totalorder %s4638_s25, %s6404_s23 }
 0x5e0   : > { %p4640_p5 = pnand %p4639_p4, %p6512_p11 }
 0x5e1   : > { %p4645_p3 = por %p4644_p1, %p4643_p9 }
 0x5e2   : > { %p4641_p7 = pneg %p4640_p5 }
 0x5e3   : > { %p4647_p12 = por %p4646_p6, %p4645_p3 }
 0x5e5   : > { %p4648_p13 = pnand %p4647_p12, %p4641_p7 }
 0x5e7   : > { %4651 = shalt.err (!%p4648_p13)
}
 0x5e8   : > { %s4702_s20 = smov 128   ;;  %s4703_s27 = smov 8  }
 0x5e9   : > { %4497 = dma.vmem_to_hbm [thread:$0]  (%p6512_p11), %s6408_s16, 4096, %s6404_s23, %s3954_s13, %s4702_s20, %s4702_s20, %s4703_s27  }
 0x5ea PF: > { %s3982_s26 = sand.u32 1, %s4678_s30   ;;  %p6513_p8 = scmp.ne.s32.totalorder %s6499_s22, 0 }
 0x5eb   : > { %p6514_p10 = scmp.ge.s32.totalorder %s4690_s12, 2  ;;  %s3983_s25 = scalar_lea.sflag [#allocation6], %s3982_s26 }
 0x5ed   : > { %p4504_p0 = pnand %p6514_p10, %p6513_p8 }
 0x5ef   : > { %4673 = dma.done.wait (!%p4504_p0), %s3983_s25, 4096  }
 0x5f0   : > { %4675 = vsyncadd (!%p4504_p0), %s3983_s25, 4294963200  ;;  %p22_p2 = scmp.ge.s32.totalorder %s4779_s15, 4   ;;  %s6515_s30 = smov %s4682_s10 }
 0x5f1   : > { %s6516_s10 = smov %s4686_s11  ;;  %s6517_s11 = smov %s4791_s18 }
 0x5f2   : > { %s6518_s12 = smov %s4779_s15  ;;  %24 = sbr.rel (!%p22_p2) target bundleno = 5 (0x5), region = 104 }
 0x5f9   :  { %3988 = vsyncpa [#allocation5], 1 }
 0x5fa   :  { %3990 = vsyncpa [#allocation5 + $0x1], 1 }
 0x5fb   :  { %3991 = vsyncpa [#allocation6], 1 }
 0x5fc   :  { %3993 = vsyncpa [#allocation6 + $0x1], 1 }

</bundles_post_ra>
